<compile_context>
chip_gen: v7x
topology: tpu7x:2x2x1
jax: 0.10.0
libtpu: 0.0.40
codegen_flags: <defaults>
</compile_context>

<pallas_src>
import numpy as np
import jax
import jax.numpy as jnp
from jax import lax
from jax.experimental import pallas as pl
from jax.experimental.pallas import tpu as pltpu
from jax.scipy.special import erf as erf_exact

FM = 16            # global from model.py
NUM_HEADS = 8      # CrossAttention default
MORPH_K = 3        # Block(blockNum=0) -> kernels[0] == 3
BN_EPS = 1e-5
LN_EPS = 1e-6


# ---------------------------------------------------------------------------
# In-kernel math helpers
# ---------------------------------------------------------------------------
def _erf_approx(x):
    # Abramowitz & Stegun 7.1.26 polynomial, |err| <= 1.5e-7 (f32-exact).
    a1, a2, a3, a4, a5 = (0.254829592, -0.284496736, 1.421413741,
                          -1.453152027, 1.061405429)
    p = 0.3275911
    s = jnp.where(x >= 0.0, 1.0, -1.0)
    z = jnp.abs(x)
    t = 1.0 / (1.0 + p * z)
    poly = ((((a5 * t + a4) * t + a3) * t + a2) * t + a1) * t
    return s * (1.0 - poly * jnp.exp(-z * z))


def _gelu(x):
    # exact (erf-based) GELU, matching nn.GELU() default
    return 0.5 * x * (1.0 + _erf_approx(x * 0.7071067811865476))


# ---------------------------------------------------------------------------
# Kernel 1: morphology (hard-max erosion/dilation) + conv/BN/GELU branch.
#   grid=(2,): program 0 = SpectralMorph branch, program 1 = SpatialMorph.
#   All tensors are lane-folded: last dim = B*H*W (=128).
#   m_ref[t] is a constant 0/1 matrix so that (X @ m[t])[c, l] equals the
#   zero-padded, spatially shifted value of X at tap t (this replaces im2col).
# ---------------------------------------------------------------------------
def _morph_branch_kernel(rest_ref, m_ref, we_ref, wd_ref,
                         wspec_ref, bspec_ref, wspat_ref, bspat_ref, out_ref):
    prog = pl.program_id(0)
    nc, bl = rest_ref.shape          # (2*FM, B*L)
    oc = bspec_ref.shape[0]          # FM
    ntaps = m_ref.shape[0]           # 9

    r = rest_ref[...]                # (NC, BL), loaded once

    def tap_body(t, carry):
        e_acc, d_acc = carry
        mt = m_ref[t].astype(jnp.float32)                              # (BL, BL)
        pt = jnp.dot(r, mt, preferred_element_type=jnp.float32)        # (NC, BL)
        we = we_ref[t]                                                 # (OC, NC)
        wd = wd_ref[t]                                                 # (OC, NC)
        for c in range(nc):                                            # static 32
            prb = jnp.broadcast_to(pt[c:c + 1, :], (oc, bl))
            e_acc = jnp.minimum(e_acc, prb - we[:, c:c + 1])           # erosion
            d_acc = jnp.maximum(d_acc, prb + wd[:, c:c + 1])           # dilation
        return e_acc, d_acc

    e0 = jnp.full((oc, bl), jnp.inf, dtype=jnp.float32)
    d0 = jnp.full((oc, bl), -jnp.inf, dtype=jnp.float32)
    e_acc, d_acc = lax.fori_loop(0, ntaps, tap_body, (e0, d0))
    ed = jnp.concatenate([e_acc, d_acc], axis=0)                       # (2*OC, BL)

    @pl.when(prog == 0)
    def _spectral():
        # two fused 1x1 convs (BN pre-folded) -> one (OC, 2*OC)x(2*OC, BL) matmul
        z = jnp.dot(wspec_ref[...], ed,
                    preferred_element_type=jnp.float32) + bspec_ref[...]
        out_ref[...] = _gelu(z)

    @pl.when(prog == 1)
    def _spatial():
        # two fused 3x3 convs (BN pre-folded), im2col done via the same m[t]
        def conv_body(t, acc):
            mt = m_ref[t].astype(jnp.float32)
            shifted = jnp.dot(ed, mt, preferred_element_type=jnp.float32)
            return acc + jnp.dot(wspat_ref[t], shifted,
                                 preferred_element_type=jnp.float32)
        z = lax.fori_loop(0, ntaps, conv_body,
                          jnp.zeros((oc, bl), jnp.float32)) + bspat_ref[...]
        out_ref[...] = _gelu(z)


# ---------------------------------------------------------------------------
# Kernel 2: LayerNorm + CrossAttention (cls query) + residual + cls LayerNorm.
#   grid=(B,): one batch element per program (2 TCs on v7x).  Head handling is
#   loop-free: hred (D, H) / hexp (H, D) are block-diagonal 0/1 matrices.
# ---------------------------------------------------------------------------
def _attn_kernel(x_ref, ga_ref, ba_ref, wq_ref, wk_ref, wv_ref,
                 wp_ref, bp_ref, gc_ref, bc_ref, hred_ref, hexp_ref, out_ref):
    n, d = x_ref.shape
    nh = hred_ref.shape[1]
    scale = float(d // nh) ** -0.5

    x = x_ref[...]                                                   # (N, D)
    mu = jnp.mean(x, axis=1, keepdims=True)
    xc = x - mu
    var = jnp.mean(xc * xc, axis=1, keepdims=True)
    xn = xc * lax.rsqrt(var + LN_EPS) * ga_ref[...] + ba_ref[...]

    q = jnp.dot(xn[0:1, :], wq_ref[...], preferred_element_type=jnp.float32)  # (1,D)
    k = jnp.dot(xn, wk_ref[...], preferred_element_type=jnp.float32)          # (N,D)
    v = jnp.dot(xn, wv_ref[...], preferred_element_type=jnp.float32)          # (N,D)

    s = k * jnp.broadcast_to(q, k.shape)                                      # (N,D)
    logits = jnp.dot(s, hred_ref[...],
                     preferred_element_type=jnp.float32) * scale              # (N,NH)
    m = jnp.max(logits, axis=0, keepdims=True)
    p = jnp.exp(logits - m)
    p = p * pl.reciprocal(jnp.sum(p, axis=0, keepdims=True), approx=True)
    pf = jnp.dot(p, hexp_ref[...], preferred_element_type=jnp.float32)        # (N,D)
    attn_out = jnp.sum(pf * v, axis=0, keepdims=True)                         # (1,D)

    proj = jnp.dot(attn_out, wp_ref[...],
                   preferred_element_type=jnp.float32) + bp_ref[...]          # (1,D)
    cls = proj + x[0:1, :]                       # residual with original cls token
    mu2 = jnp.mean(cls, axis=1, keepdims=True)
    cc = cls - mu2
    var2 = jnp.mean(cc * cc, axis=1, keepdims=True)
    out_ref[...] = cc * lax.rsqrt(var2 + LN_EPS) * gc_ref[...] + bc_ref[...]


# ---------------------------------------------------------------------------
# Glue
# ---------------------------------------------------------------------------
def _shift_select_matrices(B, H, W):
    """M[t, l_src, l_dst] = 1 iff the source pixel (h+dh, w+dw) of destination
    pixel (h, w) (tap t: dh=t//3-1, dw=t%3-1) lies inside the same batch image.
    Columns with no 1 implement the zero padding of fixed_padding / conv."""
    L = H * W
    M = np.zeros((9, B * L, B * L), dtype=np.int8)
    for t in range(9):
        dh, dw = t // 3 - 1, t % 3 - 1
        for b in range(B):
            for h in range(H):
                for w in range(W):
                    hh, ww = h + dh, w + dw
                    if 0 <= hh < H and 0 <= ww < W:
                        M[t, b * L + hh * W + ww, b * L + h * W + w] = 1
    return M


def _im2col_3x3(x):
    # Used only by the pure-JAX reference.
    B, C, H, W = x.shape
    xp = jnp.pad(x, ((0, 0), (0, 0), (1, 1), (1, 1)))
    cols = [xp[:, :, ki:ki + H, kj:kj + W] for ki in range(3) for kj in range(3)]
    pat = jnp.stack(cols, axis=2)
    return pat.reshape(B, C * 9, H * W)


def block_forward(x, P):
    B, C, H, W = x.shape
    L = H * W
    BL = B * L
    NC = 2 * FM
    O = FM
    D = L

    # lane-folded input: last dim = B*L (=128)
    rest = x[:, 1:].reshape(B, NC, L).transpose(1, 0, 2).reshape(NC, BL)
    cls_in = x[:, 0:1].reshape(B, 1, L)

    M = jnp.asarray(_shift_select_matrices(B, H, W))            # (9, BL, BL) int8

    def morph_w(w):                                  # (O, NC, 3, 3) -> (9, O, NC)
        return jnp.transpose(w, (2, 3, 0, 1)).reshape(9, O, NC)

    we_all = jnp.stack([morph_w(P['we_spec']), morph_w(P['we_spat'])])  # (2,9,O,NC)
    wd_all = jnp.stack([morph_w(P['wd_spec']), morph_w(P['wd_spat'])])

    # Fold eval-mode BatchNorm into conv weights/bias.
    s_spec = P['bn_spec_g'] / jnp.sqrt(P['bn_spec_v'] + BN_EPS)
    s_spat = P['bn_spat_g'] / jnp.sqrt(P['bn_spat_v'] + BN_EPS)
    w_spec = jnp.concatenate([P['spec_w1'].reshape(O, O),
                              P['spec_w2'].reshape(O, O)], axis=1) * s_spec[:, None]
    b_spec = ((P['spec_b1'] + P['spec_b2'] - P['bn_spec_m']) * s_spec
              + P['bn_spec_b']).reshape(O, 1)
    w_spat = (jnp.transpose(jnp.concatenate([P['spat_w1'], P['spat_w2']], axis=1),
                            (2, 3, 0, 1)).reshape(9, O, NC)
              * s_spat[None, :, None])                                    # (9,O,NC)
    b_spat = ((P['spat_b1'] + P['spat_b2'] - P['bn_spat_m']) * s_spat
              + P['bn_spat_b']).reshape(O, 1)

    branch = pl.pallas_call(
        _morph_branch_kernel,
        out_shape=jax.ShapeDtypeStruct((2, O, BL), jnp.float32),
        grid=(2,),
        in_specs=[
            pl.BlockSpec((NC, BL), lambda i: (0, 0)),
            pl.BlockSpec((9, BL, BL), lambda i: (0, 0, 0)),
            pl.BlockSpec((None, 9, O, NC), lambda i: (i, 0, 0, 0)),
            pl.BlockSpec((None, 9, O, NC), lambda i: (i, 0, 0, 0)),
            pl.BlockSpec((O, 2 * O), lambda i: (0, 0)),
            pl.BlockSpec((O, 1), lambda i: (0, 0)),
            pl.BlockSpec((9, O, NC), lambda i: (0, 0, 0)),
            pl.BlockSpec((O, 1), lambda i: (0, 0)),
        ],
        out_specs=pl.BlockSpec((None, O, BL), lambda i: (i, 0, 0)),
        compiler_params=pltpu.CompilerParams(dimension_semantics=("parallel",)),
    )(rest, M, we_all, wd_all, w_spec, b_spec, w_spat, b_spat)

    spec = branch[0].reshape(O, B, L).transpose(1, 0, 2)        # (B, O, L)
    spat = branch[1].reshape(O, B, L).transpose(1, 0, 2)
    x_seq = jnp.concatenate([cls_in, spec, spat], axis=1)       # (B, 1+2*FM, D)

    hd = D // NUM_HEADS
    hred = (jnp.arange(D)[:, None] // hd
            == jnp.arange(NUM_HEADS)[None, :]).astype(jnp.float32)   # (D, NH)
    hexp = hred.T                                                    # (NH, D)

    N = 1 + 2 * FM
    cls_out = pl.pallas_call(
        _attn_kernel,
        out_shape=jax.ShapeDtypeStruct((B, 1, D), jnp.float32),
        grid=(B,),
        in_specs=[
            pl.BlockSpec((None, N, D), lambda b: (b, 0, 0)),
            pl.BlockSpec((1, D), lambda b: (0, 0)),
            pl.BlockSpec((1, D), lambda b: (0, 0)),
            pl.BlockSpec((D, D), lambda b: (0, 0)),
            pl.BlockSpec((D, D), lambda b: (0, 0)),
            pl.BlockSpec((D, D), lambda b: (0, 0)),
            pl.BlockSpec((D, D), lambda b: (0, 0)),
            pl.BlockSpec((1, D), lambda b: (0, 0)),
            pl.BlockSpec((1, D), lambda b: (0, 0)),
            pl.BlockSpec((1, D), lambda b: (0, 0)),
            pl.BlockSpec((D, NUM_HEADS), lambda b: (0, 0)),
            pl.BlockSpec((NUM_HEADS, D), lambda b: (0, 0)),
        ],
        out_specs=pl.BlockSpec((None, 1, D), lambda b: (b, 0, 0)),
        compiler_params=pltpu.CompilerParams(dimension_semantics=("parallel",)),
    )(x_seq,
      P['ln_att_g'].reshape(1, D), P['ln_att_b'].reshape(1, D),
      P['wq'].T, P['wk'].T, P['wv'].T,
      P['proj_w'].T, P['proj_b'].reshape(1, D),
      P['ln_cls_g'].reshape(1, D), P['ln_cls_b'].reshape(1, D),
      hred, hexp)

    return jnp.concatenate(
        [cls_out.reshape(B, 1, H, W),
         spec.reshape(B, O, H, W),
         spat.reshape(B, O, H, W)], axis=1)


# ---------------------------------------------------------------------------
# Pure-JAX reference (eval-mode semantics) for numerical checking
# ---------------------------------------------------------------------------
def reference_forward(x, P):
    B, C, H, W = x.shape
    L = H * W
    O = FM
    hp = jax.lax.Precision.HIGHEST
    rest = x[:, 1:]
    pat = _im2col_3x3(rest)

    def morph(w, erosion):
        wf = w.reshape(O, -1)
        t = pat[:, None, :, :]
        if erosion:
            return -jnp.max(wf[None, :, :, None] - t, axis=2)
        return jnp.max(wf[None, :, :, None] + t, axis=2)

    ero_spec = morph(P['we_spec'], True)
    dil_spec = morph(P['wd_spec'], False)
    ero_spat = morph(P['we_spat'], True)
    dil_spat = morph(P['wd_spat'], False)

    def bn(z, g, b, m, v):
        return (z - m[:, None]) / jnp.sqrt(v[:, None] + BN_EPS) * g[:, None] + b[:, None]

    def gelu_exact(z):
        return 0.5 * z * (1.0 + erf_exact(z / jnp.sqrt(2.0)))

    z1 = jnp.einsum('ok,bkl->bol', P['spec_w1'].reshape(O, O), ero_spec,
                    precision=hp) + P['spec_b1'][:, None]
    z2 = jnp.einsum('ok,bkl->bol', P['spec_w2'].reshape(O, O), dil_spec,
                    precision=hp) + P['spec_b2'][:, None]
    spec = gelu_exact(bn(z1 + z2, P['bn_spec_g'], P['bn_spec_b'],
                         P['bn_spec_m'], P['bn_spec_v']))

    p1 = _im2col_3x3(ero_spat.reshape(B, O, H, W))
    p2 = _im2col_3x3(dil_spat.reshape(B, O, H, W))
    z1 = jnp.einsum('ok,bkl->bol', P['spat_w1'].reshape(O, -1), p1,
                    precision=hp) + P['spat_b1'][:, None]
    z2 = jnp.einsum('ok,bkl->bol', P['spat_w2'].reshape(O, -1), p2,
                    precision=hp) + P['spat_b2'][:, None]
    spat = gelu_exact(bn(z1 + z2, P['bn_spat_g'], P['bn_spat_b'],
                         P['bn_spat_m'], P['bn_spat_v']))

    x_seq = jnp.concatenate([x[:, 0:1].reshape(B, 1, L), spec, spat], axis=1)

    def ln(z, g, b):
        mu = z.mean(-1, keepdims=True)
        var = ((z - mu) ** 2).mean(-1, keepdims=True)
        return (z - mu) / jnp.sqrt(var + LN_EPS) * g + b

    D = L
    hd = D // NUM_HEADS
    xn = ln(x_seq, P['ln_att_g'], P['ln_att_b'])
    q = jnp.einsum('bnd,ed->bne', xn[:, 0:1], P['wq'], precision=hp
                   ).reshape(B, 1, NUM_HEADS, hd).transpose(0, 2, 1, 3)
    k = jnp.einsum('bnd,ed->bne', xn, P['wk'], precision=hp
                   ).reshape(B, -1, NUM_HEADS, hd).transpose(0, 2, 1, 3)
    v = jnp.einsum('bnd,ed->bne', xn, P['wv'], precision=hp
                   ).reshape(B, -1, NUM_HEADS, hd).transpose(0, 2, 1, 3)
    attn = jnp.einsum('bhqe,bhke->bhqk', q, k, precision=hp) * (hd ** -0.5)
    attn = jax.nn.softmax(attn, axis=-1)
    o = jnp.einsum('bhqk,bhke->bhqe', attn, v, precision=hp
                   ).transpose(0, 2, 1, 3).reshape(B, 1, D)
    o = jnp.einsum('bnd,ed->bne', o, P['proj_w'], precision=hp) + P['proj_b']
    cls = ln(o + x_seq[:, 0:1], P['ln_cls_g'], P['ln_cls_b'])
    return jnp.concatenate(
        [cls.reshape(B, 1, H, W),
         jnp.concatenate([spec, spat], axis=1).reshape(B, 2 * FM, H, W)],
        axis=1)


# ---------------------------------------------------------------------------
# Deterministic parameter init (shapes from the module __init__)
# ---------------------------------------------------------------------------
def init_params(key, dim):
    O, NC, K = FM, 2 * FM, MORPH_K
    keys = jax.random.split(key, 16)
    r = lambda k, shape, s=0.05: (s * jax.random.normal(k, shape)).astype(jnp.float32)
    return dict(
        we_spec=r(keys[0], (O, NC, K, K)), wd_spec=r(keys[1], (O, NC, K, K)),
        we_spat=r(keys[2], (O, NC, K, K)), wd_spat=r(keys[3], (O, NC, K, K)),
        spec_w1=r(keys[4], (O, O, 1, 1)), spec_b1=r(keys[5], (O,)),
        spec_w2=r(keys[6], (O, O, 1, 1)), spec_b2=r(keys[7], (O,)),
        spat_w1=r(keys[8], (O, O, 3, 3)), spat_b1=r(keys[9], (O,)),
        spat_w2=r(keys[10], (O, O, 3, 3)), spat_b2=r(keys[11], (O,)),
        bn_spec_g=jnp.ones((O,), jnp.float32), bn_spec_b=jnp.zeros((O,), jnp.float32),
        bn_spec_m=jnp.zeros((O,), jnp.float32), bn_spec_v=jnp.ones((O,), jnp.float32),
        bn_spat_g=jnp.ones((O,), jnp.float32), bn_spat_b=jnp.zeros((O,), jnp.float32),
        bn_spat_m=jnp.zeros((O,), jnp.float32), bn_spat_v=jnp.ones((O,), jnp.float32),
        ln_att_g=jnp.ones((dim,), jnp.float32), ln_att_b=jnp.zeros((dim,), jnp.float32),
        ln_cls_g=jnp.ones((dim,), jnp.float32), ln_cls_b=jnp.zeros((dim,), jnp.float32),
        wq=r(keys[12], (dim, dim)), wk=r(keys[13], (dim, dim)),
        wv=r(keys[14], (dim, dim)),
        proj_w=r(keys[15], (dim, dim)),
        proj_b=jnp.zeros((dim,), jnp.float32),
    )


if __name__ == "__main__":
    # TODO(synk): Dropout (attn_drop/proj_drop) and BatchNorm batch-statistics
    #             training behaviour are intentionally eval-mode (identity /
    #             running stats); no stochastic ops are emitted.
    B, H, W = 2, 8, 8
    dim = H * W                       # LayerNorm(dim) is applied over H*W
    C = 1 + 2 * FM                    # cls channel + 32 "rest" channels
    key = jax.random.PRNGKey(0)
    kx, kp = jax.random.split(key)
    x = jax.random.normal(kx, (B, C, H, W), dtype=jnp.float32)
    P = init_params(kp, dim)

    out = jax.jit(block_forward)(x, P)
    out = jax.block_until_ready(out)
    assert out.shape == (B, C, H, W), out.shape
    assert bool(jnp.isfinite(out).all())

    ref = reference_forward(x, P)
    err = float(jnp.max(jnp.abs(out - ref)))
    # Loose tolerance to absorb MXU vs XLA f32-matmul precision differences.
    assert err < 5e-2, f"max abs error vs reference: {err}"
    print("KERNEL_OK")
</pallas_src>

<mosaic_0001>
module attributes {stable_mosaic.version = 11 : i64} {
  func.func @_morph_branch_kernel(%arg0: i32, %arg1: memref<32x128xf32, #tpu.memory_space<vmem>>, %arg2: memref<9x128x128xi8, #tpu.memory_space<vmem>>, %arg3: memref<1x9x16x32xf32, #tpu.memory_space<vmem>>, %arg4: memref<1x9x16x32xf32, #tpu.memory_space<vmem>>, %arg5: memref<16x32xf32, #tpu.memory_space<vmem>>, %arg6: memref<16x1xf32, #tpu.memory_space<vmem>>, %arg7: memref<9x16x32xf32, #tpu.memory_space<vmem>>, %arg8: memref<16x1xf32, #tpu.memory_space<vmem>>, %arg9: memref<1x16x128xf32, #tpu.memory_space<vmem>>) attributes {dimension_semantics = [#tpu.dimension_semantics<parallel>], iteration_bounds = array<i64: 2>, scalar_prefetch = 0 : i64, scratch_operands = 0 : i64, tpu.core_type = #tpu.core_type<tc>, window_params = [{pipeline_mode = #tpu.pipeline_mode<synchronous>, transform_indices = @transform_0, window_bounds = array<i64: 32, 128>}, {pipeline_mode = #tpu.pipeline_mode<synchronous>, transform_indices = @transform_1, window_bounds = array<i64: 9, 128, 128>}, {transform_indices = @transform_2, window_bounds = array<i64: 1, 9, 16, 32>}, {transform_indices = @transform_3, window_bounds = array<i64: 1, 9, 16, 32>}, {pipeline_mode = #tpu.pipeline_mode<synchronous>, transform_indices = @transform_4, window_bounds = array<i64: 16, 32>}, {pipeline_mode = #tpu.pipeline_mode<synchronous>, transform_indices = @transform_5, window_bounds = array<i64: 16, 1>}, {pipeline_mode = #tpu.pipeline_mode<synchronous>, transform_indices = @transform_6, window_bounds = array<i64: 9, 16, 32>}, {pipeline_mode = #tpu.pipeline_mode<synchronous>, transform_indices = @transform_7, window_bounds = array<i64: 16, 1>}, {transform_indices = @transform_8, window_bounds = array<i64: 1, 16, 128>}]} {
    %c0 = arith.constant 0 : index
    %c0_0 = arith.constant 0 : index
    %0 = vector.load %arg1[%c0, %c0_0] : memref<32x128xf32, #tpu.memory_space<vmem>>, vector<32x128xf32>
    %cst = arith.constant 0x7F800000 : f32
    %1 = vector.broadcast %cst : f32 to vector<16x128xf32>
    %cst_1 = arith.constant 0xFF800000 : f32
    %2 = vector.broadcast %cst_1 : f32 to vector<16x128xf32>
    %c0_i32 = arith.constant 0 : i32
    %c9_i32 = arith.constant 9 : i32
    %3 = arith.addi %c0_i32, %c9_i32 : i32
    %c1_i32 = arith.constant 1 : i32
    %4:2 = scf.for %arg10 = %c0_i32 to %3 step %c1_i32 iter_args(%arg11 = %1, %arg12 = %2) -> (vector<16x128xf32>, vector<16x128xf32>)  : i32 {
      %12 = arith.index_cast %arg10 : i32 to index
      %c0_7 = arith.constant 0 : index
      %c0_8 = arith.constant 0 : index
      %13 = vector.load %arg2[%12, %c0_7, %c0_8] : memref<9x128x128xi8, #tpu.memory_space<vmem>>, vector<1x128x128xi8>
      %14 = vector.shape_cast %13 : vector<1x128x128xi8> to vector<128x128xi8>
      %15 = arith.sitofp %14 : vector<128x128xi8> to vector<128x128xf32>
      %cst_9 = arith.constant dense<0.000000e+00> : vector<32x128xf32>
      %16 = tpu.matmul %0, %15, %cst_9 {dimension_numbers = #tpu.dot_dimension_numbers<[1], [0], [0], [1], [0, 0, 1, 1], [], []>} : vector<32x128xf32>, vector<128x128xf32>, vector<32x128xf32> -> vector<32x128xf32>
      %c0_10 = arith.constant 0 : index
      %17 = arith.index_cast %arg10 : i32 to index
      %c0_11 = arith.constant 0 : index
      %c0_12 = arith.constant 0 : index
      %18 = vector.load %arg3[%c0_10, %17, %c0_11, %c0_12] : memref<1x9x16x32xf32, #tpu.memory_space<vmem>>, vector<1x1x16x32xf32>
      %19 = vector.shape_cast %18 : vector<1x1x16x32xf32> to vector<16x32xf32>
      %c0_13 = arith.constant 0 : index
      %20 = arith.index_cast %arg10 : i32 to index
      %c0_14 = arith.constant 0 : index
      %c0_15 = arith.constant 0 : index
      %21 = vector.load %arg4[%c0_13, %20, %c0_14, %c0_15] : memref<1x9x16x32xf32, #tpu.memory_space<vmem>>, vector<1x1x16x32xf32>
      %22 = vector.shape_cast %21 : vector<1x1x16x32xf32> to vector<16x32xf32>
      %23 = vector.extract_strided_slice %16 {offsets = [0, 0], sizes = [1, 128], strides = [1, 1]} : vector<32x128xf32> to vector<1x128xf32>
      %24 = vector.shape_cast %23 : vector<1x128xf32> to vector<1x128xf32>
      %25 = vector.broadcast %24 : vector<1x128xf32> to vector<16x128xf32>
      %26 = vector.extract_strided_slice %19 {offsets = [0, 0], sizes = [16, 1], strides = [1, 1]} : vector<16x32xf32> to vector<16x1xf32>
      %27 = vector.broadcast %26 : vector<16x1xf32> to vector<16x128xf32>
      %28 = arith.subf %25, %27 : vector<16x128xf32>
      %29 = arith.minimumf %arg11, %28 : vector<16x128xf32>
      %30 = vector.extract_strided_slice %22 {offsets = [0, 0], sizes = [16, 1], strides = [1, 1]} : vector<16x32xf32> to vector<16x1xf32>
      %31 = vector.broadcast %30 : vector<16x1xf32> to vector<16x128xf32>
      %32 = arith.addf %25, %31 : vector<16x128xf32>
      %33 = arith.maximumf %arg12, %32 : vector<16x128xf32>
      %34 = vector.extract_strided_slice %16 {offsets = [1, 0], sizes = [1, 128], strides = [1, 1]} : vector<32x128xf32> to vector<1x128xf32>
      %35 = vector.shape_cast %34 : vector<1x128xf32> to vector<1x128xf32>
      %36 = vector.broadcast %35 : vector<1x128xf32> to vector<16x128xf32>
      %37 = vector.extract_strided_slice %19 {offsets = [0, 1], sizes = [16, 1], strides = [1, 1]} : vector<16x32xf32> to vector<16x1xf32>
      %38 = vector.broadcast %37 : vector<16x1xf32> to vector<16x128xf32>
      %39 = arith.subf %36, %38 : vector<16x128xf32>
      %40 = arith.minimumf %29, %39 : vector<16x128xf32>
      %41 = vector.extract_strided_slice %22 {offsets = [0, 1], sizes = [16, 1], strides = [1, 1]} : vector<16x32xf32> to vector<16x1xf32>
      %42 = vector.broadcast %41 : vector<16x1xf32> to vector<16x128xf32>
      %43 = arith.addf %36, %42 : vector<16x128xf32>
      %44 = arith.maximumf %33, %43 : vector<16x128xf32>
      %45 = vector.extract_strided_slice %16 {offsets = [2, 0], sizes = [1, 128], strides = [1, 1]} : vector<32x128xf32> to vector<1x128xf32>
      %46 = vector.shape_cast %45 : vector<1x128xf32> to vector<1x128xf32>
      %47 = vector.broadcast %46 : vector<1x128xf32> to vector<16x128xf32>
      %48 = vector.extract_strided_slice %19 {offsets = [0, 2], sizes = [16, 1], strides = [1, 1]} : vector<16x32xf32> to vector<16x1xf32>
      %49 = vector.broadcast %48 : vector<16x1xf32> to vector<16x128xf32>
      %50 = arith.subf %47, %49 : vector<16x128xf32>
      %51 = arith.minimumf %40, %50 : vector<16x128xf32>
      %52 = vector.extract_strided_slice %22 {offsets = [0, 2], sizes = [16, 1], strides = [1, 1]} : vector<16x32xf32> to vector<16x1xf32>
      %53 = vector.broadcast %52 : vector<16x1xf32> to vector<16x128xf32>
      %54 = arith.addf %47, %53 : vector<16x128xf32>
      %55 = arith.maximumf %44, %54 : vector<16x128xf32>
      %56 = vector.extract_strided_slice %16 {offsets = [3, 0], sizes = [1, 128], strides = [1, 1]} : vector<32x128xf32> to vector<1x128xf32>
      %57 = vector.shape_cast %56 : vector<1x128xf32> to vector<1x128xf32>
      %58 = vector.broadcast %57 : vector<1x128xf32> to vector<16x128xf32>
      %59 = vector.extract_strided_slice %19 {offsets = [0, 3], sizes = [16, 1], strides = [1, 1]} : vector<16x32xf32> to vector<16x1xf32>
      %60 = vector.broadcast %59 : vector<16x1xf32> to vector<16x128xf32>
      %61 = arith.subf %58, %60 : vector<16x128xf32>
      %62 = arith.minimumf %51, %61 : vector<16x128xf32>
      %63 = vector.extract_strided_slice %22 {offsets = [0, 3], sizes = [16, 1], strides = [1, 1]} : vector<16x32xf32> to vector<16x1xf32>
      %64 = vector.broadcast %63 : vector<16x1xf32> to vector<16x128xf32>
      %65 = arith.addf %58, %64 : vector<16x128xf32>
      %66 = arith.maximumf %55, %65 : vector<16x128xf32>
      %67 = vector.extract_strided_slice %16 {offsets = [4, 0], sizes = [1, 128], strides = [1, 1]} : vector<32x128xf32> to vector<1x128xf32>
      %68 = vector.shape_cast %67 : vector<1x128xf32> to vector<1x128xf32>
      %69 = vector.broadcast %68 : vector<1x128xf32> to vector<16x128xf32>
      %70 = vector.extract_strided_slice %19 {offsets = [0, 4], sizes = [16, 1], strides = [1, 1]} : vector<16x32xf32> to vector<16x1xf32>
      %71 = vector.broadcast %70 : vector<16x1xf32> to vector<16x128xf32>
      %72 = arith.subf %69, %71 : vector<16x128xf32>
      %73 = arith.minimumf %62, %72 : vector<16x128xf32>
      %74 = vector.extract_strided_slice %22 {offsets = [0, 4], sizes = [16, 1], strides = [1, 1]} : vector<16x32xf32> to vector<16x1xf32>
      %75 = vector.broadcast %74 : vector<16x1xf32> to vector<16x128xf32>
      %76 = arith.addf %69, %75 : vector<16x128xf32>
      %77 = arith.maximumf %66, %76 : vector<16x128xf32>
      %78 = vector.extract_strided_slice %16 {offsets = [5, 0], sizes = [1, 128], strides = [1, 1]} : vector<32x128xf32> to vector<1x128xf32>
      %79 = vector.shape_cast %78 : vector<1x128xf32> to vector<1x128xf32>
      %80 = vector.broadcast %79 : vector<1x128xf32> to vector<16x128xf32>
      %81 = vector.extract_strided_slice %19 {offsets = [0, 5], sizes = [16, 1], strides = [1, 1]} : vector<16x32xf32> to vector<16x1xf32>
      %82 = vector.broadcast %81 : vector<16x1xf32> to vector<16x128xf32>
      %83 = arith.subf %80, %82 : vector<16x128xf32>
      %84 = arith.minimumf %73, %83 : vector<16x128xf32>
      %85 = vector.extract_strided_slice %22 {offsets = [0, 5], sizes = [16, 1], strides = [1, 1]} : vector<16x32xf32> to vector<16x1xf32>
      %86 = vector.broadcast %85 : vector<16x1xf32> to vector<16x128xf32>
      %87 = arith.addf %80, %86 : vector<16x128xf32>
      %88 = arith.maximumf %77, %87 : vector<16x128xf32>
      %89 = vector.extract_strided_slice %16 {offsets = [6, 0], sizes = [1, 128], strides = [1, 1]} : vector<32x128xf32> to vector<1x128xf32>
      %90 = vector.shape_cast %89 : vector<1x128xf32> to vector<1x128xf32>
      %91 = vector.broadcast %90 : vector<1x128xf32> to vector<16x128xf32>
      %92 = vector.extract_strided_slice %19 {offsets = [0, 6], sizes = [16, 1], strides = [1, 1]} : vector<16x32xf32> to vector<16x1xf32>
      %93 = vector.broadcast %92 : vector<16x1xf32> to vector<16x128xf32>
      %94 = arith.subf %91, %93 : vector<16x128xf32>
      %95 = arith.minimumf %84, %94 : vector<16x128xf32>
      %96 = vector.extract_strided_slice %22 {offsets = [0, 6], sizes = [16, 1], strides = [1, 1]} : vector<16x32xf32> to vector<16x1xf32>
      %97 = vector.broadcast %96 : vector<16x1xf32> to vector<16x128xf32>
      %98 = arith.addf %91, %97 : vector<16x128xf32>
      %99 = arith.maximumf %88, %98 : vector<16x128xf32>
      %100 = vector.extract_strided_slice %16 {offsets = [7, 0], sizes = [1, 128], strides = [1, 1]} : vector<32x128xf32> to vector<1x128xf32>
      %101 = vector.shape_cast %100 : vector<1x128xf32> to vector<1x128xf32>
      %102 = vector.broadcast %101 : vector<1x128xf32> to vector<16x128xf32>
      %103 = vector.extract_strided_slice %19 {offsets = [0, 7], sizes = [16, 1], strides = [1, 1]} : vector<16x32xf32> to vector<16x1xf32>
      %104 = vector.broadcast %103 : vector<16x1xf32> to vector<16x128xf32>
      %105 = arith.subf %102, %104 : vector<16x128xf32>
      %106 = arith.minimumf %95, %105 : vector<16x128xf32>
      %107 = vector.extract_strided_slice %22 {offsets = [0, 7], sizes = [16, 1], strides = [1, 1]} : vector<16x32xf32> to vector<16x1xf32>
      %108 = vector.broadcast %107 : vector<16x1xf32> to vector<16x128xf32>
      %109 = arith.addf %102, %108 : vector<16x128xf32>
      %110 = arith.maximumf %99, %109 : vector<16x128xf32>
      %111 = vector.extract_strided_slice %16 {offsets = [8, 0], sizes = [1, 128], strides = [1, 1]} : vector<32x128xf32> to vector<1x128xf32>
      %112 = vector.shape_cast %111 : vector<1x128xf32> to vector<1x128xf32>
      %113 = vector.broadcast %112 : vector<1x128xf32> to vector<16x128xf32>
      %114 = vector.extract_strided_slice %19 {offsets = [0, 8], sizes = [16, 1], strides = [1, 1]} : vector<16x32xf32> to vector<16x1xf32>
      %115 = vector.broadcast %114 : vector<16x1xf32> to vector<16x128xf32>
      %116 = arith.subf %113, %115 : vector<16x128xf32>
      %117 = arith.minimumf %106, %116 : vector<16x128xf32>
      %118 = vector.extract_strided_slice %22 {offsets = [0, 8], sizes = [16, 1], strides = [1, 1]} : vector<16x32xf32> to vector<16x1xf32>
      %119 = vector.broadcast %118 : vector<16x1xf32> to vector<16x128xf32>
      %120 = arith.addf %113, %119 : vector<16x128xf32>
      %121 = arith.maximumf %110, %120 : vector<16x128xf32>
      %122 = vector.extract_strided_slice %16 {offsets = [9, 0], sizes = [1, 128], strides = [1, 1]} : vector<32x128xf32> to vector<1x128xf32>
      %123 = vector.shape_cast %122 : vector<1x128xf32> to vector<1x128xf32>
      %124 = vector.broadcast %123 : vector<1x128xf32> to vector<16x128xf32>
      %125 = vector.extract_strided_slice %19 {offsets = [0, 9], sizes = [16, 1], strides = [1, 1]} : vector<16x32xf32> to vector<16x1xf32>
      %126 = vector.broadcast %125 : vector<16x1xf32> to vector<16x128xf32>
      %127 = arith.subf %124, %126 : vector<16x128xf32>
      %128 = arith.minimumf %117, %127 : vector<16x128xf32>
      %129 = vector.extract_strided_slice %22 {offsets = [0, 9], sizes = [16, 1], strides = [1, 1]} : vector<16x32xf32> to vector<16x1xf32>
      %130 = vector.broadcast %129 : vector<16x1xf32> to vector<16x128xf32>
      %131 = arith.addf %124, %130 : vector<16x128xf32>
      %132 = arith.maximumf %121, %131 : vector<16x128xf32>
      %133 = vector.extract_strided_slice %16 {offsets = [10, 0], sizes = [1, 128], strides = [1, 1]} : vector<32x128xf32> to vector<1x128xf32>
      %134 = vector.shape_cast %133 : vector<1x128xf32> to vector<1x128xf32>
      %135 = vector.broadcast %134 : vector<1x128xf32> to vector<16x128xf32>
      %136 = vector.extract_strided_slice %19 {offsets = [0, 10], sizes = [16, 1], strides = [1, 1]} : vector<16x32xf32> to vector<16x1xf32>
      %137 = vector.broadcast %136 : vector<16x1xf32> to vector<16x128xf32>
      %138 = arith.subf %135, %137 : vector<16x128xf32>
      %139 = arith.minimumf %128, %138 : vector<16x128xf32>
      %140 = vector.extract_strided_slice %22 {offsets = [0, 10], sizes = [16, 1], strides = [1, 1]} : vector<16x32xf32> to vector<16x1xf32>
      %141 = vector.broadcast %140 : vector<16x1xf32> to vector<16x128xf32>
      %142 = arith.addf %135, %141 : vector<16x128xf32>
      %143 = arith.maximumf %132, %142 : vector<16x128xf32>
      %144 = vector.extract_strided_slice %16 {offsets = [11, 0], sizes = [1, 128], strides = [1, 1]} : vector<32x128xf32> to vector<1x128xf32>
      %145 = vector.shape_cast %144 : vector<1x128xf32> to vector<1x128xf32>
      %146 = vector.broadcast %145 : vector<1x128xf32> to vector<16x128xf32>
      %147 = vector.extract_strided_slice %19 {offsets = [0, 11], sizes = [16, 1], strides = [1, 1]} : vector<16x32xf32> to vector<16x1xf32>
      %148 = vector.broadcast %147 : vector<16x1xf32> to vector<16x128xf32>
      %149 = arith.subf %146, %148 : vector<16x128xf32>
      %150 = arith.minimumf %139, %149 : vector<16x128xf32>
      %151 = vector.extract_strided_slice %22 {offsets = [0, 11], sizes = [16, 1], strides = [1, 1]} : vector<16x32xf32> to vector<16x1xf32>
      %152 = vector.broadcast %151 : vector<16x1xf32> to vector<16x128xf32>
      %153 = arith.addf %146, %152 : vector<16x128xf32>
      %154 = arith.maximumf %143, %153 : vector<16x128xf32>
      %155 = vector.extract_strided_slice %16 {offsets = [12, 0], sizes = [1, 128], strides = [1, 1]} : vector<32x128xf32> to vector<1x128xf32>
      %156 = vector.shape_cast %155 : vector<1x128xf32> to vector<1x128xf32>
      %157 = vector.broadcast %156 : vector<1x128xf32> to vector<16x128xf32>
      %158 = vector.extract_strided_slice %19 {offsets = [0, 12], sizes = [16, 1], strides = [1, 1]} : vector<16x32xf32> to vector<16x1xf32>
      %159 = vector.broadcast %158 : vector<16x1xf32> to vector<16x128xf32>
      %160 = arith.subf %157, %159 : vector<16x128xf32>
      %161 = arith.minimumf %150, %160 : vector<16x128xf32>
      %162 = vector.extract_strided_slice %22 {offsets = [0, 12], sizes = [16, 1], strides = [1, 1]} : vector<16x32xf32> to vector<16x1xf32>
      %163 = vector.broadcast %162 : vector<16x1xf32> to vector<16x128xf32>
      %164 = arith.addf %157, %163 : vector<16x128xf32>
      %165 = arith.maximumf %154, %164 : vector<16x128xf32>
      %166 = vector.extract_strided_slice %16 {offsets = [13, 0], sizes = [1, 128], strides = [1, 1]} : vector<32x128xf32> to vector<1x128xf32>
      %167 = vector.shape_cast %166 : vector<1x128xf32> to vector<1x128xf32>
      %168 = vector.broadcast %167 : vector<1x128xf32> to vector<16x128xf32>
      %169 = vector.extract_strided_slice %19 {offsets = [0, 13], sizes = [16, 1], strides = [1, 1]} : vector<16x32xf32> to vector<16x1xf32>
      %170 = vector.broadcast %169 : vector<16x1xf32> to vector<16x128xf32>
      %171 = arith.subf %168, %170 : vector<16x128xf32>
      %172 = arith.minimumf %161, %171 : vector<16x128xf32>
      %173 = vector.extract_strided_slice %22 {offsets = [0, 13], sizes = [16, 1], strides = [1, 1]} : vector<16x32xf32> to vector<16x1xf32>
      %174 = vector.broadcast %173 : vector<16x1xf32> to vector<16x128xf32>
      %175 = arith.addf %168, %174 : vector<16x128xf32>
      %176 = arith.maximumf %165, %175 : vector<16x128xf32>
      %177 = vector.extract_strided_slice %16 {offsets = [14, 0], sizes = [1, 128], strides = [1, 1]} : vector<32x128xf32> to vector<1x128xf32>
      %178 = vector.shape_cast %177 : vector<1x128xf32> to vector<1x128xf32>
      %179 = vector.broadcast %178 : vector<1x128xf32> to vector<16x128xf32>
      %180 = vector.extract_strided_slice %19 {offsets = [0, 14], sizes = [16, 1], strides = [1, 1]} : vector<16x32xf32> to vector<16x1xf32>
      %181 = vector.broadcast %180 : vector<16x1xf32> to vector<16x128xf32>
      %182 = arith.subf %179, %181 : vector<16x128xf32>
      %183 = arith.minimumf %172, %182 : vector<16x128xf32>
      %184 = vector.extract_strided_slice %22 {offsets = [0, 14], sizes = [16, 1], strides = [1, 1]} : vector<16x32xf32> to vector<16x1xf32>
      %185 = vector.broadcast %184 : vector<16x1xf32> to vector<16x128xf32>
      %186 = arith.addf %179, %185 : vector<16x128xf32>
      %187 = arith.maximumf %176, %186 : vector<16x128xf32>
      %188 = vector.extract_strided_slice %16 {offsets = [15, 0], sizes = [1, 128], strides = [1, 1]} : vector<32x128xf32> to vector<1x128xf32>
      %189 = vector.shape_cast %188 : vector<1x128xf32> to vector<1x128xf32>
      %190 = vector.broadcast %189 : vector<1x128xf32> to vector<16x128xf32>
      %191 = vector.extract_strided_slice %19 {offsets = [0, 15], sizes = [16, 1], strides = [1, 1]} : vector<16x32xf32> to vector<16x1xf32>
      %192 = vector.broadcast %191 : vector<16x1xf32> to vector<16x128xf32>
      %193 = arith.subf %190, %192 : vector<16x128xf32>
      %194 = arith.minimumf %183, %193 : vector<16x128xf32>
      %195 = vector.extract_strided_slice %22 {offsets = [0, 15], sizes = [16, 1], strides = [1, 1]} : vector<16x32xf32> to vector<16x1xf32>
      %196 = vector.broadcast %195 : vector<16x1xf32> to vector<16x128xf32>
      %197 = arith.addf %190, %196 : vector<16x128xf32>
      %198 = arith.maximumf %187, %197 : vector<16x128xf32>
      %199 = vector.extract_strided_slice %16 {offsets = [16, 0], sizes = [1, 128], strides = [1, 1]} : vector<32x128xf32> to vector<1x128xf32>
      %200 = vector.shape_cast %199 : vector<1x128xf32> to vector<1x128xf32>
      %201 = vector.broadcast %200 : vector<1x128xf32> to vector<16x128xf32>
      %202 = vector.extract_strided_slice %19 {offsets = [0, 16], sizes = [16, 1], strides = [1, 1]} : vector<16x32xf32> to vector<16x1xf32>
      %203 = vector.broadcast %202 : vector<16x1xf32> to vector<16x128xf32>
      %204 = arith.subf %201, %203 : vector<16x128xf32>
      %205 = arith.minimumf %194, %204 : vector<16x128xf32>
      %206 = vector.extract_strided_slice %22 {offsets = [0, 16], sizes = [16, 1], strides = [1, 1]} : vector<16x32xf32> to vector<16x1xf32>
      %207 = vector.broadcast %206 : vector<16x1xf32> to vector<16x128xf32>
      %208 = arith.addf %201, %207 : vector<16x128xf32>
      %209 = arith.maximumf %198, %208 : vector<16x128xf32>
      %210 = vector.extract_strided_slice %16 {offsets = [17, 0], sizes = [1, 128], strides = [1, 1]} : vector<32x128xf32> to vector<1x128xf32>
      %211 = vector.shape_cast %210 : vector<1x128xf32> to vector<1x128xf32>
      %212 = vector.broadcast %211 : vector<1x128xf32> to vector<16x128xf32>
      %213 = vector.extract_strided_slice %19 {offsets = [0, 17], sizes = [16, 1], strides = [1, 1]} : vector<16x32xf32> to vector<16x1xf32>
      %214 = vector.broadcast %213 : vector<16x1xf32> to vector<16x128xf32>
      %215 = arith.subf %212, %214 : vector<16x128xf32>
      %216 = arith.minimumf %205, %215 : vector<16x128xf32>
      %217 = vector.extract_strided_slice %22 {offsets = [0, 17], sizes = [16, 1], strides = [1, 1]} : vector<16x32xf32> to vector<16x1xf32>
      %218 = vector.broadcast %217 : vector<16x1xf32> to vector<16x128xf32>
      %219 = arith.addf %212, %218 : vector<16x128xf32>
      %220 = arith.maximumf %209, %219 : vector<16x128xf32>
      %221 = vector.extract_strided_slice %16 {offsets = [18, 0], sizes = [1, 128], strides = [1, 1]} : vector<32x128xf32> to vector<1x128xf32>
      %222 = vector.shape_cast %221 : vector<1x128xf32> to vector<1x128xf32>
      %223 = vector.broadcast %222 : vector<1x128xf32> to vector<16x128xf32>
      %224 = vector.extract_strided_slice %19 {offsets = [0, 18], sizes = [16, 1], strides = [1, 1]} : vector<16x32xf32> to vector<16x1xf32>
      %225 = vector.broadcast %224 : vector<16x1xf32> to vector<16x128xf32>
      %226 = arith.subf %223, %225 : vector<16x128xf32>
      %227 = arith.minimumf %216, %226 : vector<16x128xf32>
      %228 = vector.extract_strided_slice %22 {offsets = [0, 18], sizes = [16, 1], strides = [1, 1]} : vector<16x32xf32> to vector<16x1xf32>
      %229 = vector.broadcast %228 : vector<16x1xf32> to vector<16x128xf32>
      %230 = arith.addf %223, %229 : vector<16x128xf32>
      %231 = arith.maximumf %220, %230 : vector<16x128xf32>
      %232 = vector.extract_strided_slice %16 {offsets = [19, 0], sizes = [1, 128], strides = [1, 1]} : vector<32x128xf32> to vector<1x128xf32>
      %233 = vector.shape_cast %232 : vector<1x128xf32> to vector<1x128xf32>
      %234 = vector.broadcast %233 : vector<1x128xf32> to vector<16x128xf32>
      %235 = vector.extract_strided_slice %19 {offsets = [0, 19], sizes = [16, 1], strides = [1, 1]} : vector<16x32xf32> to vector<16x1xf32>
      %236 = vector.broadcast %235 : vector<16x1xf32> to vector<16x128xf32>
      %237 = arith.subf %234, %236 : vector<16x128xf32>
      %238 = arith.minimumf %227, %237 : vector<16x128xf32>
      %239 = vector.extract_strided_slice %22 {offsets = [0, 19], sizes = [16, 1], strides = [1, 1]} : vector<16x32xf32> to vector<16x1xf32>
      %240 = vector.broadcast %239 : vector<16x1xf32> to vector<16x128xf32>
      %241 = arith.addf %234, %240 : vector<16x128xf32>
      %242 = arith.maximumf %231, %241 : vector<16x128xf32>
      %243 = vector.extract_strided_slice %16 {offsets = [20, 0], sizes = [1, 128], strides = [1, 1]} : vector<32x128xf32> to vector<1x128xf32>
      %244 = vector.shape_cast %243 : vector<1x128xf32> to vector<1x128xf32>
      %245 = vector.broadcast %244 : vector<1x128xf32> to vector<16x128xf32>
      %246 = vector.extract_strided_slice %19 {offsets = [0, 20], sizes = [16, 1], strides = [1, 1]} : vector<16x32xf32> to vector<16x1xf32>
      %247 = vector.broadcast %246 : vector<16x1xf32> to vector<16x128xf32>
      %248 = arith.subf %245, %247 : vector<16x128xf32>
      %249 = arith.minimumf %238, %248 : vector<16x128xf32>
      %250 = vector.extract_strided_slice %22 {offsets = [0, 20], sizes = [16, 1], strides = [1, 1]} : vector<16x32xf32> to vector<16x1xf32>
      %251 = vector.broadcast %250 : vector<16x1xf32> to vector<16x128xf32>
      %252 = arith.addf %245, %251 : vector<16x128xf32>
      %253 = arith.maximumf %242, %252 : vector<16x128xf32>
      %254 = vector.extract_strided_slice %16 {offsets = [21, 0], sizes = [1, 128], strides = [1, 1]} : vector<32x128xf32> to vector<1x128xf32>
      %255 = vector.shape_cast %254 : vector<1x128xf32> to vector<1x128xf32>
      %256 = vector.broadcast %255 : vector<1x128xf32> to vector<16x128xf32>
      %257 = vector.extract_strided_slice %19 {offsets = [0, 21], sizes = [16, 1], strides = [1, 1]} : vector<16x32xf32> to vector<16x1xf32>
      %258 = vector.broadcast %257 : vector<16x1xf32> to vector<16x128xf32>
      %259 = arith.subf %256, %258 : vector<16x128xf32>
      %260 = arith.minimumf %249, %259 : vector<16x128xf32>
      %261 = vector.extract_strided_slice %22 {offsets = [0, 21], sizes = [16, 1], strides = [1, 1]} : vector<16x32xf32> to vector<16x1xf32>
      %262 = vector.broadcast %261 : vector<16x1xf32> to vector<16x128xf32>
      %263 = arith.addf %256, %262 : vector<16x128xf32>
      %264 = arith.maximumf %253, %263 : vector<16x128xf32>
      %265 = vector.extract_strided_slice %16 {offsets = [22, 0], sizes = [1, 128], strides = [1, 1]} : vector<32x128xf32> to vector<1x128xf32>
      %266 = vector.shape_cast %265 : vector<1x128xf32> to vector<1x128xf32>
      %267 = vector.broadcast %266 : vector<1x128xf32> to vector<16x128xf32>
      %268 = vector.extract_strided_slice %19 {offsets = [0, 22], sizes = [16, 1], strides = [1, 1]} : vector<16x32xf32> to vector<16x1xf32>
      %269 = vector.broadcast %268 : vector<16x1xf32> to vector<16x128xf32>
      %270 = arith.subf %267, %269 : vector<16x128xf32>
      %271 = arith.minimumf %260, %270 : vector<16x128xf32>
      %272 = vector.extract_strided_slice %22 {offsets = [0, 22], sizes = [16, 1], strides = [1, 1]} : vector<16x32xf32> to vector<16x1xf32>
      %273 = vector.broadcast %272 : vector<16x1xf32> to vector<16x128xf32>
      %274 = arith.addf %267, %273 : vector<16x128xf32>
      %275 = arith.maximumf %264, %274 : vector<16x128xf32>
      %276 = vector.extract_strided_slice %16 {offsets = [23, 0], sizes = [1, 128], strides = [1, 1]} : vector<32x128xf32> to vector<1x128xf32>
      %277 = vector.shape_cast %276 : vector<1x128xf32> to vector<1x128xf32>
      %278 = vector.broadcast %277 : vector<1x128xf32> to vector<16x128xf32>
      %279 = vector.extract_strided_slice %19 {offsets = [0, 23], sizes = [16, 1], strides = [1, 1]} : vector<16x32xf32> to vector<16x1xf32>
      %280 = vector.broadcast %279 : vector<16x1xf32> to vector<16x128xf32>
      %281 = arith.subf %278, %280 : vector<16x128xf32>
      %282 = arith.minimumf %271, %281 : vector<16x128xf32>
      %283 = vector.extract_strided_slice %22 {offsets = [0, 23], sizes = [16, 1], strides = [1, 1]} : vector<16x32xf32> to vector<16x1xf32>
      %284 = vector.broadcast %283 : vector<16x1xf32> to vector<16x128xf32>
      %285 = arith.addf %278, %284 : vector<16x128xf32>
      %286 = arith.maximumf %275, %285 : vector<16x128xf32>
      %287 = vector.extract_strided_slice %16 {offsets = [24, 0], sizes = [1, 128], strides = [1, 1]} : vector<32x128xf32> to vector<1x128xf32>
      %288 = vector.shape_cast %287 : vector<1x128xf32> to vector<1x128xf32>
      %289 = vector.broadcast %288 : vector<1x128xf32> to vector<16x128xf32>
      %290 = vector.extract_strided_slice %19 {offsets = [0, 24], sizes = [16, 1], strides = [1, 1]} : vector<16x32xf32> to vector<16x1xf32>
      %291 = vector.broadcast %290 : vector<16x1xf32> to vector<16x128xf32>
      %292 = arith.subf %289, %291 : vector<16x128xf32>
      %293 = arith.minimumf %282, %292 : vector<16x128xf32>
      %294 = vector.extract_strided_slice %22 {offsets = [0, 24], sizes = [16, 1], strides = [1, 1]} : vector<16x32xf32> to vector<16x1xf32>
      %295 = vector.broadcast %294 : vector<16x1xf32> to vector<16x128xf32>
      %296 = arith.addf %289, %295 : vector<16x128xf32>
      %297 = arith.maximumf %286, %296 : vector<16x128xf32>
      %298 = vector.extract_strided_slice %16 {offsets = [25, 0], sizes = [1, 128], strides = [1, 1]} : vector<32x128xf32> to vector<1x128xf32>
      %299 = vector.shape_cast %298 : vector<1x128xf32> to vector<1x128xf32>
      %300 = vector.broadcast %299 : vector<1x128xf32> to vector<16x128xf32>
      %301 = vector.extract_strided_slice %19 {offsets = [0, 25], sizes = [16, 1], strides = [1, 1]} : vector<16x32xf32> to vector<16x1xf32>
      %302 = vector.broadcast %301 : vector<16x1xf32> to vector<16x128xf32>
      %303 = arith.subf %300, %302 : vector<16x128xf32>
      %304 = arith.minimumf %293, %303 : vector<16x128xf32>
      %305 = vector.extract_strided_slice %22 {offsets = [0, 25], sizes = [16, 1], strides = [1, 1]} : vector<16x32xf32> to vector<16x1xf32>
      %306 = vector.broadcast %305 : vector<16x1xf32> to vector<16x128xf32>
      %307 = arith.addf %300, %306 : vector<16x128xf32>
      %308 = arith.maximumf %297, %307 : vector<16x128xf32>
      %309 = vector.extract_strided_slice %16 {offsets = [26, 0], sizes = [1, 128], strides = [1, 1]} : vector<32x128xf32> to vector<1x128xf32>
      %310 = vector.shape_cast %309 : vector<1x128xf32> to vector<1x128xf32>
      %311 = vector.broadcast %310 : vector<1x128xf32> to vector<16x128xf32>
      %312 = vector.extract_strided_slice %19 {offsets = [0, 26], sizes = [16, 1], strides = [1, 1]} : vector<16x32xf32> to vector<16x1xf32>
      %313 = vector.broadcast %312 : vector<16x1xf32> to vector<16x128xf32>
      %314 = arith.subf %311, %313 : vector<16x128xf32>
      %315 = arith.minimumf %304, %314 : vector<16x128xf32>
      %316 = vector.extract_strided_slice %22 {offsets = [0, 26], sizes = [16, 1], strides = [1, 1]} : vector<16x32xf32> to vector<16x1xf32>
      %317 = vector.broadcast %316 : vector<16x1xf32> to vector<16x128xf32>
      %318 = arith.addf %311, %317 : vector<16x128xf32>
      %319 = arith.maximumf %308, %318 : vector<16x128xf32>
      %320 = vector.extract_strided_slice %16 {offsets = [27, 0], sizes = [1, 128], strides = [1, 1]} : vector<32x128xf32> to vector<1x128xf32>
      %321 = vector.shape_cast %320 : vector<1x128xf32> to vector<1x128xf32>
      %322 = vector.broadcast %321 : vector<1x128xf32> to vector<16x128xf32>
      %323 = vector.extract_strided_slice %19 {offsets = [0, 27], sizes = [16, 1], strides = [1, 1]} : vector<16x32xf32> to vector<16x1xf32>
      %324 = vector.broadcast %323 : vector<16x1xf32> to vector<16x128xf32>
      %325 = arith.subf %322, %324 : vector<16x128xf32>
      %326 = arith.minimumf %315, %325 : vector<16x128xf32>
      %327 = vector.extract_strided_slice %22 {offsets = [0, 27], sizes = [16, 1], strides = [1, 1]} : vector<16x32xf32> to vector<16x1xf32>
      %328 = vector.broadcast %327 : vector<16x1xf32> to vector<16x128xf32>
      %329 = arith.addf %322, %328 : vector<16x128xf32>
      %330 = arith.maximumf %319, %329 : vector<16x128xf32>
      %331 = vector.extract_strided_slice %16 {offsets = [28, 0], sizes = [1, 128], strides = [1, 1]} : vector<32x128xf32> to vector<1x128xf32>
      %332 = vector.shape_cast %331 : vector<1x128xf32> to vector<1x128xf32>
      %333 = vector.broadcast %332 : vector<1x128xf32> to vector<16x128xf32>
      %334 = vector.extract_strided_slice %19 {offsets = [0, 28], sizes = [16, 1], strides = [1, 1]} : vector<16x32xf32> to vector<16x1xf32>
      %335 = vector.broadcast %334 : vector<16x1xf32> to vector<16x128xf32>
      %336 = arith.subf %333, %335 : vector<16x128xf32>
      %337 = arith.minimumf %326, %336 : vector<16x128xf32>
      %338 = vector.extract_strided_slice %22 {offsets = [0, 28], sizes = [16, 1], strides = [1, 1]} : vector<16x32xf32> to vector<16x1xf32>
      %339 = vector.broadcast %338 : vector<16x1xf32> to vector<16x128xf32>
      %340 = arith.addf %333, %339 : vector<16x128xf32>
      %341 = arith.maximumf %330, %340 : vector<16x128xf32>
      %342 = vector.extract_strided_slice %16 {offsets = [29, 0], sizes = [1, 128], strides = [1, 1]} : vector<32x128xf32> to vector<1x128xf32>
      %343 = vector.shape_cast %342 : vector<1x128xf32> to vector<1x128xf32>
      %344 = vector.broadcast %343 : vector<1x128xf32> to vector<16x128xf32>
      %345 = vector.extract_strided_slice %19 {offsets = [0, 29], sizes = [16, 1], strides = [1, 1]} : vector<16x32xf32> to vector<16x1xf32>
      %346 = vector.broadcast %345 : vector<16x1xf32> to vector<16x128xf32>
      %347 = arith.subf %344, %346 : vector<16x128xf32>
      %348 = arith.minimumf %337, %347 : vector<16x128xf32>
      %349 = vector.extract_strided_slice %22 {offsets = [0, 29], sizes = [16, 1], strides = [1, 1]} : vector<16x32xf32> to vector<16x1xf32>
      %350 = vector.broadcast %349 : vector<16x1xf32> to vector<16x128xf32>
      %351 = arith.addf %344, %350 : vector<16x128xf32>
      %352 = arith.maximumf %341, %351 : vector<16x128xf32>
      %353 = vector.extract_strided_slice %16 {offsets = [30, 0], sizes = [1, 128], strides = [1, 1]} : vector<32x128xf32> to vector<1x128xf32>
      %354 = vector.shape_cast %353 : vector<1x128xf32> to vector<1x128xf32>
      %355 = vector.broadcast %354 : vector<1x128xf32> to vector<16x128xf32>
      %356 = vector.extract_strided_slice %19 {offsets = [0, 30], sizes = [16, 1], strides = [1, 1]} : vector<16x32xf32> to vector<16x1xf32>
      %357 = vector.broadcast %356 : vector<16x1xf32> to vector<16x128xf32>
      %358 = arith.subf %355, %357 : vector<16x128xf32>
      %359 = arith.minimumf %348, %358 : vector<16x128xf32>
      %360 = vector.extract_strided_slice %22 {offsets = [0, 30], sizes = [16, 1], strides = [1, 1]} : vector<16x32xf32> to vector<16x1xf32>
      %361 = vector.broadcast %360 : vector<16x1xf32> to vector<16x128xf32>
      %362 = arith.addf %355, %361 : vector<16x128xf32>
      %363 = arith.maximumf %352, %362 : vector<16x128xf32>
      %364 = vector.extract_strided_slice %16 {offsets = [31, 0], sizes = [1, 128], strides = [1, 1]} : vector<32x128xf32> to vector<1x128xf32>
      %365 = vector.shape_cast %364 : vector<1x128xf32> to vector<1x128xf32>
      %366 = vector.broadcast %365 : vector<1x128xf32> to vector<16x128xf32>
      %367 = vector.extract_strided_slice %19 {offsets = [0, 31], sizes = [16, 1], strides = [1, 1]} : vector<16x32xf32> to vector<16x1xf32>
      %368 = vector.broadcast %367 : vector<16x1xf32> to vector<16x128xf32>
      %369 = arith.subf %366, %368 : vector<16x128xf32>
      %370 = arith.minimumf %359, %369 : vector<16x128xf32>
      %371 = vector.extract_strided_slice %22 {offsets = [0, 31], sizes = [16, 1], strides = [1, 1]} : vector<16x32xf32> to vector<16x1xf32>
      %372 = vector.broadcast %371 : vector<16x1xf32> to vector<16x128xf32>
      %373 = arith.addf %366, %372 : vector<16x128xf32>
      %374 = arith.maximumf %363, %373 : vector<16x128xf32>
      scf.yield %370, %374 : vector<16x128xf32>, vector<16x128xf32>
    }
    %c9_i32_2 = arith.constant 9 : i32
    %5 = tpu.concatenate %4#0, %4#1 in 0 : vector<16x128xf32>, vector<16x128xf32> -> vector<32x128xf32>
    %c0_i32_3 = arith.constant 0 : i32
    %6 = arith.cmpi eq, %arg0, %c0_i32_3 : i32
    %7 = arith.extui %6 : i1 to i32
    %c0_i32_4 = arith.constant 0 : i32
    %8 = arith.cmpi ne, %7, %c0_i32_4 : i32
    scf.if %8 {
      %c0_7 = arith.constant 0 : index
      %c0_8 = arith.constant 0 : index
      %12 = vector.load %arg5[%c0_7, %c0_8] : memref<16x32xf32, #tpu.memory_space<vmem>>, vector<16x32xf32>
      %cst_9 = arith.constant dense<0.000000e+00> : vector<16x128xf32>
      %13 = tpu.matmul %12, %5, %cst_9 {dimension_numbers = #tpu.dot_dimension_numbers<[1], [0], [0], [1], [0, 0, 1, 1], [], []>} : vector<16x32xf32>, vector<32x128xf32>, vector<16x128xf32> -> vector<16x128xf32>
      %c0_10 = arith.constant 0 : index
      %c0_11 = arith.constant 0 : index
      %14 = vector.load %arg6[%c0_10, %c0_11] : memref<16x1xf32, #tpu.memory_space<vmem>>, vector<16x1xf32>
      %15 = vector.broadcast %14 : vector<16x1xf32> to vector<16x128xf32>
      %16 = arith.addf %13, %15 : vector<16x128xf32>
      %cst_12 = arith.constant 5.000000e-01 : f32
      %17 = vector.broadcast %cst_12 : f32 to vector<16x128xf32>
      %18 = arith.mulf %17, %16 : vector<16x128xf32>
      %cst_13 = arith.constant 0.707106769 : f32
      %19 = vector.broadcast %cst_13 : f32 to vector<16x128xf32>
      %20 = arith.mulf %16, %19 : vector<16x128xf32>
      %cst_14 = arith.constant 0.000000e+00 : f32
      %21 = vector.broadcast %cst_14 : f32 to vector<16x128xf32>
      %22 = arith.cmpf oge, %20, %21 : vector<16x128xf32>
      %cst_15 = arith.constant 1.000000e+00 : f32
      %cst_16 = arith.constant -1.000000e+00 : f32
      %23 = vector.broadcast %cst_15 : f32 to vector<16x128xf32>
      %24 = vector.broadcast %cst_16 : f32 to vector<16x128xf32>
      %25 = arith.select %22, %23, %24 : vector<16x128xi1>, vector<16x128xf32>
      %26 = math.absf %20 : vector<16x128xf32>
      %cst_17 = arith.constant 0.327591091 : f32
      %27 = vector.broadcast %cst_17 : f32 to vector<16x128xf32>
      %28 = arith.mulf %27, %26 : vector<16x128xf32>
      %cst_18 = arith.constant 1.000000e+00 : f32
      %29 = vector.broadcast %cst_18 : f32 to vector<16x128xf32>
      %30 = arith.addf %29, %28 : vector<16x128xf32>
      %cst_19 = arith.constant 1.000000e+00 : f32
      %31 = vector.broadcast %cst_19 : f32 to vector<16x128xf32>
      %32 = arith.divf %31, %30 : vector<16x128xf32>
      %cst_20 = arith.constant 1.06140542 : f32
      %33 = vector.broadcast %cst_20 : f32 to vector<16x128xf32>
      %34 = arith.mulf %33, %32 : vector<16x128xf32>
      %cst_21 = arith.constant -1.45315206 : f32
      %35 = vector.broadcast %cst_21 : f32 to vector<16x128xf32>
      %36 = arith.addf %34, %35 : vector<16x128xf32>
      %37 = arith.mulf %36, %32 : vector<16x128xf32>
      %cst_22 = arith.constant 1.42141378 : f32
      %38 = vector.broadcast %cst_22 : f32 to vector<16x128xf32>
      %39 = arith.addf %37, %38 : vector<16x128xf32>
      %40 = arith.mulf %39, %32 : vector<16x128xf32>
      %cst_23 = arith.constant -0.284496725 : f32
      %41 = vector.broadcast %cst_23 : f32 to vector<16x128xf32>
      %42 = arith.addf %40, %41 : vector<16x128xf32>
      %43 = arith.mulf %42, %32 : vector<16x128xf32>
      %cst_24 = arith.constant 0.254829586 : f32
      %44 = vector.broadcast %cst_24 : f32 to vector<16x128xf32>
      %45 = arith.addf %43, %44 : vector<16x128xf32>
      %46 = arith.mulf %45, %32 : vector<16x128xf32>
      %cst_25 = arith.constant 0.000000e+00 : f32
      %47 = vector.broadcast %cst_25 : f32 to vector<16x128xf32>
      %48 = arith.subf %47, %26 : vector<16x128xf32>
      %49 = arith.mulf %48, %26 : vector<16x128xf32>
      %50 = math.exp %49 : vector<16x128xf32>
      %51 = arith.mulf %46, %50 : vector<16x128xf32>
      %cst_26 = arith.constant 1.000000e+00 : f32
      %52 = vector.broadcast %cst_26 : f32 to vector<16x128xf32>
      %53 = arith.subf %52, %51 : vector<16x128xf32>
      %54 = arith.mulf %25, %53 : vector<16x128xf32>
      %cst_27 = arith.constant 1.000000e+00 : f32
      %55 = vector.broadcast %cst_27 : f32 to vector<16x128xf32>
      %56 = arith.addf %55, %54 : vector<16x128xf32>
      %57 = arith.mulf %18, %56 : vector<16x128xf32>
      %c0_28 = arith.constant 0 : index
      %c0_29 = arith.constant 0 : index
      %c0_30 = arith.constant 0 : index
      %58 = vector.load %arg9[%c0_28, %c0_29, %c0_30] : memref<1x16x128xf32, #tpu.memory_space<vmem>>, vector<1x16x128xf32>
      %59 = vector.shape_cast %58 : vector<1x16x128xf32> to vector<16x128xf32>
      %60 = vector.shape_cast %57 : vector<16x128xf32> to vector<1x16x128xf32>
      tpu.vector_store %arg9[%c0_28, %c0_29, %c0_30], %60 {strides = array<i32>} : memref<1x16x128xf32, #tpu.memory_space<vmem>>, vector<1x16x128xf32>,
    } else {
    }
    %c1_i32_5 = arith.constant 1 : i32
    %9 = arith.cmpi eq, %arg0, %c1_i32_5 : i32
    %10 = arith.extui %9 : i1 to i32
    %c0_i32_6 = arith.constant 0 : i32
    %11 = arith.cmpi ne, %10, %c0_i32_6 : i32
    scf.if %11 {
      %cst_7 = arith.constant 0.000000e+00 : f32
      %12 = vector.broadcast %cst_7 : f32 to vector<16x128xf32>
      %c0_i32_8 = arith.constant 0 : i32
      %c9_i32_9 = arith.constant 9 : i32
      %13 = arith.addi %c0_i32_8, %c9_i32_9 : i32
      %c1_i32_10 = arith.constant 1 : i32
      %14 = scf.for %arg10 = %c0_i32_8 to %13 step %c1_i32_10 iter_args(%arg11 = %12) -> (vector<16x128xf32>)  : i32 {
        %62 = arith.index_cast %arg10 : i32 to index
        %c0_33 = arith.constant 0 : index
        %c0_34 = arith.constant 0 : index
        %63 = vector.load %arg2[%62, %c0_33, %c0_34] : memref<9x128x128xi8, #tpu.memory_space<vmem>>, vector<1x128x128xi8>
        %64 = vector.shape_cast %63 : vector<1x128x128xi8> to vector<128x128xi8>
        %65 = arith.sitofp %64 : vector<128x128xi8> to vector<128x128xf32>
        %cst_35 = arith.constant dense<0.000000e+00> : vector<32x128xf32>
        %66 = tpu.matmul %5, %65, %cst_35 {dimension_numbers = #tpu.dot_dimension_numbers<[1], [0], [0], [1], [0, 0, 1, 1], [], []>} : vector<32x128xf32>, vector<128x128xf32>, vector<32x128xf32> -> vector<32x128xf32>
        %67 = arith.index_cast %arg10 : i32 to index
        %c0_36 = arith.constant 0 : index
        %c0_37 = arith.constant 0 : index
        %68 = vector.load %arg7[%67, %c0_36, %c0_37] : memref<9x16x32xf32, #tpu.memory_space<vmem>>, vector<1x16x32xf32>
        %69 = vector.shape_cast %68 : vector<1x16x32xf32> to vector<16x32xf32>
        %cst_38 = arith.constant dense<0.000000e+00> : vector<16x128xf32>
        %70 = tpu.matmul %69, %66, %cst_38 {dimension_numbers = #tpu.dot_dimension_numbers<[1], [0], [0], [1], [0, 0, 1, 1], [], []>} : vector<16x32xf32>, vector<32x128xf32>, vector<16x128xf32> -> vector<16x128xf32>
        %71 = arith.addf %arg11, %70 : vector<16x128xf32>
        scf.yield %71 : vector<16x128xf32>
      }
      %c9_i32_11 = arith.constant 9 : i32
      %c0_12 = arith.constant 0 : index
      %c0_13 = arith.constant 0 : index
      %15 = vector.load %arg8[%c0_12, %c0_13] : memref<16x1xf32, #tpu.memory_space<vmem>>, vector<16x1xf32>
      %16 = vector.broadcast %15 : vector<16x1xf32> to vector<16x128xf32>
      %17 = arith.addf %14, %16 : vector<16x128xf32>
      %cst_14 = arith.constant 5.000000e-01 : f32
      %18 = vector.broadcast %cst_14 : f32 to vector<16x128xf32>
      %19 = arith.mulf %18, %17 : vector<16x128xf32>
      %cst_15 = arith.constant 0.707106769 : f32
      %20 = vector.broadcast %cst_15 : f32 to vector<16x128xf32>
      %21 = arith.mulf %17, %20 : vector<16x128xf32>
      %cst_16 = arith.constant 0.000000e+00 : f32
      %22 = vector.broadcast %cst_16 : f32 to vector<16x128xf32>
      %23 = arith.cmpf oge, %21, %22 : vector<16x128xf32>
      %cst_17 = arith.constant 1.000000e+00 : f32
      %cst_18 = arith.constant -1.000000e+00 : f32
      %24 = vector.broadcast %cst_17 : f32 to vector<16x128xf32>
      %25 = vector.broadcast %cst_18 : f32 to vector<16x128xf32>
      %26 = arith.select %23, %24, %25 : vector<16x128xi1>, vector<16x128xf32>
      %27 = math.absf %21 : vector<16x128xf32>
      %cst_19 = arith.constant 0.327591091 : f32
      %28 = vector.broadcast %cst_19 : f32 to vector<16x128xf32>
      %29 = arith.mulf %28, %27 : vector<16x128xf32>
      %cst_20 = arith.constant 1.000000e+00 : f32
      %30 = vector.broadcast %cst_20 : f32 to vector<16x128xf32>
      %31 = arith.addf %30, %29 : vector<16x128xf32>
      %cst_21 = arith.constant 1.000000e+00 : f32
      %32 = vector.broadcast %cst_21 : f32 to vector<16x128xf32>
      %33 = arith.divf %32, %31 : vector<16x128xf32>
      %cst_22 = arith.constant 1.06140542 : f32
      %34 = vector.broadcast %cst_22 : f32 to vector<16x128xf32>
      %35 = arith.mulf %34, %33 : vector<16x128xf32>
      %cst_23 = arith.constant -1.45315206 : f32
      %36 = vector.broadcast %cst_23 : f32 to vector<16x128xf32>
      %37 = arith.addf %35, %36 : vector<16x128xf32>
      %38 = arith.mulf %37, %33 : vector<16x128xf32>
      %cst_24 = arith.constant 1.42141378 : f32
      %39 = vector.broadcast %cst_24 : f32 to vector<16x128xf32>
      %40 = arith.addf %38, %39 : vector<16x128xf32>
      %41 = arith.mulf %40, %33 : vector<16x128xf32>
      %cst_25 = arith.constant -0.284496725 : f32
      %42 = vector.broadcast %cst_25 : f32 to vector<16x128xf32>
      %43 = arith.addf %41, %42 : vector<16x128xf32>
      %44 = arith.mulf %43, %33 : vector<16x128xf32>
      %cst_26 = arith.constant 0.254829586 : f32
      %45 = vector.broadcast %cst_26 : f32 to vector<16x128xf32>
      %46 = arith.addf %44, %45 : vector<16x128xf32>
      %47 = arith.mulf %46, %33 : vector<16x128xf32>
      %cst_27 = arith.constant 0.000000e+00 : f32
      %48 = vector.broadcast %cst_27 : f32 to vector<16x128xf32>
      %49 = arith.subf %48, %27 : vector<16x128xf32>
      %50 = arith.mulf %49, %27 : vector<16x128xf32>
      %51 = math.exp %50 : vector<16x128xf32>
      %52 = arith.mulf %47, %51 : vector<16x128xf32>
      %cst_28 = arith.constant 1.000000e+00 : f32
      %53 = vector.broadcast %cst_28 : f32 to vector<16x128xf32>
      %54 = arith.subf %53, %52 : vector<16x128xf32>
      %55 = arith.mulf %26, %54 : vector<16x128xf32>
      %cst_29 = arith.constant 1.000000e+00 : f32
      %56 = vector.broadcast %cst_29 : f32 to vector<16x128xf32>
      %57 = arith.addf %56, %55 : vector<16x128xf32>
      %58 = arith.mulf %19, %57 : vector<16x128xf32>
      %c0_30 = arith.constant 0 : index
      %c0_31 = arith.constant 0 : index
      %c0_32 = arith.constant 0 : index
      %59 = vector.load %arg9[%c0_30, %c0_31, %c0_32] : memref<1x16x128xf32, #tpu.memory_space<vmem>>, vector<1x16x128xf32>
      %60 = vector.shape_cast %59 : vector<1x16x128xf32> to vector<16x128xf32>
      %61 = vector.shape_cast %58 : vector<16x128xf32> to vector<1x16x128xf32>
      tpu.vector_store %arg9[%c0_30, %c0_31, %c0_32], %61 {strides = array<i32>} : memref<1x16x128xf32, #tpu.memory_space<vmem>>, vector<1x16x128xf32>,
    } else {
    }
    return
  }
  func.func @transform_0(%arg0: i32) -> (i32, i32) {
    %c0_i32 = arith.constant 0 : i32
    %c0_i32_0 = arith.constant 0 : i32
    %c0_i32_1 = arith.constant 0 : i32
    return %c0_i32, %c0_i32_0 : i32, i32
  }
  func.func @transform_1(%arg0: i32) -> (i32, i32, i32) {
    %c0_i32 = arith.constant 0 : i32
    %c0_i32_0 = arith.constant 0 : i32
    %c0_i32_1 = arith.constant 0 : i32
    %c0_i32_2 = arith.constant 0 : i32
    return %c0_i32, %c0_i32_0, %c0_i32_1 : i32, i32, i32
  }
  func.func @transform_2(%arg0: i32) -> (i32, i32, i32, i32) {
    %c0_i32 = arith.constant 0 : i32
    %c0_i32_0 = arith.constant 0 : i32
    %c0_i32_1 = arith.constant 0 : i32
    %c0_i32_2 = arith.constant 0 : i32
    return %arg0, %c0_i32, %c0_i32_0, %c0_i32_1 : i32, i32, i32, i32
  }
  func.func @transform_3(%arg0: i32) -> (i32, i32, i32, i32) {
    %c0_i32 = arith.constant 0 : i32
    %c0_i32_0 = arith.constant 0 : i32
    %c0_i32_1 = arith.constant 0 : i32
    %c0_i32_2 = arith.constant 0 : i32
    return %arg0, %c0_i32, %c0_i32_0, %c0_i32_1 : i32, i32, i32, i32
  }
  func.func @transform_4(%arg0: i32) -> (i32, i32) {
    %c0_i32 = arith.constant 0 : i32
    %c0_i32_0 = arith.constant 0 : i32
    %c0_i32_1 = arith.constant 0 : i32
    return %c0_i32, %c0_i32_0 : i32, i32
  }
  func.func @transform_5(%arg0: i32) -> (i32, i32) {
    %c0_i32 = arith.constant 0 : i32
    %c0_i32_0 = arith.constant 0 : i32
    %c0_i32_1 = arith.constant 0 : i32
    return %c0_i32, %c0_i32_0 : i32, i32
  }
  func.func @transform_6(%arg0: i32) -> (i32, i32, i32) {
    %c0_i32 = arith.constant 0 : i32
    %c0_i32_0 = arith.constant 0 : i32
    %c0_i32_1 = arith.constant 0 : i32
    %c0_i32_2 = arith.constant 0 : i32
    return %c0_i32, %c0_i32_0, %c0_i32_1 : i32, i32, i32
  }
  func.func @transform_7(%arg0: i32) -> (i32, i32) {
    %c0_i32 = arith.constant 0 : i32
    %c0_i32_0 = arith.constant 0 : i32
    %c0_i32_1 = arith.constant 0 : i32
    return %c0_i32, %c0_i32_0 : i32, i32
  }
  func.func @transform_8(%arg0: i32) -> (i32, i32, i32) {
    %c0_i32 = arith.constant 0 : i32
    %c0_i32_0 = arith.constant 0 : i32
    %c0_i32_1 = arith.constant 0 : i32
    return %arg0, %c0_i32, %c0_i32_0 : i32, i32, i32
  }
}

module attributes {stable_mosaic.version = 11 : i64} {
  func.func @_attn_kernel(%arg0: i32, %arg1: memref<1x33x64xf32, #tpu.memory_space<vmem>>, %arg2: memref<1x64xf32, #tpu.memory_space<vmem>>, %arg3: memref<1x64xf32, #tpu.memory_space<vmem>>, %arg4: memref<64x64xf32, #tpu.memory_space<vmem>>, %arg5: memref<64x64xf32, #tpu.memory_space<vmem>>, %arg6: memref<64x64xf32, #tpu.memory_space<vmem>>, %arg7: memref<64x64xf32, #tpu.memory_space<vmem>>, %arg8: memref<1x64xf32, #tpu.memory_space<vmem>>, %arg9: memref<1x64xf32, #tpu.memory_space<vmem>>, %arg10: memref<1x64xf32, #tpu.memory_space<vmem>>, %arg11: memref<64x8xf32, #tpu.memory_space<vmem>>, %arg12: memref<8x64xf32, #tpu.memory_space<vmem>>, %arg13: memref<1x1x64xf32, #tpu.memory_space<vmem>>) attributes {dimension_semantics = [#tpu.dimension_semantics<parallel>], iteration_bounds = array<i64: 2>, scalar_prefetch = 0 : i64, scratch_operands = 0 : i64, tpu.core_type = #tpu.core_type<tc>, window_params = [{transform_indices = @transform_0, window_bounds = array<i64: 1, 33, 64>}, {pipeline_mode = #tpu.pipeline_mode<synchronous>, transform_indices = @transform_1, window_bounds = array<i64: 1, 64>}, {pipeline_mode = #tpu.pipeline_mode<synchronous>, transform_indices = @transform_2, window_bounds = array<i64: 1, 64>}, {pipeline_mode = #tpu.pipeline_mode<synchronous>, transform_indices = @transform_3, window_bounds = array<i64: 64, 64>}, {pipeline_mode = #tpu.pipeline_mode<synchronous>, transform_indices = @transform_4, window_bounds = array<i64: 64, 64>}, {pipeline_mode = #tpu.pipeline_mode<synchronous>, transform_indices = @transform_5, window_bounds = array<i64: 64, 64>}, {pipeline_mode = #tpu.pipeline_mode<synchronous>, transform_indices = @transform_6, window_bounds = array<i64: 64, 64>}, {pipeline_mode = #tpu.pipeline_mode<synchronous>, transform_indices = @transform_7, window_bounds = array<i64: 1, 64>}, {pipeline_mode = #tpu.pipeline_mode<synchronous>, transform_indices = @transform_8, window_bounds = array<i64: 1, 64>}, {pipeline_mode = #tpu.pipeline_mode<synchronous>, transform_indices = @transform_9, window_bounds = array<i64: 1, 64>}, {pipeline_mode = #tpu.pipeline_mode<synchronous>, transform_indices = @transform_10, window_bounds = array<i64: 64, 8>}, {pipeline_mode = #tpu.pipeline_mode<synchronous>, transform_indices = @transform_11, window_bounds = array<i64: 8, 64>}, {transform_indices = @transform_12, window_bounds = array<i64: 1, 1, 64>}]} {
    %c0 = arith.constant 0 : index
    %c0_0 = arith.constant 0 : index
    %c0_1 = arith.constant 0 : index
    %0 = vector.load %arg1[%c0, %c0_0, %c0_1] : memref<1x33x64xf32, #tpu.memory_space<vmem>>, vector<1x33x64xf32>
    %1 = vector.shape_cast %0 : vector<1x33x64xf32> to vector<33x64xf32>
    %cst = arith.constant dense<0.000000e+00> : vector<33xf32>
    %2 = vector.multi_reduction <add>, %1, %cst [1] : vector<33x64xf32> to vector<33xf32>
    %3 = vector.shape_cast %2 : vector<33xf32> to vector<33x1xf32>
    %cst_2 = arith.constant 6.400000e+01 : f32
    %4 = vector.broadcast %cst_2 : f32 to vector<33x1xf32>
    %5 = arith.divf %3, %4 : vector<33x1xf32>
    %6 = vector.broadcast %5 : vector<33x1xf32> to vector<33x64xf32>
    %7 = arith.subf %1, %6 : vector<33x64xf32>
    %8 = arith.mulf %7, %7 : vector<33x64xf32>
    %cst_3 = arith.constant dense<0.000000e+00> : vector<33xf32>
    %9 = vector.multi_reduction <add>, %8, %cst_3 [1] : vector<33x64xf32> to vector<33xf32>
    %10 = vector.shape_cast %9 : vector<33xf32> to vector<33x1xf32>
    %cst_4 = arith.constant 6.400000e+01 : f32
    %11 = vector.broadcast %cst_4 : f32 to vector<33x1xf32>
    %12 = arith.divf %10, %11 : vector<33x1xf32>
    %cst_5 = arith.constant 9.99999997E-7 : f32
    %13 = vector.broadcast %cst_5 : f32 to vector<33x1xf32>
    %14 = arith.addf %12, %13 : vector<33x1xf32>
    %15 = math.rsqrt %14 : vector<33x1xf32>
    %16 = vector.broadcast %15 : vector<33x1xf32> to vector<33x64xf32>
    %17 = arith.mulf %7, %16 : vector<33x64xf32>
    %c0_6 = arith.constant 0 : index
    %c0_7 = arith.constant 0 : index
    %18 = vector.load %arg2[%c0_6, %c0_7] : memref<1x64xf32, #tpu.memory_space<vmem>>, vector<1x64xf32>
    %19 = vector.broadcast %18 : vector<1x64xf32> to vector<33x64xf32>
    %20 = arith.mulf %17, %19 : vector<33x64xf32>
    %c0_8 = arith.constant 0 : index
    %c0_9 = arith.constant 0 : index
    %21 = vector.load %arg3[%c0_8, %c0_9] : memref<1x64xf32, #tpu.memory_space<vmem>>, vector<1x64xf32>
    %22 = vector.broadcast %21 : vector<1x64xf32> to vector<33x64xf32>
    %23 = arith.addf %20, %22 : vector<33x64xf32>
    %24 = vector.extract_strided_slice %23 {offsets = [0, 0], sizes = [1, 64], strides = [1, 1]} : vector<33x64xf32> to vector<1x64xf32>
    %c0_10 = arith.constant 0 : index
    %c0_11 = arith.constant 0 : index
    %25 = vector.load %arg4[%c0_10, %c0_11] : memref<64x64xf32, #tpu.memory_space<vmem>>, vector<64x64xf32>
    %cst_12 = arith.constant dense<0.000000e+00> : vector<1x64xf32>
    %26 = tpu.matmul %24, %25, %cst_12 {dimension_numbers = #tpu.dot_dimension_numbers<[1], [0], [0], [1], [0, 0, 1, 1], [], []>} : vector<1x64xf32>, vector<64x64xf32>, vector<1x64xf32> -> vector<1x64xf32>
    %c0_13 = arith.constant 0 : index
    %c0_14 = arith.constant 0 : index
    %27 = vector.load %arg5[%c0_13, %c0_14] : memref<64x64xf32, #tpu.memory_space<vmem>>, vector<64x64xf32>
    %cst_15 = arith.constant dense<0.000000e+00> : vector<33x64xf32>
    %28 = tpu.matmul %23, %27, %cst_15 {dimension_numbers = #tpu.dot_dimension_numbers<[1], [0], [0], [1], [0, 0, 1, 1], [], []>} : vector<33x64xf32>, vector<64x64xf32>, vector<33x64xf32> -> vector<33x64xf32>
    %c0_16 = arith.constant 0 : index
    %c0_17 = arith.constant 0 : index
    %29 = vector.load %arg6[%c0_16, %c0_17] : memref<64x64xf32, #tpu.memory_space<vmem>>, vector<64x64xf32>
    %cst_18 = arith.constant dense<0.000000e+00> : vector<33x64xf32>
    %30 = tpu.matmul %23, %29, %cst_18 {dimension_numbers = #tpu.dot_dimension_numbers<[1], [0], [0], [1], [0, 0, 1, 1], [], []>} : vector<33x64xf32>, vector<64x64xf32>, vector<33x64xf32> -> vector<33x64xf32>
    %31 = vector.shape_cast %26 : vector<1x64xf32> to vector<1x64xf32>
    %32 = vector.broadcast %31 : vector<1x64xf32> to vector<33x64xf32>
    %33 = arith.mulf %28, %32 : vector<33x64xf32>
    %c0_19 = arith.constant 0 : index
    %c0_20 = arith.constant 0 : index
    %34 = vector.load %arg11[%c0_19, %c0_20] : memref<64x8xf32, #tpu.memory_space<vmem>>, vector<64x8xf32>
    %cst_21 = arith.constant dense<0.000000e+00> : vector<33x8xf32>
    %35 = tpu.matmul %33, %34, %cst_21 {dimension_numbers = #tpu.dot_dimension_numbers<[1], [0], [0], [1], [0, 0, 1, 1], [], []>} : vector<33x64xf32>, vector<64x8xf32>, vector<33x8xf32> -> vector<33x8xf32>
    %cst_22 = arith.constant 0.353553385 : f32
    %36 = vector.broadcast %cst_22 : f32 to vector<33x8xf32>
    %37 = arith.mulf %35, %36 : vector<33x8xf32>
    %cst_23 = arith.constant dense<0xFF800000> : vector<8xf32>
    %38 = vector.multi_reduction <maximumf>, %37, %cst_23 [0] : vector<33x8xf32> to vector<8xf32>
    %39 = vector.shape_cast %38 : vector<8xf32> to vector<1x8xf32>
    %40 = vector.broadcast %39 : vector<1x8xf32> to vector<33x8xf32>
    %41 = arith.subf %37, %40 : vector<33x8xf32>
    %42 = math.exp %41 : vector<33x8xf32>
    %cst_24 = arith.constant dense<0.000000e+00> : vector<8xf32>
    %43 = vector.multi_reduction <add>, %42, %cst_24 [0] : vector<33x8xf32> to vector<8xf32>
    %44 = vector.shape_cast %43 : vector<8xf32> to vector<1x8xf32>
    %45 = tpu.reciprocal %44 {approx = true} : vector<1x8xf32> -> vector<1x8xf32>
    %46 = vector.broadcast %45 : vector<1x8xf32> to vector<33x8xf32>
    %47 = arith.mulf %42, %46 : vector<33x8xf32>
    %c0_25 = arith.constant 0 : index
    %c0_26 = arith.constant 0 : index
    %48 = vector.load %arg12[%c0_25, %c0_26] : memref<8x64xf32, #tpu.memory_space<vmem>>, vector<8x64xf32>
    %cst_27 = arith.constant dense<0.000000e+00> : vector<33x64xf32>
    %49 = tpu.matmul %47, %48, %cst_27 {dimension_numbers = #tpu.dot_dimension_numbers<[1], [0], [0], [1], [0, 0, 1, 1], [], []>} : vector<33x8xf32>, vector<8x64xf32>, vector<33x64xf32> -> vector<33x64xf32>
    %50 = arith.mulf %49, %30 : vector<33x64xf32>
    %cst_28 = arith.constant dense<0.000000e+00> : vector<64xf32>
    %51 = vector.multi_reduction <add>, %50, %cst_28 [0] : vector<33x64xf32> to vector<64xf32>
    %52 = vector.shape_cast %51 : vector<64xf32> to vector<1x64xf32>
    %c0_29 = arith.constant 0 : index
    %c0_30 = arith.constant 0 : index
    %53 = vector.load %arg7[%c0_29, %c0_30] : memref<64x64xf32, #tpu.memory_space<vmem>>, vector<64x64xf32>
    %cst_31 = arith.constant dense<0.000000e+00> : vector<1x64xf32>
    %54 = tpu.matmul %52, %53, %cst_31 {dimension_numbers = #tpu.dot_dimension_numbers<[1], [0], [0], [1], [0, 0, 1, 1], [], []>} : vector<1x64xf32>, vector<64x64xf32>, vector<1x64xf32> -> vector<1x64xf32>
    %c0_32 = arith.constant 0 : index
    %c0_33 = arith.constant 0 : index
    %55 = vector.load %arg8[%c0_32, %c0_33] : memref<1x64xf32, #tpu.memory_space<vmem>>, vector<1x64xf32>
    %56 = arith.addf %54, %55 : vector<1x64xf32>
    %57 = vector.extract_strided_slice %1 {offsets = [0, 0], sizes = [1, 64], strides = [1, 1]} : vector<33x64xf32> to vector<1x64xf32>
    %58 = arith.addf %56, %57 : vector<1x64xf32>
    %cst_34 = arith.constant dense<0.000000e+00> : vector<1xf32>
    %59 = vector.multi_reduction <add>, %58, %cst_34 [1] : vector<1x64xf32> to vector<1xf32>
    %60 = vector.shape_cast %59 : vector<1xf32> to vector<1x1xf32>
    %cst_35 = arith.constant 6.400000e+01 : f32
    %61 = vector.broadcast %cst_35 : f32 to vector<1x1xf32>
    %62 = arith.divf %60, %61 : vector<1x1xf32>
    %63 = vector.broadcast %62 : vector<1x1xf32> to vector<1x64xf32>
    %64 = arith.subf %58, %63 : vector<1x64xf32>
    %65 = arith.mulf %64, %64 : vector<1x64xf32>
    %cst_36 = arith.constant dense<0.000000e+00> : vector<1xf32>
    %66 = vector.multi_reduction <add>, %65, %cst_36 [1] : vector<1x64xf32> to vector<1xf32>
    %67 = vector.shape_cast %66 : vector<1xf32> to vector<1x1xf32>
    %cst_37 = arith.constant 6.400000e+01 : f32
    %68 = vector.broadcast %cst_37 : f32 to vector<1x1xf32>
    %69 = arith.divf %67, %68 : vector<1x1xf32>
    %cst_38 = arith.constant 9.99999997E-7 : f32
    %70 = vector.broadcast %cst_38 : f32 to vector<1x1xf32>
    %71 = arith.addf %69, %70 : vector<1x1xf32>
    %72 = math.rsqrt %71 : vector<1x1xf32>
    %73 = vector.broadcast %72 : vector<1x1xf32> to vector<1x64xf32>
    %74 = arith.mulf %64, %73 : vector<1x64xf32>
    %c0_39 = arith.constant 0 : index
    %c0_40 = arith.constant 0 : index
    %75 = vector.load %arg9[%c0_39, %c0_40] : memref<1x64xf32, #tpu.memory_space<vmem>>, vector<1x64xf32>
    %76 = arith.mulf %74, %75 : vector<1x64xf32>
    %c0_41 = arith.constant 0 : index
    %c0_42 = arith.constant 0 : index
    %77 = vector.load %arg10[%c0_41, %c0_42] : memref<1x64xf32, #tpu.memory_space<vmem>>, vector<1x64xf32>
    %78 = arith.addf %76, %77 : vector<1x64xf32>
    %c0_43 = arith.constant 0 : index
    %c0_44 = arith.constant 0 : index
    %c0_45 = arith.constant 0 : index
    %79 = vector.load %arg13[%c0_43, %c0_44, %c0_45] : memref<1x1x64xf32, #tpu.memory_space<vmem>>, vector<1x1x64xf32>
    %80 = vector.shape_cast %79 : vector<1x1x64xf32> to vector<1x64xf32>
    %81 = vector.shape_cast %78 : vector<1x64xf32> to vector<1x1x64xf32>
    tpu.vector_store %arg13[%c0_43, %c0_44, %c0_45], %81 {strides = array<i32>} : memref<1x1x64xf32, #tpu.memory_space<vmem>>, vector<1x1x64xf32>,
    return
  }
  func.func @transform_0(%arg0: i32) -> (i32, i32, i32) {
    %c0_i32 = arith.constant 0 : i32
    %c0_i32_0 = arith.constant 0 : i32
    %c0_i32_1 = arith.constant 0 : i32
    return %arg0, %c0_i32, %c0_i32_0 : i32, i32, i32
  }
  func.func @transform_1(%arg0: i32) -> (i32, i32) {
    %c0_i32 = arith.constant 0 : i32
    %c0_i32_0 = arith.constant 0 : i32
    %c0_i32_1 = arith.constant 0 : i32
    return %c0_i32, %c0_i32_0 : i32, i32
  }
  func.func @transform_2(%arg0: i32) -> (i32, i32) {
    %c0_i32 = arith.constant 0 : i32
    %c0_i32_0 = arith.constant 0 : i32
    %c0_i32_1 = arith.constant 0 : i32
    return %c0_i32, %c0_i32_0 : i32, i32
  }
  func.func @transform_3(%arg0: i32) -> (i32, i32) {
    %c0_i32 = arith.constant 0 : i32
    %c0_i32_0 = arith.constant 0 : i32
    %c0_i32_1 = arith.constant 0 : i32
    return %c0_i32, %c0_i32_0 : i32, i32
  }
  func.func @transform_4(%arg0: i32) -> (i32, i32) {
    %c0_i32 = arith.constant 0 : i32
    %c0_i32_0 = arith.constant 0 : i32
    %c0_i32_1 = arith.constant 0 : i32
    return %c0_i32, %c0_i32_0 : i32, i32
  }
  func.func @transform_5(%arg0: i32) -> (i32, i32) {
    %c0_i32 = arith.constant 0 : i32
    %c0_i32_0 = arith.constant 0 : i32
    %c0_i32_1 = arith.constant 0 : i32
    return %c0_i32, %c0_i32_0 : i32, i32
  }
  func.func @transform_6(%arg0: i32) -> (i32, i32) {
    %c0_i32 = arith.constant 0 : i32
    %c0_i32_0 = arith.constant 0 : i32
    %c0_i32_1 = arith.constant 0 : i32
    return %c0_i32, %c0_i32_0 : i32, i32
  }
  func.func @transform_7(%arg0: i32) -> (i32, i32) {
    %c0_i32 = arith.constant 0 : i32
    %c0_i32_0 = arith.constant 0 : i32
    %c0_i32_1 = arith.constant 0 : i32
    return %c0_i32, %c0_i32_0 : i32, i32
  }
  func.func @transform_8(%arg0: i32) -> (i32, i32) {
    %c0_i32 = arith.constant 0 : i32
    %c0_i32_0 = arith.constant 0 : i32
    %c0_i32_1 = arith.constant 0 : i32
    return %c0_i32, %c0_i32_0 : i32, i32
  }
  func.func @transform_9(%arg0: i32) -> (i32, i32) {
    %c0_i32 = arith.constant 0 : i32
    %c0_i32_0 = arith.constant 0 : i32
    %c0_i32_1 = arith.constant 0 : i32
    return %c0_i32, %c0_i32_0 : i32, i32
  }
  func.func @transform_10(%arg0: i32) -> (i32, i32) {
    %c0_i32 = arith.constant 0 : i32
    %c0_i32_0 = arith.constant 0 : i32
    %c0_i32_1 = arith.constant 0 : i32
    return %c0_i32, %c0_i32_0 : i32, i32
  }
  func.func @transform_11(%arg0: i32) -> (i32, i32) {
    %c0_i32 = arith.constant 0 : i32
    %c0_i32_0 = arith.constant 0 : i32
    %c0_i32_1 = arith.constant 0 : i32
    return %c0_i32, %c0_i32_0 : i32, i32
  }
  func.func @transform_12(%arg0: i32) -> (i32, i32, i32) {
    %c0_i32 = arith.constant 0 : i32
    %c0_i32_0 = arith.constant 0 : i32
    %c0_i32_1 = arith.constant 0 : i32
    return %arg0, %c0_i32, %c0_i32_0 : i32, i32, i32
  }
}

</mosaic_0001>

<bundles_post_ra>
// kernel: squeeze.3
= control target key start
LH: loop header
LB: loop body
LE: loop exit
PB: predicated region body
PF: predicated region fallthrough
CT: control target
= control target key end

     0   :  { %vm3_vm0 = vcmask 523264   ;;  %s222_s0 = inlined_call_operand.vmem [shape: f32[1,16,128], index: 0, kind: input, shape index: {}]   ;;  %s223_s1 = inlined_call_operand.vmem [shape: f32[16,2,64], index: 1, kind: output, shape index: {}]  }
   0x1   :  { %v13_v0 = vld [vmem:[%s222_s0] sm:$0xff]   ;;  %v140_v1 = vld [vmem:[%s222_s0 + $0x8] sm:$0xff]   ;;  %s157_s0 = smov 64  }
   0x2   :  { %14 = vrot.lane.b32.xlu0 %v13_v0, %s157_s0  ;;  %4 = vst.msk [vmem:[#allocation0] ss:$8 sm:$0xf] %vm3_vm0, %v13_v0   ;;  %5 = vst.msk [vmem:[#allocation0] ss:$8 sm:$0xf0] %vm3_vm0, %v13_v0  }
   0x3   :  { %10 = vst.msk [vmem:[#allocation0 + $0x40] ss:$8 sm:$0xf] %vm3_vm0, %v140_v1   ;;  %12 = vst.msk [vmem:[#allocation0 + $0x40] ss:$8 sm:$0xf0] %vm3_vm0, %v140_v1  }
   0x6   :  { %23 = vrot.lane.b32.xlu0 %v140_v1, %s157_s0 }
  0x74   :  { %v15_v2 = vpop.permute.xlu0 %14  }
  0x75   :  { %18 = vst.msk [vmem:[#allocation0 + $0x1] ss:$8 sm:$0xf] %vm3_vm0, %v15_v2   ;;  %20 = vst.msk [vmem:[#allocation0 + $0x1] ss:$8 sm:$0xf0] %vm3_vm0, %v15_v2  }
  0x78   :  { %v24_v3 = vpop.permute.xlu0 %23  }
  0x79   :  { %27 = vst.msk [vmem:[#allocation0 + $0x41] ss:$8 sm:$0xf] %vm3_vm0, %v24_v3   ;;  %29 = vst.msk [vmem:[#allocation0 + $0x41] ss:$8 sm:$0xf0] %vm3_vm0, %v24_v3  }
  0x7c   :  { %v33_v4 = vld [vmem:[#allocation0] sm:$0x3]  ;;  %v37_v5 = vld [vmem:[#allocation0 + $0x8] sm:$0x3]  ;;  %v42_v6 = vld [vmem:[#allocation0 + $0x10] sm:$0x3] }
  0x7d   :  { %35 = vst [vmem:[%s223_s1] sm:$0x3] %v33_v4  ;;  %141 = vst [vmem:[%s223_s1 + $0x2] sm:$0x3] %v37_v5  ;;  %v48_v7 = vld [vmem:[#allocation0 + $0x18] sm:$0x3] }
  0x7e   :  { %142 = vst [vmem:[%s223_s1 + $0x4] sm:$0x3] %v42_v6  ;;  %v54_v8 = vld [vmem:[#allocation0 + $0x20] sm:$0x3]  ;;  %v60_v9 = vld [vmem:[#allocation0 + $0x28] sm:$0x3] }
  0x7f   :  { %143 = vst [vmem:[%s223_s1 + $0x6] sm:$0x3] %v48_v7  ;;  %144 = vst [vmem:[%s223_s1 + $0x8] sm:$0x3] %v54_v8  ;;  %v66_v10 = vld [vmem:[#allocation0 + $0x30] sm:$0x3] }
  0x80   :  { %145 = vst [vmem:[%s223_s1 + $0xa] sm:$0x3] %v60_v9  ;;  %v72_v11 = vld [vmem:[#allocation0 + $0x38] sm:$0x3]  ;;  %146 = vst [vmem:[%s223_s1 + $0xc] sm:$0x3] %v66_v10 }
  0x81   :  { %147 = vst [vmem:[%s223_s1 + $0xe] sm:$0x3] %v72_v11  ;;  %v78_v12 = vld [vmem:[#allocation0 + $0x40] sm:$0x3]  ;;  %v84_v13 = vld [vmem:[#allocation0 + $0x48] sm:$0x3] }
  0x82   :  { %v90_v14 = vld [vmem:[#allocation0 + $0x50] sm:$0x3]  ;;  %148 = vst [vmem:[%s223_s1 + $0x10] sm:$0x3] %v78_v12  ;;  %149 = vst [vmem:[%s223_s1 + $0x12] sm:$0x3] %v84_v13 }
  0x83   :  { %150 = vst [vmem:[%s223_s1 + $0x14] sm:$0x3] %v90_v14  ;;  %v96_v15 = vld [vmem:[#allocation0 + $0x58] sm:$0x3]  ;;  %v102_v16 = vld [vmem:[#allocation0 + $0x60] sm:$0x3] }
  0x84   :  { %v108_v17 = vld [vmem:[#allocation0 + $0x68] sm:$0x3]  ;;  %151 = vst [vmem:[%s223_s1 + $0x16] sm:$0x3] %v96_v15  ;;  %152 = vst [vmem:[%s223_s1 + $0x18] sm:$0x3] %v102_v16 }
  0x85   :  { %153 = vst [vmem:[%s223_s1 + $0x1a] sm:$0x3] %v108_v17  ;;  %v114_v18 = vld [vmem:[#allocation0 + $0x70] sm:$0x3]  ;;  %v120_v19 = vld [vmem:[#allocation0 + $0x78] sm:$0x3] }
  0x86   :  { %154 = vst [vmem:[%s223_s1 + $0x1c] sm:$0x3] %v114_v18  ;;  %155 = vst [vmem:[%s223_s1 + $0x1e] sm:$0x3] %v120_v19 }

// kernel: block_forward.3
= control target key start
LH: loop header
LB: loop body
LE: loop exit
PB: predicated region body
PF: predicated region fallthrough
CT: control target
= control target key end

     0   :  { %s1665_s21 = smov 0   ;;  %s1984_s0 = inlined_call_operand.vmem [shape: f32[2,33,64], index: 0, kind: input, shape index: {}]   ;;  %s1985_s1 = inlined_call_operand.vmem [shape: f32[1,64], index: 1, kind: input, shape index: {}]   ;;  %s1986_s2 = inlined_call_operand.vmem [shape: f32[1,64], index: 2, kind: input, shape index: {}]   ;;  %s1987_s3 = inlined_call_operand.vmem [shape: f32[64,64], index: 3, kind: input, shape index: {}]   ;;  %s1988_s4 = inlined_call_operand.vmem [shape: f32[64,64], index: 4, kind: input, shape index: {}]   ;;  %s1989_s5 = inlined_call_operand.vmem [shape: f32[64,64], index: 5, kind: input, shape index: {}]   ;;  %s1990_s6 = inlined_call_operand.vmem [shape: f32[64,64], index: 6, kind: input, shape index: {}]   ;;  %s1991_s7 = inlined_call_operand.vmem [shape: f32[1,64], index: 7, kind: input, shape index: {}]   ;;  %s1992_s8 = inlined_call_operand.vmem [shape: f32[1,64], index: 8, kind: input, shape index: {}]   ;;  %s1993_s9 = inlined_call_operand.vmem [shape: f32[1,64], index: 9, kind: input, shape index: {}]   ;;  %s1994_s10 = inlined_call_operand.vmem [shape: f32[64,8], index: 10, kind: input, shape index: {}]   ;;  %s1995_s11 = inlined_call_operand.vmem [shape: f32[8,64], index: 11, kind: input, shape index: {}]   ;;  %s1996_s12 = inlined_call_operand.vmem [shape: f32[2,1,64], index: 12, kind: output, shape index: {}]  }
   0x1 LB: > { %s1250_s22 = sadd.s32 4294967295, %s1595_s21   ;;  %p1254_p0 = scmp.ge.s32.totalorder %s1595_s21, 1  ;;  %s1595_s21 = sphi %s1665_s21, %s22_s21  }
   0x2   : > { %p362_p1 = scmp.lt.s32.totalorder %s1595_s21, 3 }
   0x4   : > { %p363_p2 = pnand %p1254_p0, %p362_p1 }
   0x5   : > { %p402_p3 = scmp.lt.s32.totalorder (!%p363_p2), %s1250_s22, 1  ;;  %vm415_vm0 = vcmask (!%p363_p2), 523264   ;;  %vm428_vm1 = vcmask (!%p363_p2), 516096   ;;  %v507_v35 = vld [vmem:[%s1987_s3] sm:$0xff] (!%p363_p2)  ;;  %v508_v36 = vld [vmem:[%s1987_s3 + $0x8] sm:$0xff] (!%p363_p2)  ;;  %v1597_v40 = vmov (!%p363_p2), 0.0|0.0  }
   0x6   : > { %366 = sbr.rel (%p363_p2) target bundleno = 1621 (0x655), region = 68  ;;  %v1494_v37 = vpack.c.bf16 (!%p363_p2), %v508_v36, %v507_v35  ;;  %v588_v38 = vld [vmem:[%s1988_s4] sm:$0xff] (!%p363_p2)  ;;  %v589_v39 = vld [vmem:[%s1988_s4 + $0x8] sm:$0xff] (!%p363_p2)  ;;  %1493 = vmatprep.subr.bf16.mxu0 (!%p363_p2), %v1597_v40  ;;  %1505 = vmatprep.subr.bf16.mxu1 (!%p363_p2), %v1597_v40  ;;  %v509_v42 = vld [vmem:[%s1987_s3 + $0x10] sm:$0xff] (!%p363_p2)  ;;  %vm1598_vm2 = vmmov (!%p363_p2), 0   ;;  %v1599_v59 = vmov (!%p363_p2), 0.0  }
   0x7   : > { %v1506_v41 = vpack.c.bf16 (!%p363_p2), %v589_v39, %v588_v38  ;;  %v510_v43 = vld [vmem:[%s1987_s3 + $0x18] sm:$0xff] (!%p363_p2)  ;;  %v590_v45 = vld [vmem:[%s1988_s4 + $0x10] sm:$0xff] (!%p363_p2)  ;;  %v511_v48 = vld [vmem:[%s1987_s3 + $0x20] sm:$0xff] (!%p363_p2)  ;;  %1361 = vmatprep.mubr.msk.f32.mxu0 (!%p363_p2), %vm1598_vm2, %v1599_v59  ;;  %1380 = vmatprep.mubr.msk.f32.mxu1 (!%p363_p2), %vm1598_vm2, %v1599_v59  ;;  %vm923_vm3 = vcmask (!%p363_p2), 64512   ;;  %vm928_vm4 = vcmask (!%p363_p2), 57344  }
   0x8   : > { %1495 = vmatpush3.bf16.msra.mxu0 (!%p363_p2), %v1494_v37  ;;  %v1497_v44 = vpack.c.bf16 (!%p363_p2), %v510_v43, %v509_v42  ;;  %v591_v46 = vld [vmem:[%s1988_s4 + $0x18] sm:$0xff] (!%p363_p2)  ;;  %v512_v49 = vld [vmem:[%s1987_s3 + $0x28] sm:$0xff] (!%p363_p2)  ;;  %v592_v51 = vld [vmem:[%s1988_s4 + $0x20] sm:$0xff] (!%p363_p2) }
   0x9   : > { %1507 = vmatpush3.bf16.msra.mxu1 (!%p363_p2), %v1506_v41  ;;  %1496 = vmatprep.subr.bf16.mxu0 (!%p363_p2), %v1597_v40  ;;  %v1509_v47 = vpack.c.bf16 (!%p363_p2), %v591_v46, %v590_v45  ;;  %v1500_v50 = vpack.c.bf16 (!%p363_p2), %v512_v49, %v511_v48  ;;  %v593_v52 = vld [vmem:[%s1988_s4 + $0x28] sm:$0xff] (!%p363_p2)  ;;  %v513_v54 = vld [vmem:[%s1987_s3 + $0x30] sm:$0xff] (!%p363_p2)  ;;  %v514_v55 = vld [vmem:[%s1987_s3 + $0x38] sm:$0xff] (!%p363_p2) }
   0xa   : > { %1508 = vmatprep.subr.bf16.mxu1 (!%p363_p2), %v1597_v40  ;;  %v1512_v53 = vpack.c.bf16 (!%p363_p2), %v593_v52, %v592_v51  ;;  %v594_v56 = vld [vmem:[%s1988_s4 + $0x30] sm:$0xff] (!%p363_p2)  ;;  %v1503_v57 = vpack.c.bf16 (!%p363_p2), %v514_v55, %v513_v54  ;;  %v595_v58 = vld [vmem:[%s1988_s4 + $0x38] sm:$0xff] (!%p363_p2)  ;;  %v702_v38 = vld [vmem:[%s1989_s5 + $0x20] sm:$0xff] (!%p363_p2) }
   0xb   : > { %v1515_v60 = vpack.c.bf16 (!%p363_p2), %v595_v58, %v594_v56  ;;  %v807_v35 = vld [vmem:[%s1994_s10 + $0x10] sm:$0xff] (!%p363_p2)  ;;  %v808_v36 = vld [vmem:[%s1994_s10 + $0x18] sm:$0xff] (!%p363_p2)  ;;  %v703_v39 = vld [vmem:[%s1989_s5 + $0x28] sm:$0xff] (!%p363_p2) }
   0xc   : > { %1498 = vmatpush3.bf16.msra.mxu0 (!%p363_p2), %v1497_v44  ;;  %v1533_v44 = vpack.c.bf16 (!%p363_p2), %v808_v36, %v807_v35  ;;  %v809_v46 = vld [vmem:[%s1994_s10 + $0x20] sm:$0xff] (!%p363_p2)  ;;  %v1524_v48 = vpack.c.bf16 (!%p363_p2), %v703_v39, %v702_v38  ;;  %v705_v49 = vld [vmem:[%s1989_s5 + $0x38] sm:$0xff] (!%p363_p2) }
   0xd   : > { %s1998_s22 = smov (!%p402_p3, %s1250_s22), 1  ;;  %1510 = vmatpush3.bf16.msra.mxu1 %v1509_v47  ;;  %1499 = vmatprep.subr.bf16.mxu0 %v1597_v40  ;;  %v810_v47 = vld [vmem:[%s1994_s10 + $0x28] sm:$0xff]  ;;  %v812_v58 = vld [vmem:[%s1994_s10 + $0x38] sm:$0xff] }
   0xe   : > { %s1553_s23 = smul.u32 40, %s1998_s22  ;;  %1511 = vmatprep.subr.bf16.mxu1 %v1597_v40  ;;  %s409_s25 = scalar_lea.vmem %s1996_s12, %s1998_s22 }
  0x10   : > { %s406_s26 = scalar_lea.vmem %s1984_s0, %s1553_s23  ;;  %1501 = vmatpush3.bf16.msra.mxu0 %v1500_v50 }
  0x11   : > { %v1679_v0 = vld [vmem:[%s406_s26] sm:$0xff]  ;;  %v412_v1 = vld [vmem:[%s406_s26 + $0x10] sm:$0xff]  ;;  %v411_v2 = vld [vmem:[%s406_s26 + $0x8] sm:$0xff]  ;;  %1513 = vmatpush3.bf16.msra.mxu1 %v1512_v53  ;;  %1502 = vmatprep.subr.bf16.mxu0 %v1597_v40  ;;  %v1536_v53 = vpack.c.bf16 %v810_v47, %v809_v46 }
  0x12   : > { %v416_v3 = vsel %vm415_vm0, %v1679_v0, 0.0  ;;  %v422_v4 = vsel %vm415_vm0, %v412_v1, 0.0  ;;  %v413_v5 = vld [vmem:[%s406_s26 + $0x18] sm:$0xff]  ;;  %v419_v6 = vsel %vm415_vm0, %v411_v2, 0.0  ;;  %v414_v8 = vld [vmem:[%s406_s26 + $0x20] sm:$0x1]  ;;  %1514 = vmatprep.subr.bf16.mxu1 %v1597_v40 }
  0x13   : > { %417 = vadd.xlane.f32.xlu0 %v416_v3  ;;  %423 = vadd.xlane.f32.xlu1 %v422_v4  ;;  %v425_v7 = vsel %vm415_vm0, %v413_v5, 0.0  ;;  %v429_v9 = vsel %vm428_vm1, %v414_v8, 0.0 }
  0x14   : > { %1504 = vmatpush3.bf16.msra.mxu0 %v1503_v57  ;;  %v811_v57 = vld [vmem:[%s1994_s10 + $0x30] sm:$0xff] }
  0x15   : > { %1516 = vmatpush3.bf16.msra.mxu1 %v1515_v60  ;;  %1517 = vmatprep.subr.bf16.mxu0 %v1597_v40  ;;  %v1539_v60 = vpack.c.bf16 %v812_v58, %v811_v57 }
  0x16   : > { %1529 = vmatprep.subr.bf16.mxu1 %v1597_v40 }
  0x17   : > { %420 = vadd.xlane.f32.xlu0 %v419_v6  ;;  %426 = vadd.xlane.f32.xlu1 %v425_v7 }
  0x1b   : > { %430 = vadd.xlane.f32.xlu0 %v429_v9 }
  0xa0   : > { %v418_v10 = vpop.xlane.xlu0 %417  ;;  %v424_v11 = vpop.xlane.xlu1 %423 }
  0xa1   : > { %v433_v12 = vmul.f32 0.015625, %v418_v10  ;;  %v435_v13 = vmul.f32 0.015625, %v424_v11 }
  0xa3   : > { %v1688_v14 = vsub.f32 %v1679_v0, %v433_v12  ;;  %v1690_v15 = vsub.f32 %v412_v1, %v435_v13 }
  0xa4   : > { %v421_v16 = vpop.xlane.xlu0 %420  ;;  %v427_v17 = vpop.xlane.xlu1 %426 }
  0xa5   : > { %v434_v18 = vmul.f32 0.015625, %v421_v16  ;;  %v436_v19 = vmul.f32 0.015625, %v427_v17  ;;  %v443_v20 = vmul.f32 %v1688_v14, %v1688_v14  ;;  %v445_v21 = vmul.f32 %v1690_v15, %v1690_v15  ;;  %v1256_v16 = vld [vmem:[%s1985_s1] ss:$0 sm:$0xff] }
  0xa7   : > { %v1696_v22 = vsub.f32 %v411_v2, %v434_v18  ;;  %v1698_v23 = vsub.f32 %v413_v5, %v436_v19  ;;  %v448_v24 = vsel %vm415_vm0, %v443_v20, 0.0  ;;  %v454_v27 = vsel %vm415_vm0, %v445_v21, 0.0  ;;  %v698_v18 = vld [vmem:[%s1989_s5] sm:$0xff]  ;;  %v699_v19 = vld [vmem:[%s1989_s5 + $0x8] sm:$0xff] }
  0xa8   : > { %449 = vadd.xlane.f32.xlu1 %v448_v24  ;;  %v431_v25 = vpop.xlane.xlu0 %430  ;;  %v1257_v20 = vld [vmem:[%s1986_s2] ss:$0 sm:$0xff] }
  0xa9   : > { %v437_v26 = vmul.f32 0.015625, %v431_v25  ;;  %v444_v28 = vmul.f32 %v1696_v22, %v1696_v22  ;;  %v446_v29 = vmul.f32 %v1698_v23, %v1698_v23  ;;  %v805_v24 = vld [vmem:[%s1994_s10] sm:$0xff] }
  0xab   : > { %v1706_v30 = vsub.f32 %v414_v8, %v437_v26  ;;  %v451_v31 = vsel %vm415_vm0, %v444_v28, 0.0  ;;  %v457_v32 = vsel %vm415_vm0, %v446_v29, 0.0  ;;  %v1518_v26 = vpack.c.bf16 %v699_v19, %v698_v18  ;;  %v700_v29 = vld [vmem:[%s1989_s5 + $0x10] sm:$0xff] }
  0xac   : > { %455 = vadd.xlane.f32.xlu1 %v454_v27  ;;  %452 = vadd.xlane.f32.xlu0 %v451_v31  ;;  %v701_v31 = vld [vmem:[%s1989_s5 + $0x18] sm:$0xff] }
  0xad   : > { %v447_v33 = vmul.f32 %v1706_v30, %v1706_v30  ;;  %v1521_v37 = vpack.c.bf16 %v701_v31, %v700_v29 }
  0xaf   : > { %v460_v34 = vsel %vm428_vm1, %v447_v33, 0.0 }
  0xb0   : > { %458 = vadd.xlane.f32.xlu0 %v457_v32  ;;  %461 = vadd.xlane.f32.xlu1 %v460_v34 }
 0x135   : > { %v450_v61 = vpop.xlane.xlu1 %449 }
 0x136   : > { %v463_v62 = vmul.f32 0.015625, %v450_v61  ;;  %v796_v61 = vlaneseq }
 0x138   : > { %v468_v63 = vadd.f32 1e-06, %v463_v62  ;;  %v797_v62 = vshrl.u32 %v796_v61, 7 }
 0x139   : > { %v456_v1 = vpop.xlane.xlu1 %455  ;;  %v453_v2 = vpop.xlane.xlu0 %452 }
 0x13a   : > { %1565 = vrsqrt.f32 %v468_v63  ;;  %v465_v3 = vmul.f32 0.015625, %v456_v1  ;;  %v464_v4 = vmul.f32 0.015625, %v453_v2  ;;  %v798_v63 = vsub.s32 0, %v797_v62 }
 0x13c   : > { %v470_v5 = vadd.f32 1e-06, %v465_v3  ;;  %v469_v6 = vadd.f32 1e-06, %v464_v4 }
 0x13d   : > { %v462_v7 = vpop.xlane.xlu1 %461  ;;  %v459_v8 = vpop.xlane.xlu0 %458 }
 0x13e   : > { %1567 = vrsqrt.f32 %v470_v5  ;;  %v467_v9 = vmul.f32 0.015625, %v462_v7  ;;  %v466_v10 = vmul.f32 0.015625, %v459_v8 }
 0x13f   : > { %1569 = vrsqrt.f32 %v469_v6 }
 0x140   : > { %v471_v11 = vadd.f32 1e-06, %v466_v10  ;;  %v472_v12 = vadd.f32 1e-06, %v467_v9 }
 0x142   : > { %1571 = vrsqrt.f32 %v471_v11 }
 0x143   : > { %1573 = vrsqrt.f32 %v472_v12 }
 0x144   : > { %v1566_v13 = vpop.eup %1565 }
 0x145   : > { %v478_v17 = vmul.f32 %v1566_v13, %v1688_v14  ;;  %v806_v14 = vld [vmem:[%s1994_s10 + $0x8] sm:$0xff] }
 0x146   : > { %v1530_v34 = vpack.c.bf16 %v806_v14, %v805_v24 }
 0x147   : > { %v490_v21 = vmul.f32 %v1256_v16, %v478_v17 }
 0x148   : > { %v1568_v25 = vpop.eup %1567 }
 0x149   : > { %v1570_v27 = vpop.eup %1569  ;;  %v502_v28 = vadd.f32 %v1257_v20, %v490_v21  ;;  %v480_v33 = vmul.f32 %v1568_v25, %v1690_v15 }
 0x14a   : > { %v479_v32 = vmul.f32 %v1570_v27, %v1696_v22 }
 0x14b   : > { %1362 = vmatmul.mubr.msk.f32.vlgmr.msra.gmra.mrb[0].mxu0 %vm415_vm0, %v502_v28  ;;  %1381 = vmatmul.mubr.msk.f32.vlgmr.msra.gmra.mrb[0].mxu1 %vm415_vm0, %v502_v28  ;;  %v492_v42 = vmul.f32 %v1256_v16, %v480_v33  ;;  %v976_v33 = vld [vmem:[%s1995_s11] sm:$0xff] }
 0x14c   : > { %1519 = vmatpush3.bf16.msra.mxu0 %v1518_v26  ;;  %1383 = vmatprep.mubr.msk.f32.mxu1 %vm1598_vm2, %v1599_v59  ;;  %v491_v22 = vmul.f32 %v1256_v16, %v479_v32  ;;  %v1572_v15 = vpop.eup %1571 }
 0x14d   : > { %1520 = vmatprep.subr.bf16.mxu0 %v1597_v40  ;;  %1411 = vmatprep.mubr.msk.f32.mxu0 %vm1598_vm2, %v1599_v59  ;;  %v481_v43 = vmul.f32 %v1572_v15, %v1698_v23  ;;  %v1574_v45 = vpop.eup %1573  ;;  %v704_v23 = vld [vmem:[%s1989_s5 + $0x30] sm:$0xff]  ;;  %v504_v50 = vadd.f32 %v1257_v20, %v492_v42 }
 0x14e   : > { %v503_v41 = vadd.f32 %v1257_v20, %v491_v22  ;;  %1531 = vmatpush3.bf16.msra.mxu1 %v1530_v34  ;;  %v482_v52 = vmul.f32 %v1574_v45, %v1706_v30  ;;  %v1527_v54 = vpack.c.bf16 %v705_v49, %v704_v23 }
 0x14f   : > { %1532 = vmatprep.subr.bf16.mxu1 %v1597_v40  ;;  %v493_v51 = vmul.f32 %v1256_v16, %v481_v43 }
 0x150   : > { %1384 = vmatmul.mubr.msk.f32.gmra.mrb[2].mxu1 %vm415_vm0, %v503_v41  ;;  %1522 = vmatpush3.bf16.msra.mxu0 %v1521_v37  ;;  %v494_v56 = vmul.f32 %v1256_v16, %v482_v52 }
 0x151   : > { %1386 = vmatprep.mubr.msk.f32.mxu1 %vm1598_vm2, %v1599_v59  ;;  %1523 = vmatprep.subr.bf16.mxu0 %v1597_v40  ;;  %v505_v55 = vadd.f32 %v1257_v20, %v493_v51 }
 0x152   : > { %1534 = vmatpush3.bf16.msra.mxu1 %v1533_v44  ;;  %v506_v30 = vadd.f32 %v1257_v20, %v494_v56 }
 0x153   : > { %1535 = vmatprep.subr.bf16.mxu1 %v1597_v40 }
 0x154   : > { %1387 = vmatmul.mubr.msk.f32.gmra.mrb[4].mxu1 %vm415_vm0, %v504_v50  ;;  %1525 = vmatpush3.bf16.msra.mxu0 %v1524_v48 }
 0x155   : > { %1389 = vmatprep.mubr.msk.f32.mxu1 %vm1598_vm2, %v1599_v59  ;;  %1526 = vmatprep.subr.bf16.mxu0 %v1597_v40 }
 0x156   : > { %1537 = vmatpush3.bf16.msra.mxu1 %v1536_v53 }
 0x157   : > { %1538 = vmatprep.subr.bf16.mxu1 %v1597_v40 }
 0x158   : > { %1390 = vmatmul.mubr.msk.f32.gmra.mrb[6].mxu1 %vm415_vm0, %v505_v55  ;;  %1528 = vmatpush3.bf16.msra.mxu0 %v1527_v54 }
 0x159   : > { %1392 = vmatprep.mubr.msk.f32.mxu1 %vm1598_vm2, %v1599_v59  ;;  %1457 = vmatprep.subr.mxu0 %v1599_v59 }
 0x15a   : > { %1540 = vmatpush3.bf16.msra.mxu1 %v1539_v60 }
 0x15b   : > { %1412 = vmatmul.mubr.msk.f32.vlgmr.msra.gmra.mrb[2].mxu0 %vm415_vm0, %v502_v28  ;;  %1541 = vmatprep.subr.bf16.mxu1 %v1597_v40 }
 0x15c   : > { %1393 = vmatmul.mubr.msk.f32.gmra.mrb[8].mxu1 %vm415_vm0, %v506_v30  ;;  %1414 = vmatprep.mubr.msk.f32.mxu0 %vm1598_vm2, %v1599_v59 }
 0x15d   : > { %1442 = vmatprep.mubr.msk.f32.mxu1 %vm1598_vm2, %v1599_v59  ;;  %1458 = vmatpush3.msra.mxu0 %v976_v33 }
 0x15f   : > { %1415 = vmatmul.mubr.msk.f32.gmra.mrb[4].mxu0 %vm415_vm0, %v503_v41 }
 0x160   : > { %1417 = vmatprep.mubr.msk.f32.mxu0 %vm1598_vm2, %v1599_v59 }
 0x163   : > { %1418 = vmatmul.mubr.msk.f32.gmra.mrb[6].mxu0 %vm415_vm0, %v504_v50 }
 0x164   : > { %1420 = vmatprep.mubr.msk.f32.mxu0 %vm1598_vm2, %v1599_v59 }
 0x167   : > { %1421 = vmatmul.mubr.msk.f32.gmra.mrb[8].mxu0 %vm415_vm0, %v505_v55 }
 0x168   : > { %1423 = vmatprep.mubr.msk.f32.mxu0 %vm1598_vm2, %v1599_v59 }
 0x16b   : > { %1424 = vmatmul.mubr.msk.f32.gmra.mrb[10].mxu0 %vm415_vm0, %v506_v30 }
 0x16c   : > { %1459 = vmatprep.mubr.msk.f32.mxu0 %vm1598_vm2, %v1599_v59 }
 0x21e   : > { %v584_v1 = vpop.f32.mrb[0].mxu0  ;;  %v674_v2 = vpop.f32.mrb[0].mxu1 }
 0x21f   : > { %v799_v3 = vrot.slane %v584_v1, %v798_v63  ;;  %v1363_v4 = vpop.f32.mrb[1].mxu0  ;;  %v1382_v5 = vpop.f32.mrb[1].mxu1 }
 0x221   : > { %v800_v6 = vmul.f32 %v799_v3, %v674_v2 }
 0x223   : > { %v679_v7 = vpop.f32.mrb[2].mxu1  ;;  %1443 = vmatmul.mubr.msk.f32.vlgmr.msra.gmra.mrb[10].mxu1 %vm415_vm0, %v800_v6 }
 0x224   : > { %v801_v8 = vmul.f32 %v799_v3, %v679_v7  ;;  %v1385_v9 = vpop.f32.mrb[3].mxu1  ;;  %1445 = vmatprep.mubr.msk.f32.mxu1 %vm1598_vm2, %v1599_v59 }
 0x227   : > { %v684_v10 = vpop.f32.mrb[4].mxu1  ;;  %1446 = vmatmul.mubr.msk.f32.gmra.mrb[12].mxu1 %vm415_vm0, %v801_v8 }
 0x228   : > { %v802_v11 = vmul.f32 %v799_v3, %v684_v10  ;;  %v1388_v12 = vpop.f32.mrb[5].mxu1  ;;  %1448 = vmatprep.mubr.msk.f32.mxu1 %vm1598_vm2, %v1599_v59 }
 0x22b   : > { %v689_v13 = vpop.f32.mrb[6].mxu1  ;;  %1449 = vmatmul.mubr.msk.f32.gmra.mrb[14].mxu1 %vm415_vm0, %v802_v11 }
 0x22c   : > { %v803_v16 = vmul.f32 %v799_v3, %v689_v13  ;;  %v1391_v17 = vpop.f32.mrb[7].mxu1  ;;  %1451 = vmatprep.mubr.msk.f32.mxu1 %vm1598_vm2, %v1599_v59 }
 0x22e   : > { %v1884_v18 = vpop.f32.mrb[2].mxu0 }
 0x22f   : > { %v694_v19 = vpop.f32.mrb[8].mxu1  ;;  %v1413_v20 = vpop.f32.mrb[3].mxu0  ;;  %1452 = vmatmul.mubr.msk.f32.gmra.mrb[16].mxu1 %vm415_vm0, %v803_v16 }
 0x230   : > { %v804_v21 = vmul.f32 %v799_v3, %v694_v19  ;;  %v1394_v24 = vpop.f32.mrb[9].mxu1  ;;  %1454 = vmatprep.mubr.msk.f32.mxu1 %vm1598_vm2, %v1599_v59 }
 0x232   : > { %v1889_v14 = vpop.f32.mrb[4].mxu0 }
 0x233   : > { %v1416_v25 = vpop.f32.mrb[5].mxu0  ;;  %1455 = vmatmul.mubr.msk.f32.gmra.mrb[18].mxu1 %vm415_vm0, %v804_v21 }
 0x234   : > { %1490 = vmatprep.mubr.msk.f32.mxu1 %vm1598_vm2, %v1599_v59 }
 0x236   : > { %v1894_v26 = vpop.f32.mrb[6].mxu0 }
 0x237   : > { %v1419_v27 = vpop.f32.mrb[7].mxu0 }
 0x23a   : > { %v1896_v28 = vpop.f32.mrb[8].mxu0 }
 0x23b   : > { %v1422_v29 = vpop.f32.mrb[9].mxu0 }
 0x23e   : > { %v1898_v31 = vpop.f32.mrb[10].mxu0 }
 0x23f   : > { %v1425_v32 = vpop.f32.mrb[11].mxu0 }
 0x2f6   : > { %v894_v34 = vpop.f32.mrb[10].mxu1 }
 0x2f7   : > { %v1444_v35 = vpop.f32.mrb[11].mxu1  ;;  %v918_v43 = vmul.f32 0.35355338, %v894_v34 }
 0x2f9   : > { %v924_v50 = vsel %vm923_vm3, %v918_v43, -inf }
 0x2fa   : > { %v899_v36 = vpop.f32.mrb[12].mxu1 }
 0x2fb   : > { %v1447_v22 = vpop.f32.mrb[13].mxu1  ;;  %v919_v48 = vmul.f32 0.35355338, %v899_v36 }
 0x2fd   : > { %v925_v53 = vsel %vm923_vm3, %v919_v48, -inf }
 0x2fe   : > { %v904_v37 = vpop.f32.mrb[14].mxu1 }
 0x2ff   : > { %v1450_v15 = vpop.f32.mrb[15].mxu1  ;;  %v920_v38 = vmul.f32 0.35355338, %v904_v37 }
 0x301   : > { %v926_v44 = vsel %vm923_vm3, %v920_v38, -inf }
 0x302   : > { %v909_v39 = vpop.f32.mrb[16].mxu1 }
 0x303   : > { %v921_v41 = vmul.f32 0.35355338, %v909_v39  ;;  %v1453_v42 = vpop.f32.mrb[17].mxu1 }
 0x305   : > { %v927_v45 = vsel %vm923_vm3, %v921_v41, -inf }
 0x306   : > { %v932_v46 = vmax.f32 %v926_v44, %v927_v45  ;;  %v914_v47 = vpop.f32.mrb[18].mxu1  ;;  %v1103_v44 = vld [vmem:[%s1990_s6 + $0x8] sm:$0xff] }
 0x307   : > { %v922_v23 = vmul.f32 0.35355338, %v914_v47  ;;  %v1456_v49 = vpop.f32.mrb[19].mxu1 }
 0x309   : > { %v929_v51 = vsel %vm928_vm4, %v922_v23, -inf }
 0x30a   : > { %v930_v52 = vmax.f32 %v924_v50, %v929_v51  ;;  %v1108_v50 = vld [vmem:[%s1990_s6 + $0x30] sm:$0xff]  ;;  %v1109_v51 = vld [vmem:[%s1990_s6 + $0x38] sm:$0xff] }
 0x30c   : > { %v931_v54 = vmax.f32 %v930_v52, %v925_v53  ;;  %v1551_v52 = vpack.c.bf16 %v1109_v51, %v1108_v50 }
 0x30e   : > { %v933_v55 = vmax.f32 %v931_v54, %v932_v46  ;;  %v1104_v46 = vld [vmem:[%s1990_s6 + $0x10] sm:$0xff] }
 0x310   : > { %v934_v56 = vrot.slane %v933_v55, 4 }
 0x312   : > { %v935_v30 = vmax.f32 %v933_v55, %v934_v56 }
 0x314   : > { %v936_v57 = vrot.slane %v935_v30, 2 }
 0x316   : > { %v937_v58 = vmax.f32 %v935_v30, %v936_v57 }
 0x318   : > { %v938_v60 = vrot.slane %v937_v58, 1 }
 0x31a   : > { %v939_v61 = vmax.f32 %v937_v58, %v938_v60 }
 0x31c   : > { %v940_v62 = vsub.f32 %v918_v43, %v939_v61  ;;  %v941_v63 = vsub.f32 %v919_v48, %v939_v61  ;;  %v942_v1 = vsub.f32 %v920_v38, %v939_v61  ;;  %v943_v2 = vsub.f32 %v921_v41, %v939_v61  ;;  %v1102_v43 = vld [vmem:[%s1990_s6] sm:$0xff] }
 0x31d   : > { %v944_v3 = vsub.f32 %v922_v23, %v939_v61  ;;  %v1542_v45 = vpack.c.bf16 %v1103_v44, %v1102_v43  ;;  %v1106_v48 = vld [vmem:[%s1990_s6 + $0x20] sm:$0xff]  ;;  %v1107_v23 = vld [vmem:[%s1990_s6 + $0x28] sm:$0xff] }
 0x31e   : > { %v945_v4 = vmul.f32 1.442695, %v940_v62  ;;  %v947_v5 = vmul.f32 1.442695, %v941_v63  ;;  %v949_v6 = vmul.f32 1.442695, %v942_v1  ;;  %v1548_v49 = vpack.c.bf16 %v1107_v23, %v1106_v48 }
 0x31f   : > { %v951_v7 = vmul.f32 1.442695, %v943_v2  ;;  %v953_v8 = vmul.f32 1.442695, %v944_v3  ;;  %1543 = vmatpush3.bf16.msra.mxu1 %v1542_v45 }
 0x320   : > { %1575 = vpow2.f32 %v945_v4  ;;  %1544 = vmatprep.subr.bf16.mxu1 %v1597_v40 }
 0x321   : > { %1577 = vpow2.f32 %v947_v5 }
 0x322   : > { %1579 = vpow2.f32 %v949_v6 }
 0x323   : > { %1581 = vpow2.f32 %v951_v7 }
 0x324   : > { %1583 = vpow2.f32 %v953_v8 }
 0x32a   : > { %v1576_v9 = vpop.eup %1575 }
 0x32b   : > { %v1578_v10 = vpop.eup %1577  ;;  %v955_v11 = vsel %vm923_vm3, %v1576_v9, 0.0 }
 0x32c   : > { %v1580_v12 = vpop.eup %1579  ;;  %v956_v13 = vsel %vm923_vm3, %v1578_v10, 0.0 }
 0x32d   : > { %v1582_v16 = vpop.eup %1581  ;;  %v957_v17 = vadd.f32 %v956_v13, %v955_v11  ;;  %v958_v19 = vsel %vm923_vm3, %v1580_v12, 0.0 }
 0x32e   : > { %v1584_v20 = vpop.eup %1583  ;;  %v960_v24 = vsel %vm923_vm3, %v1582_v16, 0.0 }
 0x32f   : > { %v959_v21 = vadd.f32 %v958_v19, %v957_v17  ;;  %v962_v27 = vsel %vm928_vm4, %v1584_v20, 0.0 }
 0x331   : > { %v961_v25 = vadd.f32 %v960_v24, %v959_v21 }
 0x333   : > { %v963_v29 = vadd.f32 %v962_v27, %v961_v25 }
 0x335   : > { %v964_v32 = vrot.slane %v963_v29, 4 }
 0x337   : > { %v965_v33 = vadd.f32 %v964_v32, %v963_v29 }
 0x339   : > { %v966_v34 = vrot.slane %v965_v33, 2 }
 0x33b   : > { %v967_v35 = vadd.f32 %v966_v34, %v965_v33 }
 0x33d   : > { %v968_v36 = vrot.slane %v967_v35, 1 }
 0x33f   : > { %v969_v22 = vadd.f32 %v968_v36, %v967_v35 }
 0x341   : > { %1585 = vrcp.f32 %v969_v22 }
 0x34b   : > { %v1586_v37 = vpop.eup %1585 }
 0x34c   : > { %v971_v15 = vmul.f32 %v1586_v37, %v1576_v9  ;;  %v972_v38 = vmul.f32 %v1586_v37, %v1578_v10  ;;  %v973_v39 = vmul.f32 %v1586_v37, %v1580_v12  ;;  %v974_v41 = vmul.f32 %v1586_v37, %v1582_v16 }
 0x34d   : > { %v975_v42 = vmul.f32 %v1586_v37, %v1584_v20 }
 0x34e   : > { %1460 = vmatmul.mubr.msk.f32.vlgmr.msra.gmra.mrb[12].mxu0 %vm923_vm3, %v971_v15  ;;  %v1200_v15 = vld [vmem:[%s1993_s9] sm:$0x1] }
 0x34f   : > { %1462 = vmatprep.mubr.msk.f32.mxu0 %vm1598_vm2, %v1599_v59 }
 0x352   : > { %1463 = vmatmul.mubr.msk.f32.gmra.mrb[14].mxu0 %vm923_vm3, %v972_v38 }
 0x353   : > { %1465 = vmatprep.mubr.msk.f32.mxu0 %vm1598_vm2, %v1599_v59 }
 0x356   : > { %1466 = vmatmul.mubr.msk.f32.gmra.mrb[16].mxu0 %vm923_vm3, %v973_v39 }
 0x357   : > { %1468 = vmatprep.mubr.msk.f32.mxu0 %vm1598_vm2, %v1599_v59 }
 0x35a   : > { %1469 = vmatmul.mubr.msk.f32.gmra.mrb[18].mxu0 %vm923_vm3, %v974_v41 }
 0x35b   : > { %1471 = vmatprep.mubr.msk.f32.mxu0 %vm1598_vm2, %v1599_v59  ;;  %v1105_v59 = vld [vmem:[%s1990_s6 + $0x18] sm:$0xff] }
 0x35c   : > { %v1545_v47 = vpack.c.bf16 %v1105_v59, %v1104_v46 }
 0x35e   : > { %1472 = vmatmul.mubr.msk.f32.gmra.mrb[20].mxu0 %vm923_vm3, %v975_v42  ;;  %1546 = vmatpush3.bf16.msra.mxu1 %v1545_v47 }
 0x35f   : > { %1547 = vmatprep.subr.bf16.mxu1 %v1597_v40 }
 0x362   : > { %1549 = vmatpush3.bf16.msra.mxu1 %v1548_v49 }
 0x363   : > { %1550 = vmatprep.subr.bf16.mxu1 %v1597_v40 }
 0x366   : > { %1552 = vmatpush3.bf16.msra.mxu1 %v1551_v52 }
 0x421   : > { %v1058_v53 = vpop.f32.mrb[12].mxu0 }
 0x422   : > { %v1082_v54 = vmul.f32 %v1058_v53, %v1884_v18  ;;  %v1461_v55 = vpop.f32.mrb[13].mxu0 }
 0x424   : > { %v1087_v40 = vsel %vm415_vm0, %v1082_v54, 0.0 }
 0x425   : > { %v1063_v56 = vpop.f32.mrb[14].mxu0 }
 0x426   : > { %v1083_v30 = vmul.f32 %v1063_v56, %v1889_v14  ;;  %v1464_v57 = vpop.f32.mrb[15].mxu0 }
 0x428   : > { %v1088_v58 = vsel %vm415_vm0, %v1083_v30, 0.0 }
 0x429   : > { %v1089_v60 = vadd.f32 %v1088_v58, %v1087_v40  ;;  %v1068_v61 = vpop.f32.mrb[16].mxu0 }
 0x42a   : > { %v1084_v62 = vmul.f32 %v1068_v61, %v1894_v26  ;;  %v1467_v63 = vpop.f32.mrb[17].mxu0 }
 0x42c   : > { %v1090_v1 = vsel %vm415_vm0, %v1084_v62, 0.0 }
 0x42d   : > { %v1091_v2 = vadd.f32 %v1090_v1, %v1089_v60  ;;  %v1073_v3 = vpop.f32.mrb[18].mxu0 }
 0x42e   : > { %v1085_v18 = vmul.f32 %v1073_v3, %v1896_v28  ;;  %v1470_v4 = vpop.f32.mrb[19].mxu0  ;;  %v1110_v28 = vld [vmem:[%s1991_s7] sm:$0x1] }
 0x430   : > { %v1092_v5 = vsel %vm415_vm0, %v1085_v18, 0.0 }
 0x431   : > { %v1093_v14 = vadd.f32 %v1092_v5, %v1091_v2  ;;  %v1078_v6 = vpop.f32.mrb[20].mxu0 }
 0x432   : > { %v1086_v7 = vmul.f32 %v1078_v6, %v1898_v31  ;;  %v1473_v8 = vpop.f32.mrb[21].mxu0 }
 0x434   : > { %v1094_v9 = vsel %vm428_vm1, %v1086_v7, 0.0 }
 0x435   : > { %v1095_v10 = vadd.f32 %v1094_v9, %v1093_v14 }
 0x437   : > { %v1096_v11 = vrot.slane %v1095_v10, 4 }
 0x439   : > { %v1097_v26 = vadd.f32 %v1096_v11, %v1095_v10 }
 0x43b   : > { %v1098_v12 = vrot.slane %v1097_v26, 2 }
 0x43d   : > { %v1099_v13 = vadd.f32 %v1098_v12, %v1097_v26 }
 0x43f   : > { %v1100_v16 = vrot.slane %v1099_v13, 1 }
 0x441   : > { %v1101_v17 = vadd.f32 %v1100_v16, %v1099_v13 }
 0x443   : > { %1491 = vmatmul.mubr.msk.f32.vlgmr.msra.gmra.mrb[20].mxu1 %vm415_vm0, %v1101_v17 }
 0x516   : > { %v1180_v19 = vpop.f32.mrb[20].mxu1 }
 0x517   : > { %v1181_v20 = vadd.f32 %v1180_v19, %v1110_v28  ;;  %v1492_v21 = vpop.f32.mrb[21].mxu1 }
 0x519   : > { %v1184_v31 = vadd.f32 %v1181_v20, %v1679_v0  ;;  %v1198_v0 = vld [vmem:[%s1992_s8] sm:$0x1] }
 0x51b   : > { %v1185_v24 = vsel %vm428_vm1, %v1184_v31, 0.0 }
 0x51c   : > { %1186 = vadd.xlane.f32.xlu0 %v1185_v24 }
 0x5a9   : > { %v1187_v25 = vpop.xlane.xlu0 %1186 }
 0x5aa   : > { %v1188_v27 = vmul.f32 0.015625, %v1187_v25 }
 0x5ac   : > { %v1189_v29 = vsub.f32 %v1184_v31, %v1188_v27 }
 0x5ae   : > { %v1190_v32 = vmul.f32 %v1189_v29, %v1189_v29 }
 0x5b0   : > { %v1191_v33 = vsel %vm428_vm1, %v1190_v32, 0.0 }
 0x5b1   : > { %1192 = vadd.xlane.f32.xlu1 %v1191_v33 }
 0x63e   : > { %v1193_v34 = vpop.xlane.xlu1 %1192 }
 0x63f   : > { %v1194_v35 = vmul.f32 0.015625, %v1193_v34 }
 0x641   : > { %v1195_v36 = vadd.f32 1e-06, %v1194_v35 }
 0x643   : > { %1587 = vrsqrt.f32 %v1195_v36 }
 0x64d   : > { %v1588_v22 = vpop.eup %1587 }
 0x64e   : > { %v1197_v37 = vmul.f32 %v1588_v22, %v1189_v29 }
 0x650   : > { %v1199_v38 = vmul.f32 %v1198_v0, %v1197_v37 }
 0x652   : > { %v1201_v39 = vadd.f32 %v1200_v15, %v1199_v38 }
 0x654   : > { %1202 = vst.msk [vmem:[%s409_s25] sm:$0x1] %vm428_vm1, %v1201_v39 }
 0x655 PF: > { %s22_s21 = sadd.s32 1, %s1595_s21  }
 0x656   : > { %p19_p4 = scmp.ge.s32.totalorder %s22_s21, 4  }
 0x658   :  { %21 = sbr.rel (!%p19_p4) target bundleno = 1 (0x1), region = 98 }

// kernel: block_forward.2
= control target key start
LH: loop header
LB: loop body
LE: loop exit
PB: predicated region body
PF: predicated region fallthrough
CT: control target
= control target key end

     0   :  { %s2546_s27 = smov 0   ;;  %s3234_s0 = inlined_call_operand.vmem [shape: f32[32,128], index: 0, kind: input, shape index: {}]   ;;  %s3235_s1 = inlined_call_operand.vmem [shape: s8[9,128,128], index: 1, kind: input, shape index: {}]   ;;  %s3236_s2 = inlined_call_operand.vmem [shape: f32[2,9,16,32], index: 2, kind: input, shape index: {}]   ;;  %s3237_s3 = inlined_call_operand.vmem [shape: f32[2,9,16,32], index: 3, kind: input, shape index: {}]   ;;  %s3238_s4 = inlined_call_operand.vmem [shape: f32[16,32], index: 4, kind: input, shape index: {}]   ;;  %s3239_s5 = inlined_call_operand.vmem [shape: f32[16,1], index: 5, kind: input, shape index: {}]   ;;  %s3240_s6 = inlined_call_operand.vmem [shape: f32[9,16,32], index: 6, kind: input, shape index: {}]   ;;  %s3241_s7 = inlined_call_operand.vmem [shape: f32[16,1], index: 7, kind: input, shape index: {}]   ;;  %s3242_s8 = inlined_call_operand.vmem [shape: f32[2,16,128], index: 8, kind: output, shape index: {}]  }
   0x1 LB: > { %s2552_s28 = sadd.s32 4294967295, %s2431_s27   ;;  %p1930_p0 = scmp.ge.s32.totalorder %s2431_s27, 1  ;;  %s2431_s27 = sphi %s2546_s27, %s18_s27  }
   0x2   : > { %p272_p1 = scmp.lt.s32.totalorder %s2431_s27, 3 }
   0x4   : > { %p273_p2 = pnand %p1930_p0, %p272_p1 }
   0x6   : > { %276 = sbr.rel (%p273_p2) target bundleno = 1310 (0x51e), region = 52 }
   0xd   : > { %p311_p3 = scmp.lt.s32.totalorder %s2552_s28, 1  ;;  %v2560_v0 = vld [vmem:[%s3234_s0] sm:$0xff]  ;;  %v2565_v1 = vld [vmem:[%s3234_s0 + $0x8] sm:$0xff]  ;;  %v2570_v2 = vld [vmem:[%s3234_s0 + $0x10] sm:$0xff]  ;;  %v2593_v4 = vmov -inf   ;;  %v2595_v5 = vmov -inf  }
   0xe   : > { %3271 = vst [vmem:[#allocation2_spill] sm:$0xff] %v2560_v0  ;;  %3272 = vst [vmem:[#allocation3_spill] sm:$0xff] %v2565_v1  ;;  %v2575_v3 = vld [vmem:[%s3234_s0 + $0x18] sm:$0xff]  ;;  %v2597_v6 = vmov inf   ;;  %v2599_v7 = vmov inf   ;;  %s2601_s29 = smov 0  }
   0xf   : > { %3273 = vst [vmem:[#allocation4_spill] sm:$0xff] %v2570_v2  ;;  %3274 = vst [vmem:[#allocation5_spill] sm:$0xff] %v2575_v3  ;;  %s312_s15 = scalar_select %p311_p3, %s2552_s28, 1 }
  0x11   : > { %s2198_s16 = smul.u32 144, %s312_s15  ;;  %s1949_s17 = sshll.u32 %s312_s15, 4 }
  0x12   : > { %s2581_s20 = scalar_lea.vmem %s3242_s8, %s1949_s17 }
  0x13   : > { %s2586_s23 = scalar_lea.vmem %s3236_s2, %s2198_s16  ;;  %s2591_s26 = scalar_lea.vmem %s3237_s3, %s2198_s16 }
  0x14 LB: >> { %v2465_v8 = vmov 0   ;;  %s1937_s30 = sshll.u32 %s2451_s29, 4  ;;  %s1950_s9 = sshll.u32 %s2451_s29, 5  ;;  %v2466_v18 = vmov 1   ;;  %v2467_v23 = vmov 2   ;;  %v2468_v26 = vmov 3   ;;  %s2451_s29 = sphi %s2601_s29, %s335_s29   ;;  %v2447_v7 = vphi %v2599_v7, %v3343_v7   ;;  %v2443_v6 = vphi %v2597_v6, %v3342_v6   ;;  %v2439_v5 = vphi %v2595_v5, %v3341_v5   ;;  %v2435_v4 = vphi %v2593_v4, %v3340_v4  }
  0x15   : >> { %v3275_v0 = vld [vmem:[#allocation2_spill] sm:$0xff]  ;;  %2308 = vset.pattern.permute.xlu1 %v2465_v8  ;;  %2307 = vset.pattern.permute.xlu0 %v2465_v8  ;;  %s2623_s10 = scalar_lea.vmem %s2591_s26, %s1937_s30  ;;  %s2628_s13 = scalar_lea.vmem %s3235_s1, %s1950_s9  ;;  %v2469_v28 = vmov 4   ;;  %v3278_v1 = vld [vmem:[#allocation3_spill] sm:$0xff]  ;;  %v2470_v29 = vmov 5   ;;  %v2471_v30 = vmov 6   ;;  %v2472_v31 = vmov 7  }
  0x16   : >> { %2036 = vmatprep.mubr.f32.mxu0 %v3275_v0  ;;  %v3276_v2 = vld [vmem:[#allocation4_spill] sm:$0xff]  ;;  %v2631_v9 = vld [vmem:[%s2623_s10] sm:$0xff]  ;;  %s2635_s14 = scalar_lea.vmem %s2586_s23, %s1937_s30  ;;  %v2642_v14 = vld [vmem:[%s2623_s10 + $0x8] sm:$0xff]  ;;  %v2473_v32 = vmov 8   ;;  %v2474_v33 = vmov 9   ;;  %v2475_v34 = vmov 10  }
  0x17   : >> { %2039 = vmatprep.mubr.f32.mxu1 %v3276_v2  ;;  %v343_v10 = vld [vmem:[%s2628_s13] sm:$0xff]  ;;  %491 = vperm.xlu1 %2308, %v2631_v9   ;;  %3277 = vst [vmem:[#allocation6_spill] sm:$0xff] %v2642_v14  ;;  %v344_v15 = vld [vmem:[%s2628_s13 + $0x8] sm:$0xff]  ;;  %v345_v20 = vld [vmem:[%s2628_s13 + $0x10] sm:$0xff]  ;;  %v2476_v35 = vmov 11   ;;  %v2477_v36 = vmov 12  }
  0x18   : >> { %v2102_v11 = vunpack.c.l.s8.bf16 %v343_v10  ;;  %v2106_v12 = vunpack.c.h.s8.bf16 %v343_v10  ;;  %v2639_v13 = vld [vmem:[%s2635_s14] sm:$0xff]  ;;  %v2648_v16 = vld [vmem:[%s2635_s14 + $0x8] sm:$0xff]  ;;  %v2110_v17 = vunpack.c.l.s8.bf16 %v344_v15  ;;  %v2114_v19 = vunpack.c.h.s8.bf16 %v344_v15  ;;  %v346_v24 = vld [vmem:[%s2628_s13 + $0x18] sm:$0xff]  ;;  %s335_s29 = sadd.s32 1, %s2451_s29  }
  0x19   : >> { %477 = vperm.xlu0 %2307, %v2639_v13   ;;  %v2118_v21 = vunpack.c.l.s8.bf16 %v345_v20  ;;  %v2122_v22 = vunpack.c.h.s8.bf16 %v345_v20  ;;  %v2126_v25 = vunpack.c.l.s8.bf16 %v346_v24  ;;  %v2130_v27 = vunpack.c.h.s8.bf16 %v346_v24  ;;  %v3279_v3 = vld [vmem:[#allocation5_spill] sm:$0xff]  ;;  %p332_p4 = scmp.ge.s32.totalorder %s335_s29, 9  }
  0x1a   : >> { %2103 = vmatprep.subr.bf16.mxu0 %v2102_v11  ;;  %2182 = vmatprep.subr.bf16.mxu1 %v2102_v11  ;;  %v2478_v37 = vmov 13   ;;  %v2479_v38 = vmov 14   ;;  %v2480_v39 = vmov 15   ;;  %v2481_v40 = vmov 16   ;;  %p1938_p5 = scmp.ne.s32.totalorder (%p332_p4), %s2552_s28, 0 }
  0x1b   : >> { %2105 = vmatpush3.bf16.msra.mxu0 %v2102_v11  ;;  %2190 = vmatpush3.bf16.msra.mxu1 %v2102_v11  ;;  %v2482_v41 = vmov 17   ;;  %v2483_v45 = vmov 18   ;;  %v2484_v48 = vmov 19   ;;  %v2485_v52 = vmov 20  }
  0x1c   : >> { %496 = vperm.xlu1 %2308, %v2642_v14   ;;  %2107 = vmatprep.subr.bf16.mxu0 %v2106_v12  ;;  %v2486_v55 = vmov 21   ;;  %v2487_v60 = vmov 22   ;;  %v3251_v62 = vmov 23  }
  0x1d   : >> { %482 = vperm.xlu0 %2307, %v2648_v16   ;;  %2183 = vmatprep.subr.bf16.mxu1 %v2106_v12 }
  0x1f   : >> { %2109 = vmatpush3.bf16.msra.mxu0 %v2106_v12  ;;  %2191 = vmatpush3.bf16.msra.mxu1 %v2106_v12  ;;  %v3250_v12 = vmov 24  }
  0x20   : >> { %2310 = vset.pattern.permute.xlu1 %v2466_v18  ;;  %2111 = vmatprep.subr.bf16.mxu0 %v2110_v17 }
  0x21   : >> { %512 = vperm.xlu1 %2310, %v2648_v16   ;;  %2309 = vset.pattern.permute.xlu0 %v2466_v18  ;;  %v3249_v18 = vmov 25  }
  0x22   : >> { %508 = vperm.xlu0 %2309, %v2639_v13   ;;  %2184 = vmatprep.subr.bf16.mxu1 %v2110_v17 }
  0x23   : >> { %2113 = vmatpush3.bf16.msra.mxu0 %v2110_v17  ;;  %2192 = vmatpush3.bf16.msra.mxu1 %v2110_v17 }
  0x24   : >> { %2115 = vmatprep.subr.bf16.mxu0 %v2114_v19  ;;  %2185 = vmatprep.subr.bf16.mxu1 %v2114_v19 }
  0x25   : >> { %520 = vperm.xlu1 %2310, %v2631_v9  }
  0x26   : >> { %524 = vperm.xlu0 %2309, %v2642_v14  }
  0x27   : >> { %2117 = vmatpush3.bf16.msra.mxu0 %v2114_v19  ;;  %2193 = vmatpush3.bf16.msra.mxu1 %v2114_v19 }
  0x28   : >> { %2119 = vmatprep.subr.bf16.mxu0 %v2118_v21  ;;  %2186 = vmatprep.subr.bf16.mxu1 %v2118_v21 }
  0x29   : >> { %2311 = vset.pattern.permute.xlu1 %v2467_v23 }
  0x2a   : >> { %536 = vperm.xlu1 %2311, %v2639_v13   ;;  %2312 = vset.pattern.permute.xlu0 %v2467_v23 }
  0x2b   : >> { %2121 = vmatpush3.bf16.msra.mxu0 %v2118_v21  ;;  %540 = vperm.xlu0 %2312, %v2648_v16  }
  0x2c   : >> { %2123 = vmatprep.subr.bf16.mxu0 %v2122_v22  ;;  %2194 = vmatpush3.bf16.msra.mxu1 %v2118_v21 }
  0x2d   : >> { %2187 = vmatprep.subr.bf16.mxu1 %v2122_v22 }
  0x2e   : >> { %548 = vperm.xlu1 %2311, %v2631_v9  }
  0x2f   : >> { %2125 = vmatpush3.bf16.msra.mxu0 %v2122_v22  ;;  %2313 = vset.pattern.permute.xlu0 %v2468_v26 }
  0x30   : >> { %2127 = vmatprep.subr.bf16.mxu0 %v2126_v25  ;;  %2195 = vmatpush3.bf16.msra.mxu1 %v2122_v22  ;;  %v3248_v22 = vmov 26  }
  0x31   : >> { %564 = vperm.xlu0 %2313, %v2639_v13   ;;  %2188 = vmatprep.subr.bf16.mxu1 %v2126_v25 }
  0x32   : >> { %552 = vperm.xlu1 %2311, %v2642_v14  }
  0x33   : >> { %2129 = vmatpush3.bf16.msra.mxu0 %v2126_v25 }
  0x34   : >> { %2131 = vmatprep.subr.bf16.mxu0 %v2130_v27  ;;  %2196 = vmatpush3.bf16.msra.mxu1 %v2126_v25  ;;  %v3247_v25 = vmov 27  }
  0x35   : >> { %580 = vperm.xlu0 %2313, %v2642_v14   ;;  %2189 = vmatprep.subr.bf16.mxu1 %v2130_v27 }
  0x36   : >> { %2314 = vset.pattern.permute.xlu1 %v2468_v26 }
  0x37   : >> { %568 = vperm.xlu1 %2314, %v2648_v16   ;;  %2133 = vmatpush3.bf16.msra.mxu0 %v2130_v27 }
  0x38   : >> { %2197 = vmatpush3.bf16.msra.mxu1 %v2130_v27 }
  0x39   : >> { %2316 = vset.pattern.permute.xlu0 %v2469_v28 }
  0x3a   : >> { %2037 = vmatmul.mubr.f32.vlgmr.msra.gmra.mrb[0].mxu0 %v3278_v1  ;;  %596 = vperm.xlu0 %2316, %v2648_v16  }
  0x3b   : >> { %576 = vperm.xlu1 %2314, %v2631_v9   ;;  %2040 = vmatmul.mubr.f32.vlgmr.msra.gmra.mrb[0].mxu1 %v3279_v3 }
  0x3e   : >> { %2317 = vset.pattern.permute.xlu0 %v2470_v29 }
  0x3f   : >> { %2315 = vset.pattern.permute.xlu1 %v2469_v28  ;;  %620 = vperm.xlu0 %2317, %v2639_v13  }
  0x40   : >> { %592 = vperm.xlu1 %2315, %v2639_v13  }
  0x43   : >> { %636 = vperm.xlu0 %2317, %v2642_v14  }
  0x44   : >> { %604 = vperm.xlu1 %2315, %v2631_v9  }
  0x47   : >> { %2320 = vset.pattern.permute.xlu0 %v2471_v30 }
  0x48   : >> { %608 = vperm.xlu1 %2315, %v2642_v14   ;;  %652 = vperm.xlu0 %2320, %v2648_v16  }
  0x4c   : >> { %2318 = vset.pattern.permute.xlu1 %v2470_v29  ;;  %2321 = vset.pattern.permute.xlu0 %v2472_v31 }
  0x4d   : >> { %624 = vperm.xlu1 %2318, %v2648_v16   ;;  %676 = vperm.xlu0 %2321, %v2639_v13  }
  0x51   : >> { %632 = vperm.xlu1 %2318, %v2631_v9   ;;  %692 = vperm.xlu0 %2321, %v2642_v14  }
  0x55   : >> { %2319 = vset.pattern.permute.xlu1 %v2471_v30  ;;  %2324 = vset.pattern.permute.xlu0 %v2473_v32  ;;  %v3246_v30 = vmov 28  }
  0x56   : >> { %648 = vperm.xlu1 %2319, %v2639_v13   ;;  %708 = vperm.xlu0 %2324, %v2648_v16  }
  0x5a   : >> { %660 = vperm.xlu1 %2319, %v2631_v9   ;;  %2325 = vset.pattern.permute.xlu0 %v2474_v33 }
  0x5b   : >> { %732 = vperm.xlu0 %2325, %v2639_v13  }
  0x5e   : >> { %664 = vperm.xlu1 %2319, %v2642_v14  }
  0x5f   : >> { %748 = vperm.xlu0 %2325, %v2642_v14  }
  0x62   : >> { %2322 = vset.pattern.permute.xlu1 %v2472_v31 }
  0x63   : >> { %680 = vperm.xlu1 %2322, %v2648_v16   ;;  %2328 = vset.pattern.permute.xlu0 %v2475_v34 }
  0x64   : >> { %764 = vperm.xlu0 %2328, %v2648_v16  }
  0x67   : >> { %688 = vperm.xlu1 %2322, %v2631_v9  }
  0x68   : >> { %2329 = vset.pattern.permute.xlu0 %v2476_v35 }
  0x69   : >> { %788 = vperm.xlu0 %2329, %v2639_v13  }
  0x6b   : >> { %2323 = vset.pattern.permute.xlu1 %v2473_v32 }
  0x6c   : >> { %704 = vperm.xlu1 %2323, %v2639_v13  }
  0x6d   : >> { %804 = vperm.xlu0 %2329, %v2642_v14  }
  0x70   : >> { %716 = vperm.xlu1 %2323, %v2631_v9  }
  0x71   : >> { %2332 = vset.pattern.permute.xlu0 %v2477_v36 }
  0x72   : >> { %820 = vperm.xlu0 %2332, %v2648_v16  }
  0x74   : >> { %720 = vperm.xlu1 %2323, %v2642_v14  }
  0x76   : >> { %2333 = vset.pattern.permute.xlu0 %v2478_v37 }
  0x77   : >> { %844 = vperm.xlu0 %2333, %v2639_v13  }
  0x78   : >> { %2326 = vset.pattern.permute.xlu1 %v2474_v33  ;;  %v3245_v33 = vmov 29  }
  0x79   : >> { %736 = vperm.xlu1 %2326, %v2648_v16  }
  0x7b   : >> { %860 = vperm.xlu0 %2333, %v2642_v14  }
  0x7d   : >> { %744 = vperm.xlu1 %2326, %v2631_v9  }
  0x7f   : >> { %2336 = vset.pattern.permute.xlu0 %v2479_v38 }
  0x80   : >> { %876 = vperm.xlu0 %2336, %v2648_v16  }
  0x81   : >> { %2327 = vset.pattern.permute.xlu1 %v2475_v34 }
  0x82   : >> { %760 = vperm.xlu1 %2327, %v2639_v13  }
  0x84   : >> { %2337 = vset.pattern.permute.xlu0 %v2480_v39 }
  0x85   : >> { %900 = vperm.xlu0 %2337, %v2639_v13  }
  0x86   : >> { %772 = vperm.xlu1 %2327, %v2631_v9  }
  0x89   : >> { %916 = vperm.xlu0 %2337, %v2642_v14  }
  0x8a   : >> { %776 = vperm.xlu1 %2327, %v2642_v14  }
  0x8d   : >> { %2340 = vset.pattern.permute.xlu0 %v2481_v40 }
  0x8e   : >> { %2330 = vset.pattern.permute.xlu1 %v2476_v35  ;;  %932 = vperm.xlu0 %2340, %v2648_v16  }
  0x8f   : >> { %792 = vperm.xlu1 %2330, %v2648_v16  }
  0x92   : >> { %2341 = vset.pattern.permute.xlu0 %v2482_v41 }
  0x93   : >> { %800 = vperm.xlu1 %2330, %v2631_v9   ;;  %956 = vperm.xlu0 %2341, %v2639_v13  }
  0x96   : >> { %v2708_v42 = vpop.permute.xlu1 %491 }
  0x97   : >> { %2331 = vset.pattern.permute.xlu1 %v2477_v36  ;;  %972 = vperm.xlu0 %2341, %v2642_v14  }
  0x98   : >> { %816 = vperm.xlu1 %2331, %v2639_v13   ;;  %v2712_v43 = vpop.permute.xlu0 %477 }
  0x9b   : >> { %v2714_v44 = vpop.permute.xlu1 %496  ;;  %2344 = vset.pattern.permute.xlu0 %v2483_v45 }
  0x9c   : >> { %828 = vperm.xlu1 %2331, %v2631_v9   ;;  %988 = vperm.xlu0 %2344, %v2648_v16   ;;  %v2719_v46 = vpop.permute.xlu0 %482 }
  0xa0   : >> { %v2721_v47 = vpop.permute.xlu1 %512  ;;  %832 = vperm.xlu1 %2331, %v2642_v14   ;;  %2345 = vset.pattern.permute.xlu0 %v2484_v48 }
  0xa1   : >> { %1012 = vperm.xlu0 %2345, %v2639_v13   ;;  %v2729_v50 = vpop.permute.xlu0 %508 }
  0xa4   : >> { %v2726_v49 = vpop.permute.xlu1 %520  ;;  %2334 = vset.pattern.permute.xlu1 %v2478_v37 }
  0xa5   : >> { %848 = vperm.xlu1 %2334, %v2648_v16   ;;  %1028 = vperm.xlu0 %2345, %v2642_v14   ;;  %v2737_v53 = vpop.permute.xlu0 %524 }
  0xa9   : >> { %856 = vperm.xlu1 %2334, %v2631_v9   ;;  %v2733_v51 = vpop.permute.xlu1 %536  ;;  %2348 = vset.pattern.permute.xlu0 %v2485_v52 }
  0xaa   : >> { %1044 = vperm.xlu0 %2348, %v2648_v16   ;;  %v2746_v57 = vpop.permute.xlu0 %540 }
  0xad   : >> { %2335 = vset.pattern.permute.xlu1 %v2479_v38  ;;  %v2739_v54 = vpop.permute.xlu1 %548  ;;  %v3243_v38 = vmov 30  }
  0xae   : >> { %872 = vperm.xlu1 %2335, %v2639_v13   ;;  %2349 = vset.pattern.permute.xlu0 %v2486_v55 }
  0xaf   : >> { %1068 = vperm.xlu0 %2349, %v2639_v13  }
  0xb0   : >> { %v2753_v59 = vpop.permute.xlu0 %564 }
  0xb1   : >> { %v2744_v56 = vpop.permute.xlu1 %552 }
  0xb2   : >> { %884 = vperm.xlu1 %2335, %v2631_v9  }
  0xb3   : >> { %1084 = vperm.xlu0 %2349, %v2642_v14  }
  0xb4   : >> { %v2761_v63 = vpop.permute.xlu0 %580 }
  0xb6   : >> { %888 = vperm.xlu1 %2335, %v2642_v14   ;;  %v2751_v58 = vpop.permute.xlu1 %568 }
  0xb7   : >> { %2352 = vset.pattern.permute.xlu0 %v2487_v60 }
  0xb8   : >> { %1100 = vperm.xlu0 %2352, %v2648_v16  }
  0xb9   : >> { %v2770_v11 = vpop.permute.xlu0 %596 }
  0xba   : >> { %2338 = vset.pattern.permute.xlu1 %v2480_v39  ;;  %v2757_v61 = vpop.permute.xlu1 %576 }
  0xbb   : >> { %904 = vperm.xlu1 %2338, %v2648_v16  }
  0xbc   : >> { %2353 = vset.pattern.permute.xlu0 %v3251_v62 }
  0xbd   : >> { %1124 = vperm.xlu0 %2353, %v2639_v13  }
  0xbe   : >> { %v2778_v17 = vpop.permute.xlu0 %620 }
  0xbf   : >> { %912 = vperm.xlu1 %2338, %v2631_v9   ;;  %v2765_v8 = vpop.permute.xlu1 %592  ;;  %3281 = vst [vmem:[#allocation8_spill] sm:$0xff] %v2778_v17 }
  0xc0   : >> { %3280 = vst [vmem:[#allocation7_spill] sm:$0xff] %v2765_v8 }
  0xc1   : >> { %1140 = vperm.xlu0 %2353, %v2642_v14  }
  0xc2   : >> { %v2785_v20 = vpop.permute.xlu0 %636 }
  0xc3   : >> { %2339 = vset.pattern.permute.xlu1 %v2481_v40  ;;  %v2768_v10 = vpop.permute.xlu1 %604 }
  0xc4   : >> { %928 = vperm.xlu1 %2339, %v2639_v13  }
  0xc5   : >> { %2356 = vset.pattern.permute.xlu0 %v3250_v12 }
  0xc6   : >> { %1156 = vperm.xlu0 %2356, %v2648_v16  }
  0xc7   : >> { %v2775_v15 = vpop.permute.xlu1 %608  ;;  %v2797_v24 = vpop.permute.xlu0 %652 }
  0xc8   : >> { %940 = vperm.xlu1 %2339, %v2631_v9  }
  0xca   : >> { %2357 = vset.pattern.permute.xlu0 %v3249_v18 }
  0xcb   : >> { %1180 = vperm.xlu0 %2357, %v2639_v13  }
  0xcc   : >> { %944 = vperm.xlu1 %2339, %v2642_v14   ;;  %v2783_v19 = vpop.permute.xlu1 %624  ;;  %v2805_v27 = vpop.permute.xlu0 %676 }
  0xcd   : >> { %3283 = vst [vmem:[#allocation10_spill] sm:$0xff] %v2805_v27 }
  0xcf   : >> { %1196 = vperm.xlu0 %2357, %v2642_v14  }
  0xd0   : >> { %2342 = vset.pattern.permute.xlu1 %v2482_v41  ;;  %v2789_v21 = vpop.permute.xlu1 %632  ;;  %v2811_v29 = vpop.permute.xlu0 %692  ;;  %v3244_v41 = vmov 31  }
  0xd1   : >> { %960 = vperm.xlu1 %2342, %v2648_v16  }
  0xd3   : >> { %2360 = vset.pattern.permute.xlu0 %v3248_v22 }
  0xd4   : >> { %1212 = vperm.xlu0 %2360, %v2648_v16  }
  0xd5   : >> { %968 = vperm.xlu1 %2342, %v2631_v9   ;;  %v2795_v23 = vpop.permute.xlu1 %648  ;;  %v2823_v34 = vpop.permute.xlu0 %708 }
  0xd6   : >> { %3282 = vst [vmem:[#allocation9_spill] sm:$0xff] %v2795_v23 }
  0xd8   : >> { %2361 = vset.pattern.permute.xlu0 %v3247_v25 }
  0xd9   : >> { %2343 = vset.pattern.permute.xlu1 %v2483_v45  ;;  %v2801_v26 = vpop.permute.xlu1 %660  ;;  %1236 = vperm.xlu0 %2361, %v2639_v13  }
  0xda   : >> { %984 = vperm.xlu1 %2343, %v2639_v13   ;;  %v2830_v36 = vpop.permute.xlu0 %732 }
  0xdb   : >> { %3285 = vst [vmem:[#allocation12_spill] sm:$0xff] %v2830_v36 }
  0xdd   : >> { %v2807_v28 = vpop.permute.xlu1 %664  ;;  %1252 = vperm.xlu0 %2361, %v2642_v14  }
  0xde   : >> { %996 = vperm.xlu1 %2343, %v2631_v9   ;;  %v2840_v40 = vpop.permute.xlu0 %748 }
  0xe1   : >> { %2364 = vset.pattern.permute.xlu0 %v3246_v30 }
  0xe2   : >> { %1000 = vperm.xlu1 %2343, %v2642_v14   ;;  %v2815_v31 = vpop.permute.xlu1 %680  ;;  %1268 = vperm.xlu0 %2364, %v2648_v16  }
  0xe6   : >> { %2346 = vset.pattern.permute.xlu1 %v2484_v48  ;;  %v2819_v32 = vpop.permute.xlu1 %688  ;;  %2365 = vset.pattern.permute.xlu0 %v3245_v33  ;;  %v2848_v48 = vpop.permute.xlu0 %764  ;;  %v471_v33 = vlaneseq }
  0xe7   : >> { %1016 = vperm.xlu1 %2346, %v2648_v16   ;;  %1292 = vperm.xlu0 %2365, %v2639_v13  }
  0xeb   : >> { %1024 = vperm.xlu1 %2346, %v2631_v9   ;;  %v2827_v35 = vpop.permute.xlu1 %704  ;;  %1308 = vperm.xlu0 %2365, %v2642_v14  }
  0xec   : >> { %3284 = vst [vmem:[#allocation11_spill] sm:$0xff] %v2827_v35 }
  0xef   : >> { %2347 = vset.pattern.permute.xlu1 %v2485_v52  ;;  %v2833_v37 = vpop.permute.xlu1 %716  ;;  %2368 = vset.pattern.permute.xlu0 %v3243_v38  ;;  %v2855_v38 = vpop.permute.xlu0 %788 }
  0xf0   : >> { %1040 = vperm.xlu1 %2347, %v2639_v13   ;;  %1324 = vperm.xlu0 %2368, %v2648_v16   ;;  %3287 = vst [vmem:[#allocation14_spill] sm:$0xff] %v2855_v38 }
  0xf3   : >> { %v2838_v39 = vpop.permute.xlu1 %720  ;;  %v2863_v25 = vpop.permute.xlu0 %804 }
  0xf4   : >> { %1052 = vperm.xlu1 %2347, %v2631_v9   ;;  %2369 = vset.pattern.permute.xlu0 %v3244_v41  ;;  %3289 = vst [vmem:[#allocation16_spill] sm:$0xff] %v2863_v25 }
  0xf5   : >> { %1348 = vperm.xlu0 %2369, %v2639_v13  }
  0xf7   : >> { %v2875_v0 = vpop.permute.xlu0 %820 }
  0xf8   : >> { %1056 = vperm.xlu1 %2347, %v2642_v14   ;;  %v2846_v45 = vpop.permute.xlu1 %736  ;;  %3294 = vst [vmem:[#allocation21_spill] sm:$0xff] %v2875_v0 }
  0xf9   : >> { %3286 = vst [vmem:[#allocation13_spill] sm:$0xff] %v2846_v45  ;;  %1364 = vperm.xlu0 %2369, %v2642_v14  }
  0xfc   : >> { %2350 = vset.pattern.permute.xlu1 %v2486_v55  ;;  %v2852_v52 = vpop.permute.xlu1 %744  ;;  %v472_v55 = vshrl.u32 %v471_v33, 7 }
  0xfd   : >> { %1072 = vperm.xlu1 %2350, %v2648_v16  }
  0xfe   : >> { %v2869_v18 = vsub.s32 3, %v472_v55  ;;  %v2871_v12 = vsub.s32 0, %v472_v55  ;;  %v2873_v62 = vsub.s32 1, %v472_v55  ;;  %v2881_v2 = vsub.s32 4, %v472_v55 }
  0xff   : >> { %v2883_v3 = vsub.s32 5, %v472_v55  ;;  %v2885_v33 = vsub.s32 6, %v472_v55  ;;  %v2890_v35 = vsub.s32 7, %v472_v55 }
 0x100   : >> { %3291 = vst [vmem:[#allocation18_spill] sm:$0xff] %v2869_v18  ;;  %3292 = vst [vmem:[#allocation19_spill] sm:$0xff] %v2871_v12 }
 0x101   : >> { %1080 = vperm.xlu1 %2350, %v2631_v9   ;;  %v2858_v41 = vpop.permute.xlu1 %760  ;;  %3293 = vst [vmem:[#allocation20_spill] sm:$0xff] %v2873_v62  ;;  %3297 = vst [vmem:[#allocation24_spill] sm:$0xff] %v2881_v2 }
 0x102   : >> { %3288 = vst [vmem:[#allocation15_spill] sm:$0xff] %v2858_v41  ;;  %3298 = vst [vmem:[#allocation25_spill] sm:$0xff] %v2883_v3 }
 0x105   : >> { %2351 = vset.pattern.permute.xlu1 %v2487_v60  ;;  %v2861_v30 = vpop.permute.xlu1 %772  ;;  %v2877_v60 = vsub.s32 2, %v472_v55 }
 0x106   : >> { %1096 = vperm.xlu1 %2351, %v2639_v13  }
 0x107   : >> { %3295 = vst [vmem:[#allocation22_spill] sm:$0xff] %v2877_v60 }
 0x109   : >> { %v2866_v22 = vpop.permute.xlu1 %776 }
 0x10a   : >> { %3290 = vst [vmem:[#allocation17_spill] sm:$0xff] %v2866_v22  ;;  %1108 = vperm.xlu1 %2351, %v2631_v9  }
 0x10d   : >> { %v2879_v1 = vpop.f32.mrb[0].mxu0 }
 0x10e   : >> { %3296 = vst [vmem:[#allocation23_spill] sm:$0xff] %v2879_v1  ;;  %1112 = vperm.xlu1 %2351, %v2642_v14   ;;  %v2888_v41 = vpop.permute.xlu1 %792  ;;  %v445_v36 = vpop.f32.mrb[1].mxu0  ;;  %v2894_v0 = vrot.slane %v2879_v1, %v2869_v18  ;;  %v2913_v55 = vrot.slane %v2879_v1, %v2873_v62  ;;  %v2917_v14 = vrot.slane %v2879_v1, %v2877_v60 }
 0x10f   : >> { %3299 = vst [vmem:[#allocation26_spill] sm:$0xff] %v2888_v41  ;;  %v2897_v25 = vrot.slane %v445_v36, %v2871_v12  ;;  %v2900_v22 = vrot.slane %v445_v36, %v2873_v62  ;;  %v2902_v38 = vpop.f32.mrb[0].mxu1  ;;  %v2905_v27 = vrot.slane %v445_v36, %v2877_v60  ;;  %v2909_v41 = vrot.slane %v2879_v1, %v2871_v12  ;;  %v2932_v62 = vpop.permute.xlu0 %844 }
 0x110   : >> { %3300 = vst [vmem:[#allocation27_spill] sm:$0xff] %v2902_v38  ;;  %v2919_v23 = vpop.f32.mrb[1].mxu1  ;;  %v2924_v17 = vrot.slane %v445_v36, %v2869_v18  ;;  %v2927_v8 = vrot.slane %v445_v36, %v2881_v2  ;;  %v2930_v12 = vrot.slane %v445_v36, %v2883_v3  ;;  %3302 = vst [vmem:[#allocation29_spill] sm:$0xff] %v2932_v62  ;;  %v3303_v18 = vmov 23  }
 0x111   : >> { %3301 = vst [vmem:[#allocation28_spill] sm:$0xff] %v2919_v23  ;;  %v499_v38 = vadd.f32 %v2708_v42, %v2897_v25  ;;  %v485_v60 = vsub.f32 %v2897_v25, %v2712_v43  ;;  %v486_v23 = vsub.f32 %v2897_v25, %v2719_v46  ;;  %v2939_v1 = vrot.slane %v445_v36, %v2885_v33 }
 0x112   : >> { %v500_v42 = vadd.f32 %v2714_v44, %v2897_v25  ;;  %2354 = vset.pattern.permute.xlu1 %v3303_v18  ;;  %v801_v2 = vpop.permute.xlu1 %800  ;;  %v527_v62 = vadd.f32 %v2726_v49, %v2900_v22  ;;  %v2948_v45 = vrot.slane %v445_v36, %v2890_v35  ;;  %v528_v43 = vadd.f32 %v2737_v53, %v2900_v22 }
 0x113   : >> { %v501_v3 = vmax.f32 %v2439_v5, %v499_v38  ;;  %1128 = vperm.xlu1 %2354, %v2648_v16   ;;  %v515_v46 = vsub.f32 %v2900_v22, %v2729_v50  ;;  %v555_v44 = vadd.f32 %v2739_v54, %v2905_v27  ;;  %v556_v5 = vadd.f32 %v2744_v56, %v2905_v27 }
 0x114   : >> { %v502_v18 = vmax.f32 %v2435_v4, %v500_v42  ;;  %v584_v49 = vadd.f32 %v2761_v63, %v2924_v17  ;;  %v696_v25 = vadd.f32 %v2811_v29, %v2948_v45  ;;  %v2966_v53 = vadd.f32 %v2840_v40, %v2913_v55 }
 0x115   : >> { %v529_v36 = vmax.f32 %v501_v3, %v527_v62  ;;  %v612_v54 = vadd.f32 %v2775_v15, %v2927_v8  ;;  %v640_v4 = vadd.f32 %v2785_v20, %v2930_v12  ;;  %v668_v56 = vadd.f32 %v2807_v28, %v2939_v1  ;;  %v2985_v15 = vpop.permute.xlu0 %860 }
 0x116   : >> { %v530_v50 = vmax.f32 %v502_v18, %v528_v43  ;;  %v2976_v63 = vadd.f32 %v2838_v39, %v2909_v41  ;;  %v583_v38 = vadd.f32 %v2757_v61, %v2924_v17  ;;  %v611_v3 = vadd.f32 %v2768_v10, %v2927_v8 }
 0x117   : >> { %v557_v29 = vmax.f32 %v529_v36, %v555_v44  ;;  %1136 = vperm.xlu1 %2354, %v2631_v9   ;;  %v2983_v62 = vpop.permute.xlu1 %816  ;;  %v639_v28 = vadd.f32 %v2789_v21, %v2930_v12  ;;  %v667_v39 = vadd.f32 %v2801_v26, %v2939_v1  ;;  %v695_v40 = vadd.f32 %v2819_v32, %v2948_v45 }
 0x118   : >> { %v558_v20 = vmax.f32 %v530_v50, %v556_v5  ;;  %v488_v42 = vmin.f32 %v2443_v6, %v486_v23  ;;  %v516_v10 = vsub.f32 %v2900_v22, %v2721_v47  ;;  %v544_v43 = vsub.f32 %v2905_v27, %v2746_v57 }
 0x119   : >> { %v585_v61 = vmax.f32 %v557_v29, %v583_v38  ;;  %v723_v18 = vadd.f32 %v2833_v37, %v2909_v41  ;;  %v751_v21 = vadd.f32 %v2852_v52, %v2913_v55  ;;  %v3004_v26 = vadd.f32 %v2861_v30, %v2917_v14  ;;  %v3022_v50 = vpop.permute.xlu0 %876 }
 0x11a   : >> { %v586_v44 = vmax.f32 %v558_v20, %v584_v49  ;;  %v3007_v6 = vadd.f32 %v801_v2, %v2894_v0  ;;  %v518_v23 = vmin.f32 %v488_v42, %v516_v10  ;;  %v572_v47 = vsub.f32 %v2924_v17, %v2751_v58  ;;  %v3307_v42 = vld [vmem:[#allocation23_spill] sm:$0xff] }
 0x11b   : >> { %v613_v32 = vmax.f32 %v585_v61, %v611_v3  ;;  %v3304_v57 = vmov 24   ;;  %v829_v22 = vpop.permute.xlu1 %828  ;;  %v600_v37 = vsub.f32 %v2927_v8, %v2770_v11  ;;  %v628_v52 = vsub.f32 %v2930_v12, %v2783_v19  ;;  %v3306_v61 = vld [vmem:[#allocation24_spill] sm:$0xff]  ;;  %v3308_v10 = vld [vmem:[#allocation7_spill] sm:$0xff] }
 0x11c   : >> { %2355 = vset.pattern.permute.xlu1 %v3304_v57  ;;  %v614_v5 = vmax.f32 %v586_v44, %v612_v54  ;;  %v768_v30 = vsub.f32 %v2917_v14, %v2848_v48  ;;  %v546_v49 = vmin.f32 %v518_v23, %v544_v43  ;;  %v656_v58 = vsub.f32 %v2939_v1, %v2797_v24  ;;  %v3311_v44 = vld [vmem:[#allocation10_spill] sm:$0xff] }
 0x11d   : >> { %1152 = vperm.xlu1 %2355, %v2639_v13   ;;  %v641_v2 = vmax.f32 %v613_v32, %v639_v28  ;;  %v487_v36 = vmin.f32 %v2447_v7, %v485_v60  ;;  %v684_v11 = vsub.f32 %v2948_v45, %v2815_v31  ;;  %v712_v19 = vsub.f32 %v2909_v41, %v2823_v34  ;;  %v3305_v60 = vld [vmem:[#allocation13_spill] sm:$0xff]  ;;  %v3312_v23 = vld [vmem:[#allocation14_spill] sm:$0xff] }
 0x11e   : >> { %v642_v54 = vmax.f32 %v614_v5, %v640_v4  ;;  %v543_v29 = vsub.f32 %v2905_v27, %v2733_v51  ;;  %v574_v3 = vmin.f32 %v546_v49, %v572_v47  ;;  %v571_v24 = vsub.f32 %v2924_v17, %v2753_v59 }
 0x11f   : >> { %v669_v38 = vmax.f32 %v641_v2, %v667_v39  ;;  %v517_v20 = vmin.f32 %v487_v36, %v515_v46  ;;  %v833_v28 = vpop.permute.xlu1 %832  ;;  %v740_v4 = vsub.f32 %v2913_v55, %v3305_v60  ;;  %v3036_v31 = vrot.slane %v3307_v42, %v3306_v61  ;;  %v3309_v39 = vld [vmem:[#allocation8_spill] sm:$0xff]  ;;  %v3315_v36 = vld [vmem:[#allocation6_spill] sm:$0xff]  ;;  %v3318_v60 = vld [vmem:[#allocation11_spill] sm:$0xff] }
 0x120   : >> { %v670_v7 = vmax.f32 %v642_v54, %v668_v56  ;;  %v599_v34 = vsub.f32 %v2927_v8, %v3308_v10  ;;  %v602_v27 = vmin.f32 %v574_v3, %v600_v37  ;;  %v627_v59 = vsub.f32 %v2930_v12, %v3309_v39  ;;  %v3310_v56 = vld [vmem:[#allocation9_spill] sm:$0xff]  ;;  %v3050_v37 = vpop.permute.xlu0 %900 }
 0x121   : >> { %1164 = vperm.xlu1 %2355, %v2631_v9   ;;  %v697_v51 = vmax.f32 %v669_v38, %v695_v40  ;;  %v545_v46 = vmin.f32 %v517_v20, %v543_v29  ;;  %v655_v43 = vsub.f32 %v2939_v1, %v3310_v56  ;;  %v683_v32 = vsub.f32 %v2948_v45, %v3311_v44  ;;  %v3313_v12 = vld [vmem:[#allocation17_spill] sm:$0xff]  ;;  %v3314_v1 = vld [vmem:[#allocation16_spill] sm:$0xff] }
 0x122   : >> { %v698_v17 = vmax.f32 %v670_v7, %v696_v25  ;;  %v795_v47 = vsub.f32 %v2894_v0, %v3312_v23  ;;  %v630_v8 = vmin.f32 %v602_v27, %v628_v52  ;;  %v835_v40 = vadd.f32 %v829_v22, %v3036_v31  ;;  %v3316_v38 = vld [vmem:[#allocation21_spill] sm:$0xff] }
 0x123   : >> { %v725_v57 = vmax.f32 %v697_v51, %v723_v18  ;;  %v573_v5 = vmin.f32 %v545_v46, %v571_v24  ;;  %v780_v25 = vadd.f32 %v3313_v12, %v2917_v14  ;;  %v808_v49 = vadd.f32 %v3314_v1, %v2894_v0 }
 0x124   : >> { %v726_v2 = vmax.f32 %v698_v17, %v2976_v63  ;;  %v836_v45 = vadd.f32 %v833_v28, %v3036_v31  ;;  %v849_v54 = vpop.permute.xlu1 %848  ;;  %v658_v52 = vmin.f32 %v630_v8, %v656_v58  ;;  %v824_v22 = vsub.f32 %v3036_v31, %v3316_v38  ;;  %v3317_v63 = vld [vmem:[#allocation25_spill] sm:$0xff] }
 0x125   : >> { %1168 = vperm.xlu1 %2355, %v3315_v36   ;;  %v753_v18 = vmax.f32 %v725_v57, %v751_v21  ;;  %v601_v29 = vmin.f32 %v573_v5, %v599_v34  ;;  %v842_v20 = vrot.slane %v3307_v42, %v3317_v63  ;;  %v870_v24 = vrot.slane %v3307_v42, %v2885_v33  ;;  %v917_v34 = vpop.permute.xlu0 %916 }
 0x126   : >> { %v754_v3 = vmax.f32 %v726_v2, %v2966_v53  ;;  %v3068_v28 = vrot.slane %v3307_v42, %v2890_v35  ;;  %v686_v21 = vmin.f32 %v658_v52, %v684_v11  ;;  %v711_v10 = vsub.f32 %v2909_v41, %v3318_v60  ;;  %v3319_v53 = vld [vmem:[#allocation29_spill] sm:$0xff]  ;;  %v3321_v2 = vld [vmem:[#allocation12_spill] sm:$0xff] }
 0x127   : >> { %v781_v7 = vmax.f32 %v753_v18, %v3004_v26  ;;  %v629_v58 = vmin.f32 %v601_v29, %v627_v59  ;;  %v851_v27 = vsub.f32 %v842_v20, %v3319_v53  ;;  %v852_v46 = vsub.f32 %v842_v20, %v849_v54  ;;  %v3323_v18 = vld [vmem:[#allocation15_spill] sm:$0xff] }
 0x128   : >> { %v782_v51 = vmax.f32 %v754_v3, %v780_v25  ;;  %v864_v39 = vadd.f32 %v2985_v15, %v842_v20  ;;  %v3320_v17 = vmov 25   ;;  %v857_v56 = vpop.permute.xlu1 %856  ;;  %v714_v44 = vmin.f32 %v686_v21, %v712_v19  ;;  %v3322_v19 = vld [vmem:[#allocation26_spill] sm:$0xff] }
 0x129   : >> { %2358 = vset.pattern.permute.xlu1 %v3320_v17  ;;  %v809_v42 = vmax.f32 %v781_v7, %v3007_v6  ;;  %v657_v57 = vmin.f32 %v629_v58, %v655_v43  ;;  %v863_v26 = vadd.f32 %v857_v56, %v842_v20  ;;  %v880_v41 = vsub.f32 %v870_v24, %v3022_v50 }
 0x12a   : >> { %1184 = vperm.xlu1 %2358, %v2648_v16   ;;  %v810_v11 = vmax.f32 %v782_v51, %v808_v49  ;;  %v907_v59 = vsub.f32 %v3068_v28, %v3050_v37  ;;  %v920_v8 = vadd.f32 %v917_v34, %v3068_v28  ;;  %v742_v5 = vmin.f32 %v714_v44, %v740_v4  ;;  %v3326_v34 = vld [vmem:[#allocation28_spill] sm:$0xff] }
 0x12b   : >> { %v685_v15 = vmin.f32 %v657_v57, %v683_v32  ;;  %v739_v12 = vsub.f32 %v2913_v55, %v3321_v2  ;;  %v837_v25 = vmax.f32 %v809_v42, %v835_v40  ;;  %v796_v43 = vsub.f32 %v2894_v0, %v3322_v19  ;;  %v3328_v44 = vld [vmem:[#allocation20_spill] sm:$0xff] }
 0x12c   : >> { %v838_v6 = vmax.f32 %v810_v11, %v836_v45  ;;  %v770_v1 = vmin.f32 %v742_v5, %v768_v30  ;;  %v767_v55 = vsub.f32 %v2917_v14, %v3323_v18  ;;  %v3324_v29 = vmov 26  }
 0x12d   : >> { %v713_v50 = vmin.f32 %v685_v15, %v711_v10  ;;  %v865_v49 = vmax.f32 %v837_v25, %v863_v26  ;;  %v873_v37 = vpop.permute.xlu1 %872  ;;  %v823_v48 = vsub.f32 %v3036_v31, %v2983_v62  ;;  %v3325_v10 = vld [vmem:[#allocation19_spill] sm:$0xff]  ;;  %v3327_v56 = vmov 27  }
 0x12e   : >> { %1192 = vperm.xlu1 %2358, %v2631_v9   ;;  %v866_v54 = vmax.f32 %v838_v6, %v864_v39  ;;  %v879_v4 = vsub.f32 %v870_v24, %v873_v37  ;;  %v798_v40 = vmin.f32 %v770_v1, %v796_v43  ;;  %v926_v51 = vrot.slane %v3326_v34, %v3325_v10  ;;  %v933_v39 = vpop.permute.xlu0 %932 }
 0x12f   : >> { %v741_v32 = vmin.f32 %v713_v50, %v739_v12  ;;  %v954_v57 = vrot.slane %v3326_v34, %v3328_v44  ;;  %v3329_v15 = vmov 28   ;;  %v3330_v50 = vld [vmem:[#allocation22_spill] sm:$0xff] }
 0x130   : >> { %v826_v52 = vmin.f32 %v798_v40, %v824_v22  ;;  %v3331_v40 = vmov 29  }
 0x131   : >> { %v769_v45 = vmin.f32 %v741_v32, %v767_v55  ;;  %v885_v38 = vpop.permute.xlu1 %884 }
 0x132   : >> { %2359 = vset.pattern.permute.xlu1 %v3324_v29  ;;  %v891_v3 = vadd.f32 %v885_v38, %v870_v24  ;;  %v854_v20 = vmin.f32 %v826_v52, %v852_v46  ;;  %v957_v11 = vpop.permute.xlu0 %956  ;;  %v3332_v29 = vld [vmem:[#allocation18_spill] sm:$0xff] }
 0x133   : >> { %1208 = vperm.xlu1 %2359, %v2639_v13   ;;  %v797_v30 = vmin.f32 %v769_v45, %v795_v47  ;;  %v936_v47 = vsub.f32 %v926_v51, %v933_v39  ;;  %v1010_v38 = vrot.slane %v3326_v34, %v3332_v29 }
 0x134   : >> { %v893_v7 = vmax.f32 %v865_v49, %v891_v3  ;;  %v882_v14 = vmin.f32 %v854_v20, %v880_v41  ;;  %v982_v49 = vrot.slane %v3326_v34, %v3330_v50 }
 0x135   : >> { %v825_v21 = vmin.f32 %v797_v30, %v823_v48  ;;  %v889_v58 = vpop.permute.xlu1 %888  ;;  %v2371_v30 = vld [vmem:[%s2623_s10] sm:$0xff] }
 0x136   : >> { %v892_v60 = vadd.f32 %v889_v58, %v870_v24 }
 0x137   : >> { %1220 = vperm.xlu1 %2359, %v2631_v9   ;;  %v853_v22 = vmin.f32 %v825_v21, %v851_v27 }
 0x138   : >> { %v894_v53 = vmax.f32 %v866_v54, %v892_v60 }
 0x139   : >> { %v881_v17 = vmin.f32 %v853_v22, %v879_v4 }
 0x13a   : >> { %v922_v62 = vmax.f32 %v894_v53, %v920_v8  ;;  %v905_v0 = vpop.permute.xlu1 %904  ;;  %v963_v8 = vsub.f32 %v954_v57, %v957_v11 }
 0x13b   : >> { %1224 = vperm.xlu1 %2359, %v3315_v36   ;;  %v909_v31 = vmin.f32 %v881_v17, %v907_v59  ;;  %v908_v23 = vsub.f32 %v3068_v28, %v905_v0  ;;  %v1038_v0 = vrot.slane %v3326_v34, %v3306_v61 }
 0x13d   : >> { %v910_v46 = vmin.f32 %v882_v14, %v908_v23  ;;  %v3333_v14 = vmov 30  }
 0x13e   : >> { %v913_v24 = vpop.permute.xlu1 %912 }
 0x13f   : >> { %2362 = vset.pattern.permute.xlu1 %v3327_v56  ;;  %v938_v42 = vmin.f32 %v910_v46, %v936_v47  ;;  %v919_v27 = vadd.f32 %v913_v24, %v3068_v28  ;;  %v973_v28 = vpop.permute.xlu0 %972  ;;  %v2373_v46 = vld [vmem:[%s2623_s10 + $0x8] sm:$0xff] }
 0x140   : >> { %1240 = vperm.xlu1 %2362, %v2648_v16   ;;  %v976_v1 = vadd.f32 %v973_v28, %v954_v57 }
 0x141   : >> { %v921_v26 = vmax.f32 %v893_v7, %v919_v27 }
 0x143   : >> { %v929_v41 = vpop.permute.xlu1 %928  ;;  %v989_v54 = vpop.permute.xlu0 %988 }
 0x144   : >> { %1248 = vperm.xlu1 %2362, %v2631_v9   ;;  %v935_v59 = vsub.f32 %v926_v51, %v929_v41  ;;  %v992_v55 = vsub.f32 %v982_v49, %v989_v54 }
 0x146   : >> { %v937_v5 = vmin.f32 %v909_v31, %v935_v59  ;;  %v2374_v59 = vld [vmem:[%s2635_s14 + $0x8] sm:$0xff] }
 0x147   : >> { %v941_v2 = vpop.permute.xlu1 %940  ;;  %v1013_v48 = vpop.permute.xlu0 %1012 }
 0x148   : >> { %2363 = vset.pattern.permute.xlu1 %v3329_v15  ;;  %v965_v12 = vmin.f32 %v937_v5, %v963_v8  ;;  %v947_v25 = vadd.f32 %v941_v2, %v926_v51  ;;  %v1019_v7 = vsub.f32 %v1010_v38, %v1013_v48  ;;  %v1066_v8 = vrot.slane %v3326_v34, %v3317_v63 }
 0x149   : >> { %1264 = vperm.xlu1 %2363, %v2639_v13  }
 0x14a   : >> { %v949_v6 = vmax.f32 %v921_v26, %v947_v25 }
 0x14b   : >> { %v945_v19 = vpop.permute.xlu1 %944 }
 0x14c   : >> { %v948_v43 = vadd.f32 %v945_v19, %v926_v51  ;;  %v2372_v51 = vld [vmem:[%s2635_s14] sm:$0xff] }
 0x14d   : >> { %1276 = vperm.xlu1 %2363, %v2631_v9  }
 0x14e   : >> { %v950_v37 = vmax.f32 %v922_v62, %v948_v43 }
 0x150   : >> { %v978_v4 = vmax.f32 %v950_v37, %v976_v1  ;;  %v961_v32 = vpop.permute.xlu1 %960 }
 0x151   : >> { %1280 = vperm.xlu1 %2363, %v3315_v36   ;;  %v964_v18 = vsub.f32 %v954_v57, %v961_v32  ;;  %v1094_v32 = vrot.slane %v3326_v34, %v2885_v33 }
 0x153   : >> { %v966_v13 = vmin.f32 %v938_v42, %v964_v18 }
 0x154   : >> { %v969_v45 = vpop.permute.xlu1 %968 }
 0x155   : >> { %2366 = vset.pattern.permute.xlu1 %v3331_v40  ;;  %v994_v52 = vmin.f32 %v966_v13, %v992_v55  ;;  %v975_v9 = vadd.f32 %v969_v45, %v954_v57  ;;  %v3334_v57 = vmov 31  }
 0x156   : >> { %1296 = vperm.xlu1 %2366, %v2648_v16   ;;  %v1029_v16 = vpop.permute.xlu0 %1028 }
 0x157   : >> { %v977_v3 = vmax.f32 %v949_v6, %v975_v9  ;;  %v1032_v62 = vadd.f32 %v1029_v16, %v1010_v38 }
 0x159   : >> { %v985_v36 = vpop.permute.xlu1 %984 }
 0x15a   : >> { %1304 = vperm.xlu1 %2366, %v2371_v30   ;;  %v991_v20 = vsub.f32 %v982_v49, %v985_v36  ;;  %v1045_v23 = vpop.permute.xlu0 %1044 }
 0x15b   : >> { %v1048_v42 = vsub.f32 %v1038_v0, %v1045_v23 }
 0x15c   : >> { %v993_v21 = vmin.f32 %v965_v12, %v991_v20 }
 0x15d   : >> { %v997_v58 = vpop.permute.xlu1 %996 }
 0x15e   : >> { %2367 = vset.pattern.permute.xlu1 %v3333_v14  ;;  %v1021_v60 = vmin.f32 %v993_v21, %v1019_v7  ;;  %v1003_v22 = vadd.f32 %v997_v58, %v982_v49  ;;  %v1069_v15 = vpop.permute.xlu0 %1068 }
 0x15f   : >> { %1320 = vperm.xlu1 %2367, %v2372_v51   ;;  %v1075_v25 = vsub.f32 %v1066_v8, %v1069_v15 }
 0x160   : >> { %v1005_v53 = vmax.f32 %v977_v3, %v1003_v22 }
 0x161   : >> { %v1001_v39 = vpop.permute.xlu1 %1000 }
 0x162   : >> { %v1004_v17 = vadd.f32 %v1001_v39, %v982_v49  ;;  %v1085_v1 = vpop.permute.xlu0 %1084 }
 0x163   : >> { %1332 = vperm.xlu1 %2367, %v2371_v30  }
 0x164   : >> { %v1006_v31 = vmax.f32 %v978_v4, %v1004_v17  ;;  %v1088_v4 = vadd.f32 %v1085_v1, %v1066_v8 }
 0x166   : >> { %v1034_v47 = vmax.f32 %v1006_v31, %v1032_v62  ;;  %v1017_v56 = vpop.permute.xlu1 %1016  ;;  %v1101_v55 = vpop.permute.xlu0 %1100 }
 0x167   : >> { %1336 = vperm.xlu1 %2367, %v2373_v46   ;;  %v1020_v24 = vsub.f32 %v1010_v38, %v1017_v56 }
 0x169   : >> { %v1022_v27 = vmin.f32 %v994_v52, %v1020_v24  ;;  %v1104_v52 = vsub.f32 %v1094_v32, %v1101_v55 }
 0x16a   : >> { %v1025_v26 = vpop.permute.xlu1 %1024  ;;  %v1125_v20 = vpop.permute.xlu0 %1124 }
 0x16b   : >> { %2370 = vset.pattern.permute.xlu1 %v3334_v57  ;;  %v1050_v11 = vmin.f32 %v1022_v27, %v1048_v42  ;;  %v1031_v41 = vadd.f32 %v1025_v26, %v1010_v38 }
 0x16c   : >> { %1352 = vperm.xlu1 %2370, %v2374_v59  }
 0x16d   : >> { %v1033_v5 = vmax.f32 %v1005_v53, %v1031_v41 }
 0x16e   : >> { %v1141_v16 = vpop.permute.xlu0 %1140 }
 0x16f   : >> { %v1041_v2 = vpop.permute.xlu1 %1040 }
 0x170   : >> { %1360 = vperm.xlu1 %2370, %v2371_v30   ;;  %v1047_v12 = vsub.f32 %v1038_v0, %v1041_v2  ;;  %v1122_v30 = vrot.slane %v3326_v34, %v2890_v35 }
 0x172   : >> { %v1049_v28 = vmin.f32 %v1021_v60, %v1047_v12  ;;  %v1131_v14 = vsub.f32 %v1122_v30, %v1125_v20  ;;  %v1144_v62 = vadd.f32 %v1141_v16, %v1122_v30 }
 0x173   : >> { %v1053_v6 = vpop.permute.xlu1 %1052 }
 0x174   : >> { %v1077_v19 = vmin.f32 %v1049_v28, %v1075_v25  ;;  %v1059_v43 = vadd.f32 %v1053_v6, %v1038_v0 }
 0x176   : >> { %v1061_v49 = vmax.f32 %v1033_v5, %v1059_v43 }
 0x177   : >> { %v1057_v37 = vpop.permute.xlu1 %1056 }
 0x178   : >> { %v1060_v54 = vadd.f32 %v1057_v37, %v1038_v0  ;;  %v3335_v0 = vld [vmem:[#allocation27_spill] sm:$0xff] }
 0x179   : >> { %v1150_v31 = vrot.slane %v3335_v0, %v3325_v10 }
 0x17a   : >> { %v1062_v18 = vmax.f32 %v1034_v47, %v1060_v54  ;;  %v1157_v47 = vpop.permute.xlu0 %1156 }
 0x17b   : >> { %v1160_v24 = vsub.f32 %v1150_v31, %v1157_v47 }
 0x17c   : >> { %v1090_v13 = vmax.f32 %v1062_v18, %v1088_v4  ;;  %v1073_v40 = vpop.permute.xlu1 %1072 }
 0x17d   : >> { %v1076_v45 = vsub.f32 %v1066_v8, %v1073_v40 }
 0x17e   : >> { %v1181_v59 = vpop.permute.xlu0 %1180 }
 0x17f   : >> { %v1078_v9 = vmin.f32 %v1050_v11, %v1076_v45  ;;  %v1178_v11 = vrot.slane %v3335_v0, %v3328_v44 }
 0x180   : >> { %v1081_v38 = vpop.permute.xlu1 %1080 }
 0x181   : >> { %v1106_v3 = vmin.f32 %v1078_v9, %v1104_v52  ;;  %v1087_v48 = vadd.f32 %v1081_v38, %v1066_v8  ;;  %v1187_v15 = vsub.f32 %v1178_v11, %v1181_v59  ;;  %v1234_v52 = vrot.slane %v3335_v0, %v3332_v29 }
 0x182   : >> { %v1197_v28 = vpop.permute.xlu0 %1196 }
 0x183   : >> { %v1089_v36 = vmax.f32 %v1061_v49, %v1087_v48  ;;  %v1200_v1 = vadd.f32 %v1197_v28, %v1178_v11  ;;  %v1206_v49 = vrot.slane %v3335_v0, %v3330_v50 }
 0x185   : >> { %v1097_v7 = vpop.permute.xlu1 %1096 }
 0x186   : >> { %v1103_v21 = vsub.f32 %v1094_v32, %v1097_v7  ;;  %v1213_v54 = vpop.permute.xlu0 %1212 }
 0x187   : >> { %v1216_v18 = vsub.f32 %v1206_v49, %v1213_v54 }
 0x188   : >> { %v1105_v58 = vmin.f32 %v1077_v19, %v1103_v21 }
 0x189   : >> { %v1109_v60 = vpop.permute.xlu1 %1108 }
 0x18a   : >> { %v1133_v22 = vmin.f32 %v1105_v58, %v1131_v14  ;;  %v1115_v51 = vadd.f32 %v1109_v60, %v1094_v32  ;;  %v1237_v38 = vpop.permute.xlu0 %1236 }
 0x18c   : >> { %v1117_v53 = vmax.f32 %v1089_v36, %v1115_v51  ;;  %v1262_v51 = vrot.slane %v3335_v0, %v3306_v61 }
 0x18d   : >> { %v1113_v39 = vpop.permute.xlu1 %1112 }
 0x18e   : >> { %v1116_v17 = vadd.f32 %v1113_v39, %v1094_v32  ;;  %v1253_v14 = vpop.permute.xlu0 %1252 }
 0x18f   : >> { %v1256_v60 = vadd.f32 %v1253_v14, %v1234_v52 }
 0x190   : >> { %v1118_v23 = vmax.f32 %v1090_v13, %v1116_v17 }
 0x192   : >> { %v1146_v34 = vmax.f32 %v1118_v23, %v1144_v62  ;;  %v1129_v46 = vpop.permute.xlu1 %1128 }
 0x193   : >> { %v1132_v56 = vsub.f32 %v1122_v30, %v1129_v46  ;;  %v1290_v46 = vrot.slane %v3335_v0, %v3317_v63 }
 0x195   : >> { %v1134_v42 = vmin.f32 %v1106_v3, %v1132_v56 }
 0x196   : >> { %v1137_v27 = vpop.permute.xlu1 %1136 }
 0x197   : >> { %v1162_v57 = vmin.f32 %v1134_v42, %v1160_v24  ;;  %v1143_v26 = vadd.f32 %v1137_v27, %v1122_v30  ;;  %v1243_v30 = vsub.f32 %v1234_v52, %v1237_v38 }
 0x199   : >> { %v1145_v41 = vmax.f32 %v1117_v53, %v1143_v26  ;;  %v1269_v53 = vpop.permute.xlu0 %1268 }
 0x19a   : >> { %v1272_v17 = vsub.f32 %v1262_v51, %v1269_v53 }
 0x19c   : >> { %v1153_v8 = vpop.permute.xlu1 %1152 }
 0x19d   : >> { %v1159_v5 = vsub.f32 %v1150_v31, %v1153_v8  ;;  %v1293_v24 = vpop.permute.xlu0 %1292 }
 0x19e   : >> { %v1299_v27 = vsub.f32 %v1290_v46, %v1293_v24 }
 0x19f   : >> { %v1161_v2 = vmin.f32 %v1133_v22, %v1159_v5 }
 0x1a0   : >> { %v1165_v10 = vpop.permute.xlu1 %1164 }
 0x1a1   : >> { %v1189_v12 = vmin.f32 %v1161_v2, %v1187_v15  ;;  %v1171_v25 = vadd.f32 %v1165_v10, %v1150_v31  ;;  %v1309_v5 = vpop.permute.xlu0 %1308 }
 0x1a2   : >> { %v1312_v2 = vadd.f32 %v1309_v5, %v1290_v46 }
 0x1a3   : >> { %v1173_v6 = vmax.f32 %v1145_v41, %v1171_v25 }
 0x1a4   : >> { %v1169_v19 = vpop.permute.xlu1 %1168 }
 0x1a5   : >> { %v1172_v43 = vadd.f32 %v1169_v19, %v1150_v31 }
 0x1a7   : >> { %v1174_v37 = vmax.f32 %v1146_v34, %v1172_v43 }
 0x1a9   : >> { %v1202_v44 = vmax.f32 %v1174_v37, %v1200_v1  ;;  %v1185_v4 = vpop.permute.xlu1 %1184 }
 0x1aa   : >> { %v1188_v32 = vsub.f32 %v1178_v11, %v1185_v4 }
 0x1ac   : >> { %v1190_v55 = vmin.f32 %v1162_v57, %v1188_v32 }
 0x1ad   : >> { %v1193_v13 = vpop.permute.xlu1 %1192 }
 0x1ae   : >> { %v1218_v40 = vmin.f32 %v1190_v55, %v1216_v18  ;;  %v1199_v45 = vadd.f32 %v1193_v13, %v1178_v11 }
 0x1b0   : >> { %v1201_v9 = vmax.f32 %v1173_v6, %v1199_v45  ;;  %v1325_v6 = vpop.permute.xlu0 %1324 }
 0x1b2   : >> { %v1209_v3 = vpop.permute.xlu1 %1208 }
 0x1b3   : >> { %v1215_v48 = vsub.f32 %v1206_v49, %v1209_v3 }
 0x1b4   : >> { %v1349_v18 = vpop.permute.xlu0 %1348 }
 0x1b5   : >> { %v1217_v36 = vmin.f32 %v1189_v12, %v1215_v48  ;;  %v1318_v12 = vrot.slane %v3335_v0, %v2885_v33 }
 0x1b6   : >> { %v1221_v50 = vpop.permute.xlu1 %1220 }
 0x1b7   : >> { %v1245_v20 = vmin.f32 %v1217_v36, %v1243_v30  ;;  %v1227_v7 = vadd.f32 %v1221_v50, %v1206_v49  ;;  %v1328_v19 = vsub.f32 %v1318_v12, %v1325_v6 }
 0x1b9   : >> { %v1229_v21 = vmax.f32 %v1201_v9, %v1227_v7  ;;  %v1365_v9 = vpop.permute.xlu0 %1364 }
 0x1ba   : >> { %v1225_v58 = vpop.permute.xlu1 %1224 }
 0x1bb   : >> { %v1228_v22 = vadd.f32 %v1225_v58, %v1206_v49 }
 0x1bd   : >> { %v1230_v16 = vmax.f32 %v1202_v44, %v1228_v22  ;;  %v1346_v44 = vrot.slane %v3335_v0, %v2890_v35 }
 0x1bf   : >> { %v1241_v29 = vpop.permute.xlu1 %1240  ;;  %v1258_v39 = vmax.f32 %v1230_v16, %v1256_v60  ;;  %v1355_v55 = vsub.f32 %v1346_v44, %v1349_v18  ;;  %v1368_v48 = vadd.f32 %v1365_v9, %v1346_v44 }
 0x1c0   : >> { %v1244_v62 = vsub.f32 %v1234_v52, %v1241_v29 }
 0x1c2   : >> { %v1246_v31 = vmin.f32 %v1218_v40, %v1244_v62 }
 0x1c3   : >> { %v1249_v23 = vpop.permute.xlu1 %1248 }
 0x1c4   : >> { %v1255_v47 = vadd.f32 %v1249_v23, %v1234_v52  ;;  %v1274_v34 = vmin.f32 %v1246_v31, %v1272_v17 }
 0x1c6   : >> { %v1257_v56 = vmax.f32 %v1229_v21, %v1255_v47 }
 0x1c8   : >> { %v1265_v42 = vpop.permute.xlu1 %1264 }
 0x1c9   : >> { %v1271_v57 = vsub.f32 %v1262_v51, %v1265_v42 }
 0x1cb   : >> { %v1273_v26 = vmin.f32 %v1245_v20, %v1271_v57 }
 0x1cc   : >> { %v1277_v61 = vpop.permute.xlu1 %1276 }
 0x1cd   : >> { %v1283_v11 = vadd.f32 %v1277_v61, %v1262_v51  ;;  %v1301_v41 = vmin.f32 %v1273_v26, %v1299_v27 }
 0x1cf   : >> { %v1285_v59 = vmax.f32 %v1257_v56, %v1283_v11 }
 0x1d0   : >> { %v1281_v8 = vpop.permute.xlu1 %1280 }
 0x1d1   : >> { %v1284_v15 = vadd.f32 %v1281_v8, %v1262_v51 }
 0x1d3   : >> { %v1286_v10 = vmax.f32 %v1258_v39, %v1284_v15 }
 0x1d5   : >> { %v1297_v25 = vpop.permute.xlu1 %1296  ;;  %v1314_v63 = vmax.f32 %v1286_v10, %v1312_v2 }
 0x1d6   : >> { %v1300_v28 = vsub.f32 %v1290_v46, %v1297_v25 }
 0x1d8   : >> { %v1302_v43 = vmin.f32 %v1274_v34, %v1300_v28 }
 0x1d9   : >> { %v1305_v1 = vpop.permute.xlu1 %1304 }
 0x1da   : >> { %v1311_v49 = vadd.f32 %v1305_v1, %v1290_v46  ;;  %v1330_v37 = vmin.f32 %v1302_v43, %v1328_v19 }
 0x1dc   : >> { %v1313_v54 = vmax.f32 %v1285_v59, %v1311_v49 }
 0x1de   : >> { %v1321_v4 = vpop.permute.xlu1 %1320 }
 0x1df   : >> { %v1327_v32 = vsub.f32 %v1318_v12, %v1321_v4 }
 0x1e1   : >> { %v1329_v13 = vmin.f32 %v1301_v41, %v1327_v32 }
 0x1e2   : >> { %v1333_v40 = vpop.permute.xlu1 %1332 }
 0x1e3   : >> { %v3150_v7 = vmin.f32 %v1329_v13, %v1355_v55   ;;  %v1339_v45 = vadd.f32 %v1333_v40, %v1318_v12 }
 0x1e5   : >> { %v3336_v33 = vmov %v3150_v7  ;;  %v1341_v52 = vmax.f32 %v1313_v54, %v1339_v45 }
 0x1e6   : >> { %v1337_v38 = vpop.permute.xlu1 %1336  ;;  %v3343_v7 = vmov %v3336_v33 }
 0x1e7   : >> { %v1340_v3 = vadd.f32 %v1337_v38, %v1318_v12 }
 0x1e9   : >> { %v1342_v30 = vmax.f32 %v1314_v63, %v1340_v3 }
 0x1eb   : >> { %v3152_v4 = vmax.f32 %v1342_v30, %v1368_v48   ;;  %v1353_v50 = vpop.permute.xlu1 %1352 }
 0x1ec   : >> { %v1356_v20 = vsub.f32 %v1346_v44, %v1353_v50 }
 0x1ed   : >> { %v3337_v36 = vmov %v3152_v4 }
 0x1ee   : >> { %v3154_v6 = vmin.f32 %v1330_v37, %v1356_v20   ;;  %v3340_v4 = vmov %v3337_v36 }
 0x1ef   : >> { %v1361_v0 = vpop.permute.xlu1 %1360  ;;  %334 = sbr.rel (!%p332_p4) target bundleno = 20 (0x14), region = 112 }
 0x1f0   : >> { %v3338_v35 = vmov %v3154_v6  ;;  %v1367_v21 = vadd.f32 %v1361_v0, %v1346_v44 }
 0x1f1   : >> { %v3342_v6 = vmov %v3338_v35 }
 0x1f2   : >> { %v3156_v5 = vmax.f32 %v1341_v52, %v1367_v21  }
 0x1f4   : >> { %v3339_v14 = vmov %v3156_v5 }
 0x1f5   : >> { %v3341_v5 = vmov %v3339_v14 }
 0x1f6   : > { %1374 = sbr.rel (%p1938_p5) target bundleno = 775 (0x307), region = 63  ;;  %v2134_v7 = vpack.c.bf16 (!%p1938_p5), %v3338_v35, %v3336_v33  ;;  %v2138_v58 = vpack.c.bf16 (!%p1938_p5), %v3337_v36, %v3339_v14  ;;  %v1375_v60 = vld [vmem:[%s3238_s4] sm:$0xff] (!%p1938_p5)  ;;  %vm1389_vm0 = vcmask (!%p1938_p5), 261120   ;;  %v2497_v51 = vmov (!%p1938_p5), 0   ;;  %v1378_v16 = vld [vmem:[%s3239_s5 + $0x8] sm:$0xff] (!%p1938_p5) }
 0x1f7   : > { %v1377_v22 = vld [vmem:[%s3239_s5] sm:$0xff] (!%p1938_p5)  ;;  %2050 = vmatprep.mubr.msk.f32.mxu0 (!%p1938_p5), %vm1389_vm0, %v1375_v60  ;;  %2375 = vset.pattern.permute.xlu0 (!%p1938_p5), %v2497_v51  ;;  %v1376_v53 = vld [vmem:[%s3238_s4 + $0x8] sm:$0xff] (!%p1938_p5)  ;;  %v2498_v38 = vmov (!%p1938_p5), -1.0  }
 0x1f8   : > { %2135 = vmatprep.subr.bf16.mxu0 (!%p1938_p5), %v2134_v7  ;;  %1381 = vperm.xlu0 (!%p1938_p5), %2375, %v1377_v22  }
 0x1f9   : > { %2137 = vmatpush3.bf16.msra.mxu0 (!%p1938_p5), %v2134_v7 }
 0x1fa   : > { %2139 = vmatprep.subr.bf16.mxu0 (!%p1938_p5), %v2138_v58 }
 0x1fc   : > { %1386 = vperm.xlu0 (!%p1938_p5), %2375, %v1378_v16  }
 0x1fd   : > { %2141 = vmatpush3.bf16.msra.mxu0 %v2138_v58 }
 0x200   : > { %2051 = vmatmul.mubr.msk.f32.vlgmr.msra.gmra.mrb[0].mxu0 %vm1389_vm0, %v1376_v53 }
 0x277   : > { %v1382_v29 = vpop.permute.xlu0 %1381 }
 0x27b   : > { %v1387_v39 = vpop.permute.xlu0 %1386 }
 0x2d3   : > { %v2052_v17 = vpop.f32.mrb[0].mxu0 }
 0x2d4   : > { %v1468_v62 = vadd.f32 %v2052_v17, %v1387_v39  ;;  %v1462_v31 = vpop.f32.mrb[1].mxu0 }
 0x2d5   : > { %v1463_v23 = vadd.f32 %v1462_v31, %v1382_v29 }
 0x2d6   : > { %v1474_v47 = vmul.f32 0.70710677, %v1468_v62  ;;  %v1472_v0 = vmul.f32 0.5, %v1468_v62 }
 0x2d7   : > { %v1473_v34 = vmul.f32 0.70710677, %v1463_v23  ;;  %v1471_v7 = vmul.f32 0.5, %v1463_v23 }
 0x2d8   : > { %v1480_v46 = vand.u32 2147483647, %v1474_v47  ;;  %vm1476_vm1 = vcmp.ge.f32.partialorder %v1474_v47, 0.0 }
 0x2d9   : > { %v1479_v56 = vand.u32 2147483647, %v1473_v34  ;;  %vm1475_vm2 = vcmp.ge.f32.partialorder %v1473_v34, 0.0  ;;  %v1478_v3 = vsel %vm1476_vm1, 1.0, %v2498_v38 }
 0x2da   : > { %v1482_v24 = vmul.f32 0.3275911, %v1480_v46  ;;  %v1508_v26 = vsub.f32 0.0, %v1480_v46  ;;  %v1477_v50 = vsel %vm1475_vm2, 1.0, %v2498_v38 }
 0x2db   : > { %v1481_v42 = vmul.f32 0.3275911, %v1479_v56  ;;  %v1507_v61 = vsub.f32 0.0, %v1479_v56 }
 0x2dc   : > { %v1484_v27 = vadd.f32 1.0, %v1482_v24  ;;  %v1510_v41 = vmul.f32 %v1508_v26, %v1480_v46 }
 0x2dd   : > { %v1483_v57 = vadd.f32 1.0, %v1481_v42  ;;  %v1509_v5 = vmul.f32 %v1507_v61, %v1479_v56 }
 0x2de   : > { %2376 = vrcp.f32 %v1484_v27  ;;  %v1513_v10 = vmul.f32 1.442695, %v1510_v41 }
 0x2df   : > { %2378 = vrcp.f32 %v1483_v57  ;;  %v1511_v63 = vmul.f32 1.442695, %v1509_v5 }
 0x2e0   : > { %2380 = vpow2.f32 %v1513_v10 }
 0x2e1   : > { %2382 = vpow2.f32 %v1511_v63 }
 0x2e8   : > { %v2377_v11 = vpop.eup %2376 }
 0x2e9   : > { %v2379_v59 = vpop.eup %2378  ;;  %v1490_v8 = vmul.f32 1.0614054, %v2377_v11 }
 0x2ea   : > { %v1489_v15 = vmul.f32 1.0614054, %v2379_v59  ;;  %v2381_v55 = vpop.eup %2380 }
 0x2eb   : > { %v1492_v2 = vadd.f32 -1.4531521, %v1490_v8  ;;  %v2383_v40 = vpop.eup %2382 }
 0x2ec   : > { %v1491_v12 = vadd.f32 -1.4531521, %v1489_v15 }
 0x2ed   : > { %v1494_v25 = vmul.f32 %v2377_v11, %v1492_v2 }
 0x2ee   : > { %v1493_v28 = vmul.f32 %v2379_v59, %v1491_v12 }
 0x2ef   : > { %v1496_v6 = vadd.f32 1.4214138, %v1494_v25 }
 0x2f0   : > { %v1495_v19 = vadd.f32 1.4214138, %v1493_v28 }
 0x2f1   : > { %v1498_v43 = vmul.f32 %v2377_v11, %v1496_v6 }
 0x2f2   : > { %v1497_v1 = vmul.f32 %v2379_v59, %v1495_v19 }
 0x2f3   : > { %v1500_v49 = vadd.f32 -0.28449672, %v1498_v43 }
 0x2f4   : > { %v1499_v37 = vadd.f32 -0.28449672, %v1497_v1 }
 0x2f5   : > { %v1502_v54 = vmul.f32 %v2377_v11, %v1500_v49 }
 0x2f6   : > { %v1501_v44 = vmul.f32 %v2379_v59, %v1499_v37 }
 0x2f7   : > { %v1504_v4 = vadd.f32 0.2548296, %v1502_v54 }
 0x2f8   : > { %v1503_v32 = vadd.f32 0.2548296, %v1501_v44 }
 0x2f9   : > { %v1506_v18 = vmul.f32 %v2377_v11, %v1504_v4 }
 0x2fa   : > { %v1505_v13 = vmul.f32 %v2379_v59, %v1503_v32 }
 0x2fb   : > { %v1516_v45 = vmul.f32 %v2381_v55, %v1506_v18 }
 0x2fc   : > { %v1515_v52 = vmul.f32 %v2383_v40, %v1505_v13 }
 0x2fd   : > { %v1518_v9 = vsub.f32 1.0, %v1516_v45 }
 0x2fe   : > { %v1517_v48 = vsub.f32 1.0, %v1515_v52 }
 0x2ff   : > { %v1520_v30 = vmul.f32 %v1518_v9, %v1478_v3 }
 0x300   : > { %v1519_v20 = vmul.f32 %v1517_v48, %v1477_v50 }
 0x301   : > { %v1522_v21 = vadd.f32 1.0, %v1520_v30 }
 0x302   : > { %v1521_v58 = vadd.f32 1.0, %v1519_v20 }
 0x303   : > { %v1524_v60 = vmul.f32 %v1522_v21, %v1472_v0 }
 0x304   : > { %v1523_v22 = vmul.f32 %v1521_v58, %v1471_v7 }
 0x305   : > { %1526 = vst [vmem:[%s2581_s20 + $0x8] sm:$0xff] %v1524_v60 }
 0x306   : > { %1525 = vst [vmem:[%s2581_s20] sm:$0xff] %v1523_v22 }
 0x307 PF: > { %p1941_p6 = scmp.ne.s32.totalorder %s2552_s28, 1 }
 0x308   : > { %v3193_v51 = vmov (!%p1941_p6), 0.0   ;;  %v3195_v16 = vmov (!%p1941_p6), 0.0   ;;  %s3197_s24 = smov (!%p1941_p6), 0  }
 0x309   : > { %1530 = sbr.rel (%p1941_p6) target bundleno = 1310 (0x51e), region = 67 }
 0x310 LB: >> { %2085 = vmatprep.mubr.f32.mxu0 %v3336_v33  ;;  %s1951_s28 = sshll.u32 %s2463_s24, 5  ;;  %s1944_s30 = sshll.u32 %s2463_s24, 4  ;;  %vm1667_vm3 = vcmask 261120   ;;  %s2463_s24 = sphi %s3197_s24, %s1536_s24   ;;  %v2459_v16 = vphi %v3195_v16, %v3345_v16   ;;  %v2455_v51 = vphi %v3193_v51, %v3344_v51  }
 0x311   : >> { %s1541_s29 = scalar_lea.vmem %s3235_s1, %s1951_s28  ;;  %s1664_s11 = scalar_lea.vmem %s3240_s6, %s1944_s30 }
 0x312   : >> { %v1542_v53 = vld [vmem:[%s1541_s29] sm:$0xff]  ;;  %v1543_v17 = vld [vmem:[%s1541_s29 + $0x8] sm:$0xff]  ;;  %v1544_v23 = vld [vmem:[%s1541_s29 + $0x10] sm:$0xff]  ;;  %s1536_s24 = sadd.s32 1, %s2463_s24  }
 0x313   : >> { %v2142_v29 = vunpack.c.l.s8.bf16 %v1542_v53  ;;  %v2146_v39 = vunpack.c.h.s8.bf16 %v1542_v53  ;;  %v2150_v62 = vunpack.c.l.s8.bf16 %v1543_v17  ;;  %v2154_v31 = vunpack.c.h.s8.bf16 %v1543_v17  ;;  %v1545_v46 = vld [vmem:[%s1541_s29 + $0x18] sm:$0xff]  ;;  %v1665_v42 = vld [vmem:[%s1664_s11] sm:$0xff]  ;;  %v1666_v59 = vld [vmem:[%s1664_s11 + $0x8] sm:$0xff]  ;;  %p1533_p7 = scmp.ge.s32.totalorder %s1536_s24, 9  }
 0x314   : >> { %v2158_v47 = vunpack.c.l.s8.bf16 %v1544_v23  ;;  %v2162_v34 = vunpack.c.h.s8.bf16 %v1544_v23  ;;  %v2166_v56 = vunpack.c.l.s8.bf16 %v1545_v46  ;;  %v2170_v24 = vunpack.c.h.s8.bf16 %v1545_v46  ;;  %2099 = vmatprep.mubr.msk.f32.mxu1 %vm1667_vm3, %v1665_v42  ;;  %v1751_v10 = vld [vmem:[%s3241_s7] sm:$0xff] (%p1533_p7)  ;;  %v1752_v25 = vld [vmem:[%s3241_s7 + $0x8] sm:$0xff] (%p1533_p7) }
 0x315   : >> { %2143 = vmatprep.subr.bf16.mxu0 %v2142_v29  ;;  %v2499_v12 = vmov (%p1533_p7), 0  }
 0x316   : >> { %2145 = vmatpush3.bf16.msra.mxu0 %v2142_v29  ;;  %2384 = vset.pattern.permute.xlu0 (%p1533_p7), %v2499_v12 }
 0x317   : >> { %2147 = vmatprep.subr.bf16.mxu0 %v2146_v39  ;;  %1755 = vperm.xlu0 (%p1533_p7), %2384, %v1751_v10  }
 0x31a   : >> { %2149 = vmatpush3.bf16.msra.mxu0 %v2146_v39 }
 0x31b   : >> { %2151 = vmatprep.subr.bf16.mxu0 %v2150_v62  ;;  %1760 = vperm.xlu0 (%p1533_p7), %2384, %v1752_v25  }
 0x31e   : >> { %2153 = vmatpush3.bf16.msra.mxu0 %v2150_v62 }
 0x31f   : >> { %2155 = vmatprep.subr.bf16.mxu0 %v2154_v31 }
 0x322   : >> { %2157 = vmatpush3.bf16.msra.mxu0 %v2154_v31  ;;  %v2500_v31 = vmov (%p1533_p7), -1.0  }
 0x323   : >> { %2159 = vmatprep.subr.bf16.mxu0 %v2158_v47 }
 0x326   : >> { %2161 = vmatpush3.bf16.msra.mxu0 %v2158_v47 }
 0x327   : >> { %2163 = vmatprep.subr.bf16.mxu0 %v2162_v34 }
 0x32a   : >> { %2165 = vmatpush3.bf16.msra.mxu0 %v2162_v34 }
 0x32b   : >> { %2167 = vmatprep.subr.bf16.mxu0 %v2166_v56 }
 0x32e   : >> { %2169 = vmatpush3.bf16.msra.mxu0 %v2166_v56 }
 0x32f   : >> { %2171 = vmatprep.subr.bf16.mxu0 %v2170_v24 }
 0x332   : >> { %2173 = vmatpush3.bf16.msra.mxu0 %v2170_v24 }
 0x335   : >> { %2086 = vmatmul.mubr.f32.vlgmr.msra.gmra.mrb[0].mxu0 %v3338_v35 }
 0x336   : >> { %2088 = vmatprep.mubr.f32.mxu0 %v3339_v14 }
 0x339   : >> { %2089 = vmatmul.mubr.f32.gmra.mrb[2].mxu0 %v3337_v36 }
 0x396   : > { %v1756_v63 = vpop.permute.xlu0 (%p1533_p7), %1755 }
 0x39a   : > { %v1761_v19 = vpop.permute.xlu0 (%p1533_p7), %1760 }
 0x408   : >> { %v2087_v27 = vpop.f32.mrb[0].mxu0 }
 0x409   : >> { %v1644_v57 = vpop.f32.mrb[1].mxu0 }
 0x40a   : >> { %v2174_v26 = vpack.c.bf16 %v2087_v27, %v1644_v57 }
 0x40c   : >> { %v2090_v61 = vpop.f32.mrb[2].mxu0  ;;  %2175 = vmatprep.subr.bf16.mxu1 %v2174_v26 }
 0x40d   : >> { %v1654_v11 = vpop.f32.mrb[3].mxu0  ;;  %2177 = vmatpush3.bf16.msra.mxu1 %v2174_v26 }
 0x40e   : >> { %v2178_v41 = vpack.c.bf16 %v2090_v61, %v1654_v11 }
 0x410   : >> { %2179 = vmatprep.subr.bf16.mxu1 %v2178_v41 }
 0x411   : >> { %2181 = vmatpush3.bf16.msra.mxu1 %v2178_v41 }
 0x414   : >> { %2100 = vmatmul.mubr.msk.f32.vlgmr.msra.gmra.mrb[0].mxu1 %vm1667_vm3, %v1666_v59 }
 0x4e5   : > { %1535 = sbr.rel (!%p1533_p7) target bundleno = 784 (0x310), region = 123 }
 0x4e7   : >> { %v2101_v8 = vpop.f32.mrb[0].mxu1 }
 0x4e8   : >> { %v1750_v5 = vadd.f32 %v2455_v51, %v2101_v8   ;;  %v1740_v15 = vpop.f32.mrb[1].mxu1 }
 0x4e9   : >> { %v1749_v2 = vadd.f32 %v2459_v16, %v1740_v15  }
 0x4ea   : >> { %v3344_v51 = vmov %v1750_v5  ;;  %v1764_v1 = vadd.f32 (%p1533_p7), %v1761_v19, %v1750_v5 }
 0x4eb   : >> { %v3345_v16 = vmov %v1749_v2  ;;  %v1763_v28 = vadd.f32 (%p1533_p7), %v1756_v63, %v1749_v2 }
 0x4ec   : > { %v1768_v37 = vmul.f32 0.70710677, %v1764_v1  ;;  %v1766_v26 = vmul.f32 0.5, %v1764_v1 }
 0x4ed   : > { %v1767_v6 = vmul.f32 0.70710677, %v1763_v28  ;;  %v1765_v46 = vmul.f32 0.5, %v1763_v28 }
 0x4ee   : > { %v1774_v36 = vand.u32 2147483647, %v1768_v37  ;;  %vm1770_vm5 = vcmp.ge.f32.partialorder %v1768_v37, 0.0 }
 0x4ef   : > { %v1773_v43 = vand.u32 2147483647, %v1767_v6  ;;  %vm1769_vm4 = vcmp.ge.f32.partialorder %v1767_v6, 0.0  ;;  %v1772_v42 = vsel %vm1770_vm5, 1.0, %v2500_v31 }
 0x4f0   : > { %v1776_v35 = vmul.f32 0.3275911, %v1774_v36  ;;  %v1802_v32 = vsub.f32 0.0, %v1774_v36  ;;  %v1771_v23 = vsel %vm1769_vm4, 1.0, %v2500_v31 }
 0x4f1   : > { %v1775_v49 = vmul.f32 0.3275911, %v1773_v43  ;;  %v1801_v54 = vsub.f32 0.0, %v1773_v43 }
 0x4f2   : > { %v1778_v14 = vadd.f32 1.0, %v1776_v35  ;;  %v1804_v45 = vmul.f32 %v1802_v32, %v1774_v36 }
 0x4f3   : > { %v1777_v33 = vadd.f32 1.0, %v1775_v49  ;;  %v1803_v4 = vmul.f32 %v1801_v54, %v1773_v43 }
 0x4f4   : > { %v1807_v48 = vmul.f32 1.442695, %v1804_v45 }
 0x4f5   : > { %2385 = vrcp.f32 %v1777_v33  ;;  %v1805_v40 = vmul.f32 1.442695, %v1803_v4 }
 0x4f6   : > { %2387 = vrcp.f32 %v1778_v14 }
 0x4f7   : > { %2389 = vpow2.f32 %v1805_v40 }
 0x4f8   : > { %2391 = vpow2.f32 %v1807_v48 }
 0x4ff   : > { %v2386_v44 = vpop.eup %2385 }
 0x500   : > { %v1783_v18 = vmul.f32 1.0614054, %v2386_v44  ;;  %v2388_v13 = vpop.eup %2387 }
 0x501   : > { %v1784_v9 = vmul.f32 1.0614054, %v2388_v13  ;;  %v2390_v16 = vpop.eup %2389 }
 0x502   : > { %v1785_v55 = vadd.f32 -1.4531521, %v1783_v18  ;;  %v2392_v62 = vpop.eup %2391 }
 0x503   : > { %v1786_v3 = vadd.f32 -1.4531521, %v1784_v9 }
 0x504   : > { %v1787_v52 = vmul.f32 %v2386_v44, %v1785_v55 }
 0x505   : > { %v1788_v50 = vmul.f32 %v2388_v13, %v1786_v3 }
 0x506   : > { %v1789_v38 = vadd.f32 1.4214138, %v1787_v52 }
 0x507   : > { %v1790_v0 = vadd.f32 1.4214138, %v1788_v50 }
 0x508   : > { %v1791_v30 = vmul.f32 %v2386_v44, %v1789_v38 }
 0x509   : > { %v1792_v7 = vmul.f32 %v2388_v13, %v1790_v0 }
 0x50a   : > { %v1793_v20 = vadd.f32 -0.28449672, %v1791_v30 }
 0x50b   : > { %v1794_v60 = vadd.f32 -0.28449672, %v1792_v7 }
 0x50c   : > { %v1795_v21 = vmul.f32 %v2386_v44, %v1793_v20 }
 0x50d   : > { %v1796_v51 = vmul.f32 %v2388_v13, %v1794_v60 }
 0x50e   : > { %v1797_v58 = vadd.f32 0.2548296, %v1795_v21 }
 0x50f   : > { %v1798_v29 = vadd.f32 0.2548296, %v1796_v51 }
 0x510   : > { %v1799_v22 = vmul.f32 %v2386_v44, %v1797_v58 }
 0x511   : > { %v1800_v17 = vmul.f32 %v2388_v13, %v1798_v29 }
 0x512   : > { %v1809_v53 = vmul.f32 %v2390_v16, %v1799_v22 }
 0x513   : > { %v1810_v34 = vmul.f32 %v2392_v62, %v1800_v17 }
 0x514   : > { %v1811_v39 = vsub.f32 1.0, %v1809_v53 }
 0x515   : > { %v1812_v24 = vsub.f32 1.0, %v1810_v34 }
 0x516   : > { %v1813_v47 = vmul.f32 %v1811_v39, %v1771_v23 }
 0x517   : > { %v1814_v57 = vmul.f32 %v1812_v24, %v1772_v42 }
 0x518   : > { %v1815_v56 = vadd.f32 1.0, %v1813_v47 }
 0x519   : > { %v1816_v61 = vadd.f32 1.0, %v1814_v57 }
 0x51a   : > { %v1817_v27 = vmul.f32 %v1815_v56, %v1765_v46 }
 0x51b   : > { %v1818_v11 = vmul.f32 %v1816_v61, %v1766_v26 }
 0x51c   : > { %1819 = vst [vmem:[%s2581_s20] sm:$0xff] %v1817_v27 }
 0x51d   : > { %1820 = vst [vmem:[%s2581_s20 + $0x8] sm:$0xff] %v1818_v11 }
 0x51e PF: > { %s18_s27 = sadd.s32 1, %s2431_s27  }
 0x51f   : > { %p15_p8 = scmp.ge.s32.totalorder %s18_s27, 4  }
 0x521   :  { %17 = sbr.rel (!%p15_p8) target bundleno = 1 (0x1), region = 134 }

</bundles_post_ra>
